<compile_context>
chip_gen: v7x
topology: tpu7x:2x2x1
jax: 0.10.0
libtpu: 0.0.40
codegen_flags: <defaults>
</compile_context>

<pallas_src>
import functools

import jax
import jax.numpy as jnp
import numpy as np
from jax.experimental import pallas as pl
from jax.experimental.pallas import tpu as pltpu


def day_model2_kernel(inputs_ref, data_ref,
                      wfc_ref, bfc_ref,
                      wih0h_ref, wih0f_ref, b0_ref,
                      wih1_hbm, whh0_hbm, whh1_hbm, b1_ref,
                      wfin_ref, bfin_ref,
                      fc_hid_ref, out_ref,
                      wih1_vmem, whh0_vmem, whh1_vmem, gates0_ref, dma_sem,
                      *, B, T, G):
    G3, G4 = 3 * G, 4 * G
    bf16 = jnp.bfloat16

    # ---- kick off recurrent-weight DMAs (HBM -> VMEM); overlap hoisted matmuls ----
    cp_wih1 = pltpu.make_async_copy(wih1_hbm, wih1_vmem, dma_sem.at[0])
    cp_whh0 = pltpu.make_async_copy(whh0_hbm, whh0_vmem, dma_sem.at[1])
    cp_whh1 = pltpu.make_async_copy(whh1_hbm, whh1_vmem, dma_sem.at[2])
    cp_wih1.start()
    cp_whh0.start()
    cp_whh1.start()

    # ---- fc_in + Tanh for every timestep: one lane-dense (T*B, G) matmul ----
    x_bf = inputs_ref[...].astype(bf16)                           # (T*B, H)
    fc = jnp.tanh(
        jnp.dot(x_bf, wfc_ref[...], preferred_element_type=jnp.float32)
        + bfc_ref[...])                                           # (T*B, G); lanes >= H are 0
    fc_hid_ref[...] = fc                                          # unmasked full-lane stores

    # ---- hoisted layer-0 input projection (kills concat + per-step matmul) ----
    data_bf = data_ref[...].astype(bf16)                          # (T*B, F)
    gates0_ref[...] = (
        jnp.dot(fc.astype(bf16), wih0h_ref[...],
                preferred_element_type=jnp.float32)
        + jnp.dot(data_bf, wih0f_ref[...], preferred_element_type=jnp.float32)
        + b0_ref[...])                                            # (T*B, 4G), parked in VMEM

    # Recurrent weights must be resident before the serial chain starts.
    cp_wih1.wait()
    cp_whh0.wait()
    cp_whh1.wait()
    wih1 = wih1_vmem[...]                                         # (G, 4G) bf16
    whh0 = whh0_vmem[...]
    whh1 = whh1_vmem[...]
    b1b = jnp.broadcast_to(b1_ref[...], (B, G4))                  # hoisted broadcast

    def cell(gates, c):
        # Gate columns pre-permuted to [i | f | o | g]:
        # one sigmoid over a 3G slab, one tanh over a G slab.
        ifo = jax.nn.sigmoid(gates[:, :G3])
        g = jnp.tanh(gates[:, G3:])
        c_new = ifo[:, G:2 * G] * c + ifo[:, :G] * g
        return ifo[:, 2 * G:G3] * jnp.tanh(c_new), c_new

    c1 = jnp.zeros((B, G), jnp.float32)
    h2 = jnp.zeros((B, G), jnp.float32)
    c2 = jnp.zeros((B, G), jnp.float32)
    rec0 = jnp.zeros((B, G4), jnp.float32)    # h1_{t-1} @ W_hh0 (software-pipelined)
    rec1 = jnp.zeros((B, G4), jnp.float32)    # h2_{t-1} @ W_hh1 (software-pipelined)

    # Static unroll at tiny T; per-step activations come from VMEM scratch via
    # static slices, so only the small (B, .) carries live across iterations.
    for t in range(T):
        # layer 0: no matmul on the chain (input term hoisted, recurrence pipelined)
        h1, c1 = cell(gates0_ref[t * B:(t + 1) * B, :] + rec0, c1)
        h1b = h1.astype(bf16)
        # On-chain dot (layer-1 input gates) kept separate from the W_hh0 dot,
        # which is only consumed at t+1 and can overlap cell(...) below
        # (avoids sitting on the sequential MRF drain on v5e/v6e).
        g1 = jnp.dot(h1b, wih1, preferred_element_type=jnp.float32)     # (B, 4G)
        rec0 = jnp.dot(h1b, whh0, preferred_element_type=jnp.float32)   # (B, 4G)
        h2, c2 = cell(g1 + rec1 + b1b, c2)
        if t + 1 < T:
            rec1 = jnp.dot(h2.astype(bf16), whh1,
                           preferred_element_type=jnp.float32)

    # ---- fc_final on last timestep: VPU multiply + lane reduction (no MXU) ----
    out_ref[...] = (jnp.sum(h2 * wfin_ref[...], axis=-1, keepdims=True)
                    + bfin_ref[...])


def _prepare_kernel_params(params, H, F, D, G):
    """Pad / reorder / fuse canonical (pre-transposed) params for the kernel.

    Gate column order is permuted from PyTorch (i, f, g, o) to (i, f, o, g) so
    the kernel can do one sigmoid over the first 3G lanes and one tanh over the
    last G lanes.  All matmul weights are cast to bf16; biases stay f32.
    """
    bf16 = jnp.bfloat16
    PERM = (0, 1, 3, 2)   # (i, f, g, o) -> (i, f, o, g)

    def pad_gate_cols(w):                     # (R, 4D) -> (R, 4G), per-gate zero pad
        r = w.shape[0]
        w4 = w.reshape(r, 4, D)[:, PERM, :]
        w4 = jnp.pad(w4, ((0, 0), (0, 0), (0, G - D)))
        return w4.reshape(r, 4 * G)

    def pad_rows(w, rows):                    # (R, C) -> (rows, C)
        return jnp.pad(w, ((0, rows - w.shape[0]), (0, 0)))

    wih0 = params['wih0']                                              # (D, 4D)
    wih0h = pad_rows(pad_gate_cols(wih0[:H, :]), G).astype(bf16)       # (G, 4G)
    wih0f = pad_gate_cols(wih0[H:, :]).astype(bf16)                    # (F, 4G)
    b0 = pad_gate_cols(params['b0'])                                   # (1, 4G) f32

    wih1 = pad_rows(pad_gate_cols(params['wih1']), G).astype(bf16)     # (G, 4G)
    whh0 = pad_rows(pad_gate_cols(params['whh0']), G).astype(bf16)     # (G, 4G)
    whh1 = pad_rows(pad_gate_cols(params['whh1']), G).astype(bf16)     # (G, 4G)
    b1 = pad_gate_cols(params['b1'])                                   # (1, 4G) f32

    wfc = jnp.pad(params['wfc'], ((0, 0), (0, G - H))).astype(bf16)    # (H, G)
    bfc = jnp.pad(params['bfc'], ((0, 0), (0, G - H)))                 # (1, G) f32
    wfin = jnp.pad(params['wfin'][:, 0][None, :], ((0, 0), (0, G - D)))  # (1, G) f32

    return dict(wfc=wfc, bfc=bfc, wih0h=wih0h, wih0f=wih0f, b0=b0,
                wih1=wih1, whh0=whh0, whh1=whh1, b1=b1,
                wfin=wfin, bfin=params['bfin'])


def day_model2_forward(inputs, data, params):
    B, T, H = inputs.shape
    F = data.shape[2]
    D = H + F
    G = 128                      # padded per-gate lane width (lane-aligned gates)
    assert D <= G and H <= G

    kp = _prepare_kernel_params(params, H, F, D, G)

    # Time-major, flattened to 2-D outside the kernel (cheap XLA transposes):
    # row t*B + b  <->  (batch b, time t).
    inputs_tm = jnp.transpose(inputs, (1, 0, 2)).reshape(T * B, H)
    data_tm = jnp.transpose(data, (1, 0, 2)).reshape(T * B, F)

    vmem = pl.BlockSpec(memory_space=pltpu.MemorySpace.VMEM)
    hbm = pl.BlockSpec(memory_space=pl.ANY)   # big recurrent weights: DMA'd in-kernel

    args = (inputs_tm, data_tm,
            kp['wfc'], kp['bfc'],
            kp['wih0h'], kp['wih0f'], kp['b0'],
            kp['wih1'], kp['whh0'], kp['whh1'], kp['b1'],
            kp['wfin'], kp['bfin'])
    in_specs = [vmem, vmem,
                vmem, vmem,
                vmem, vmem, vmem,
                hbm, hbm, hbm, vmem,
                vmem, vmem]

    fc_flat, out = pl.pallas_call(
        functools.partial(day_model2_kernel, B=B, T=T, G=G),
        out_shape=(
            jax.ShapeDtypeStruct((T * B, G), jnp.float32),   # lane-dense fc_hid slab
            jax.ShapeDtypeStruct((B, 1), jnp.float32),
        ),
        in_specs=in_specs,
        out_specs=(vmem, vmem),
        scratch_shapes=[
            pltpu.VMEM((G, 4 * G), jnp.bfloat16),            # W_ih1
            pltpu.VMEM((G, 4 * G), jnp.bfloat16),            # W_hh0
            pltpu.VMEM((G, 4 * G), jnp.bfloat16),            # W_hh1
            pltpu.VMEM((T * B, 4 * G), jnp.float32),         # hoisted layer-0 gates
            pltpu.SemaphoreType.DMA((3,)),
        ],
    )(*args)

    # Back to batch-first (B, T, H): slice off padded lanes, reshape, transpose.
    fc_hid = jnp.transpose(fc_flat.reshape(T, B, G)[:, :, :H], (1, 0, 2))
    return fc_hid, out[:, 0]


def make_params(key, H, F):
    """Deterministic init mimicking PyTorch default uniform(-1/sqrt(fan), +)."""
    D = H + F
    ks = jax.random.split(key, 16)

    def u(k, shape, fan):
        bound = 1.0 / np.sqrt(fan)
        return jax.random.uniform(k, shape, jnp.float32, -bound, bound)

    # fc_in: Linear(H -> H); stored transposed (in, out)
    wfc = u(ks[0], (H, H), H)
    bfc = u(ks[1], (1, H), H)
    # LSTM layer 0: input D -> hidden D  (weights transposed to (in, 4D))
    wih0 = u(ks[2], (D, 4 * D), D)
    whh0 = u(ks[3], (D, 4 * D), D)
    b0 = u(ks[4], (1, 4 * D), D) + u(ks[5], (1, 4 * D), D)   # b_ih + b_hh
    # LSTM layer 1: input D -> hidden D
    wih1 = u(ks[6], (D, 4 * D), D)
    whh1 = u(ks[7], (D, 4 * D), D)
    b1 = u(ks[8], (1, 4 * D), D) + u(ks[9], (1, 4 * D), D)
    # fc_final: Linear(D -> 1)
    wfin = u(ks[10], (D, 1), D)
    bfin = u(ks[11], (1, 1), D)

    return dict(wfc=wfc, bfc=bfc, wih0=wih0, whh0=whh0, b0=b0,
                wih1=wih1, whh1=whh1, b1=b1, wfin=wfin, bfin=bfin)


def reference_forward(inputs, data, params, matmul_dtype=None):
    """Pure-JAX reference (un-padded params, PyTorch gate order).

    matmul_dtype=None      -> plain f32 semantics (PyTorch-equivalent).
    matmul_dtype=bfloat16  -> mirrors the kernel's bf16-operand matmuls.
    """
    B, T, H = inputs.shape
    F = data.shape[2]
    D = H + F

    def mm(a, b):
        if matmul_dtype is not None:
            a = a.astype(matmul_dtype)
            b = b.astype(matmul_dtype)
        return jnp.dot(a, b, preferred_element_type=jnp.float32)

    fc_hid = jnp.tanh(mm(inputs, params['wfc']) + params['bfc'][0])
    x = jnp.concatenate([fc_hid, data], axis=2)

    def cell(x_t, h, c, wih, whh, b):
        g = mm(x_t, wih) + mm(h, whh) + b
        i = jax.nn.sigmoid(g[:, 0:D])
        f = jax.nn.sigmoid(g[:, D:2 * D])
        gg = jnp.tanh(g[:, 2 * D:3 * D])
        o = jax.nn.sigmoid(g[:, 3 * D:4 * D])
        c = f * c + i * gg
        return o * jnp.tanh(c), c

    h1 = c1 = h2 = c2 = jnp.zeros((B, D), jnp.float32)
    for t in range(T):
        h1, c1 = cell(x[:, t, :], h1, c1, params['wih0'], params['whh0'],
                      params['b0'][0])
        h2, c2 = cell(h1, h2, c2, params['wih1'], params['whh1'],
                      params['b1'][0])
    out = jnp.dot(h2, params['wfin'],
                  preferred_element_type=jnp.float32) + params['bfin'][0]
    return fc_hid, out[:, 0]


if __name__ == "__main__":
    B, T, H, F = 2, 8, 32, 4     # batch, input_day, hid_size, input_size

    key = jax.random.PRNGKey(0)
    k_in, k_data, k_param = jax.random.split(key, 3)
    inputs = jax.random.normal(k_in, (B, T, H), jnp.float32)   # day reps
    data = jax.random.normal(k_data, (B, T, F), jnp.float32)   # permuted raw data
    params = make_params(k_param, H, F)

    fc_hid, pred = jax.jit(day_model2_forward)(inputs, data, params)
    jax.block_until_ready((fc_hid, pred))

    assert fc_hid.shape == (B, T, H) and pred.shape == (B,)

    # Tight check: reference that mirrors the kernel's bf16-operand matmuls.
    fc_refb, pred_refb = reference_forward(inputs, data, params,
                                           matmul_dtype=jnp.bfloat16)
    assert jnp.allclose(fc_hid, fc_refb, atol=2e-2, rtol=2e-2)
    assert jnp.allclose(pred, pred_refb, atol=2e-2, rtol=2e-2)

    # Sanity check vs the full-f32 PyTorch-style reference (documented bf16
    # precision trade-off -> loose tolerance).
    fc_ref, pred_ref = reference_forward(inputs, data, params)
    assert jnp.allclose(fc_hid, fc_ref, atol=5e-2, rtol=5e-2)
    assert jnp.allclose(pred, pred_ref, atol=2.5e-1, rtol=2.5e-1)

    print("KERNEL_OK")
</pallas_src>

<mosaic_0001>
module attributes {stable_mosaic.version = 11 : i64} {
  func.func @day_model2_kernel(%arg0: memref<16x32xf32, #tpu.memory_space<vmem>>, %arg1: memref<16x4xf32, #tpu.memory_space<vmem>>, %arg2: memref<32x128xbf16, #tpu.memory_space<vmem>>, %arg3: memref<1x128xf32, #tpu.memory_space<vmem>>, %arg4: memref<128x512xbf16, #tpu.memory_space<vmem>>, %arg5: memref<4x512xbf16, #tpu.memory_space<vmem>>, %arg6: memref<1x512xf32, #tpu.memory_space<vmem>>, %arg7: memref<128x512xbf16, #tpu.memory_space<any>>, %arg8: memref<128x512xbf16, #tpu.memory_space<any>>, %arg9: memref<128x512xbf16, #tpu.memory_space<any>>, %arg10: memref<1x512xf32, #tpu.memory_space<vmem>>, %arg11: memref<1x128xf32, #tpu.memory_space<vmem>>, %arg12: memref<1x1xf32, #tpu.memory_space<vmem>>, %arg13: memref<16x128xf32, #tpu.memory_space<vmem>>, %arg14: memref<2x1xf32, #tpu.memory_space<vmem>>, %arg15: memref<128x512xbf16, #tpu.memory_space<vmem>>, %arg16: memref<128x512xbf16, #tpu.memory_space<vmem>>, %arg17: memref<128x512xbf16, #tpu.memory_space<vmem>>, %arg18: memref<16x512xf32, #tpu.memory_space<vmem>>, %arg19: memref<3x!tpu.dma_semaphore, #tpu.memory_space<semaphore_mem>>) attributes {dimension_semantics = [], scalar_prefetch = 0 : i64, scratch_operands = 5 : i64, tpu.core_type = #tpu.core_type<tc>} {
    %c0_i32 = arith.constant 0 : i32
    %0 = tpu.memref_slice %arg19[%c0_i32] : memref<3x!tpu.dma_semaphore, #tpu.memory_space<semaphore_mem>> -> memref<1x!tpu.dma_semaphore, #tpu.memory_space<semaphore_mem>>
    %1 = tpu.memref_squeeze %0 : memref<1x!tpu.dma_semaphore, #tpu.memory_space<semaphore_mem>> -> memref<!tpu.dma_semaphore, #tpu.memory_space<semaphore_mem>>
    tpu.enqueue_dma source(%arg7 : memref<128x512xbf16, #tpu.memory_space<any>>) target(%arg15 : memref<128x512xbf16, #tpu.memory_space<vmem>>) target_semaphore(%1 : memref<!tpu.dma_semaphore, #tpu.memory_space<semaphore_mem>>)
    %c1_i32 = arith.constant 1 : i32
    %2 = tpu.memref_slice %arg19[%c1_i32] : memref<3x!tpu.dma_semaphore, #tpu.memory_space<semaphore_mem>> -> memref<1x!tpu.dma_semaphore, #tpu.memory_space<semaphore_mem>>
    %3 = tpu.memref_squeeze %2 : memref<1x!tpu.dma_semaphore, #tpu.memory_space<semaphore_mem>> -> memref<!tpu.dma_semaphore, #tpu.memory_space<semaphore_mem>>
    tpu.enqueue_dma source(%arg8 : memref<128x512xbf16, #tpu.memory_space<any>>) target(%arg16 : memref<128x512xbf16, #tpu.memory_space<vmem>>) target_semaphore(%3 : memref<!tpu.dma_semaphore, #tpu.memory_space<semaphore_mem>>)
    %c2_i32 = arith.constant 2 : i32
    %4 = tpu.memref_slice %arg19[%c2_i32] : memref<3x!tpu.dma_semaphore, #tpu.memory_space<semaphore_mem>> -> memref<1x!tpu.dma_semaphore, #tpu.memory_space<semaphore_mem>>
    %5 = tpu.memref_squeeze %4 : memref<1x!tpu.dma_semaphore, #tpu.memory_space<semaphore_mem>> -> memref<!tpu.dma_semaphore, #tpu.memory_space<semaphore_mem>>
    tpu.enqueue_dma source(%arg9 : memref<128x512xbf16, #tpu.memory_space<any>>) target(%arg17 : memref<128x512xbf16, #tpu.memory_space<vmem>>) target_semaphore(%5 : memref<!tpu.dma_semaphore, #tpu.memory_space<semaphore_mem>>)
    %c0 = arith.constant 0 : index
    %c0_0 = arith.constant 0 : index
    %6 = vector.load %arg0[%c0, %c0_0] : memref<16x32xf32, #tpu.memory_space<vmem>>, vector<16x32xf32>
    %7 = arith.truncf %6 : vector<16x32xf32> to vector<16x32xbf16>
    %c0_1 = arith.constant 0 : index
    %c0_2 = arith.constant 0 : index
    %8 = vector.load %arg2[%c0_1, %c0_2] : memref<32x128xbf16, #tpu.memory_space<vmem>>, vector<32x128xbf16>
    %cst = arith.constant dense<0.000000e+00> : vector<16x128xf32>
    %9 = tpu.matmul %7, %8, %cst {dimension_numbers = #tpu.dot_dimension_numbers<[1], [0], [0], [1], [0, 0, 1, 1], [], []>} : vector<16x32xbf16>, vector<32x128xbf16>, vector<16x128xf32> -> vector<16x128xf32>
    %c0_3 = arith.constant 0 : index
    %c0_4 = arith.constant 0 : index
    %10 = vector.load %arg3[%c0_3, %c0_4] : memref<1x128xf32, #tpu.memory_space<vmem>>, vector<1x128xf32>
    %11 = vector.broadcast %10 : vector<1x128xf32> to vector<16x128xf32>
    %12 = arith.addf %9, %11 : vector<16x128xf32>
    %13 = math.tanh %12 : vector<16x128xf32>
    %c0_5 = arith.constant 0 : index
    %c0_6 = arith.constant 0 : index
    %14 = vector.load %arg13[%c0_5, %c0_6] : memref<16x128xf32, #tpu.memory_space<vmem>>, vector<16x128xf32>
    tpu.vector_store %arg13[%c0_5, %c0_6], %13 {strides = array<i32>} : memref<16x128xf32, #tpu.memory_space<vmem>>, vector<16x128xf32>,
    %c0_7 = arith.constant 0 : index
    %c0_8 = arith.constant 0 : index
    %15 = vector.load %arg1[%c0_7, %c0_8] : memref<16x4xf32, #tpu.memory_space<vmem>>, vector<16x4xf32>
    %16 = arith.truncf %15 : vector<16x4xf32> to vector<16x4xbf16>
    %17 = arith.truncf %13 : vector<16x128xf32> to vector<16x128xbf16>
    %c0_9 = arith.constant 0 : index
    %c0_10 = arith.constant 0 : index
    %18 = vector.load %arg4[%c0_9, %c0_10] : memref<128x512xbf16, #tpu.memory_space<vmem>>, vector<128x512xbf16>
    %cst_11 = arith.constant dense<0.000000e+00> : vector<16x512xf32>
    %19 = tpu.matmul %17, %18, %cst_11 {dimension_numbers = #tpu.dot_dimension_numbers<[1], [0], [0], [1], [0, 0, 1, 1], [], []>} : vector<16x128xbf16>, vector<128x512xbf16>, vector<16x512xf32> -> vector<16x512xf32>
    %c0_12 = arith.constant 0 : index
    %c0_13 = arith.constant 0 : index
    %20 = vector.load %arg5[%c0_12, %c0_13] : memref<4x512xbf16, #tpu.memory_space<vmem>>, vector<4x512xbf16>
    %cst_14 = arith.constant dense<0.000000e+00> : vector<16x512xf32>
    %21 = tpu.matmul %16, %20, %cst_14 {dimension_numbers = #tpu.dot_dimension_numbers<[1], [0], [0], [1], [0, 0, 1, 1], [], []>} : vector<16x4xbf16>, vector<4x512xbf16>, vector<16x512xf32> -> vector<16x512xf32>
    %22 = arith.addf %19, %21 : vector<16x512xf32>
    %c0_15 = arith.constant 0 : index
    %c0_16 = arith.constant 0 : index
    %23 = vector.load %arg6[%c0_15, %c0_16] : memref<1x512xf32, #tpu.memory_space<vmem>>, vector<1x512xf32>
    %24 = vector.broadcast %23 : vector<1x512xf32> to vector<16x512xf32>
    %25 = arith.addf %22, %24 : vector<16x512xf32>
    %c0_17 = arith.constant 0 : index
    %c0_18 = arith.constant 0 : index
    %26 = vector.load %arg18[%c0_17, %c0_18] : memref<16x512xf32, #tpu.memory_space<vmem>>, vector<16x512xf32>
    tpu.vector_store %arg18[%c0_17, %c0_18], %25 {strides = array<i32>} : memref<16x512xf32, #tpu.memory_space<vmem>>, vector<16x512xf32>,
    %c0_i32_19 = arith.constant 0 : i32
    %27 = tpu.memref_slice %arg19[%c0_i32_19] : memref<3x!tpu.dma_semaphore, #tpu.memory_space<semaphore_mem>> -> memref<1x!tpu.dma_semaphore, #tpu.memory_space<semaphore_mem>>
    %28 = tpu.memref_squeeze %27 : memref<1x!tpu.dma_semaphore, #tpu.memory_space<semaphore_mem>> -> memref<!tpu.dma_semaphore, #tpu.memory_space<semaphore_mem>>
    tpu.wait_dma2 semaphore(%28 : memref<!tpu.dma_semaphore, #tpu.memory_space<semaphore_mem>>) src(%arg7 : memref<128x512xbf16, #tpu.memory_space<any>>) dst(%arg15 : memref<128x512xbf16, #tpu.memory_space<vmem>>)
    %c1_i32_20 = arith.constant 1 : i32
    %29 = tpu.memref_slice %arg19[%c1_i32_20] : memref<3x!tpu.dma_semaphore, #tpu.memory_space<semaphore_mem>> -> memref<1x!tpu.dma_semaphore, #tpu.memory_space<semaphore_mem>>
    %30 = tpu.memref_squeeze %29 : memref<1x!tpu.dma_semaphore, #tpu.memory_space<semaphore_mem>> -> memref<!tpu.dma_semaphore, #tpu.memory_space<semaphore_mem>>
    tpu.wait_dma2 semaphore(%30 : memref<!tpu.dma_semaphore, #tpu.memory_space<semaphore_mem>>) src(%arg8 : memref<128x512xbf16, #tpu.memory_space<any>>) dst(%arg16 : memref<128x512xbf16, #tpu.memory_space<vmem>>)
    %c2_i32_21 = arith.constant 2 : i32
    %31 = tpu.memref_slice %arg19[%c2_i32_21] : memref<3x!tpu.dma_semaphore, #tpu.memory_space<semaphore_mem>> -> memref<1x!tpu.dma_semaphore, #tpu.memory_space<semaphore_mem>>
    %32 = tpu.memref_squeeze %31 : memref<1x!tpu.dma_semaphore, #tpu.memory_space<semaphore_mem>> -> memref<!tpu.dma_semaphore, #tpu.memory_space<semaphore_mem>>
    tpu.wait_dma2 semaphore(%32 : memref<!tpu.dma_semaphore, #tpu.memory_space<semaphore_mem>>) src(%arg9 : memref<128x512xbf16, #tpu.memory_space<any>>) dst(%arg17 : memref<128x512xbf16, #tpu.memory_space<vmem>>)
    %c0_22 = arith.constant 0 : index
    %c0_23 = arith.constant 0 : index
    %33 = vector.load %arg15[%c0_22, %c0_23] : memref<128x512xbf16, #tpu.memory_space<vmem>>, vector<128x512xbf16>
    %c0_24 = arith.constant 0 : index
    %c0_25 = arith.constant 0 : index
    %34 = vector.load %arg16[%c0_24, %c0_25] : memref<128x512xbf16, #tpu.memory_space<vmem>>, vector<128x512xbf16>
    %c0_26 = arith.constant 0 : index
    %c0_27 = arith.constant 0 : index
    %35 = vector.load %arg17[%c0_26, %c0_27] : memref<128x512xbf16, #tpu.memory_space<vmem>>, vector<128x512xbf16>
    %c0_28 = arith.constant 0 : index
    %c0_29 = arith.constant 0 : index
    %36 = vector.load %arg10[%c0_28, %c0_29] : memref<1x512xf32, #tpu.memory_space<vmem>>, vector<1x512xf32>
    %37 = vector.shape_cast %36 : vector<1x512xf32> to vector<1x512xf32>
    %38 = vector.broadcast %37 : vector<1x512xf32> to vector<2x512xf32>
    %cst_30 = arith.constant 0.000000e+00 : f32
    %39 = vector.broadcast %cst_30 : f32 to vector<2x128xf32>
    %cst_31 = arith.constant 0.000000e+00 : f32
    %40 = vector.broadcast %cst_31 : f32 to vector<2x128xf32>
    %cst_32 = arith.constant 0.000000e+00 : f32
    %41 = vector.broadcast %cst_32 : f32 to vector<2x512xf32>
    %cst_33 = arith.constant 0.000000e+00 : f32
    %42 = vector.broadcast %cst_33 : f32 to vector<2x512xf32>
    %c0_34 = arith.constant 0 : index
    %c0_35 = arith.constant 0 : index
    %43 = vector.load %arg18[%c0_34, %c0_35] : memref<16x512xf32, #tpu.memory_space<vmem>>, vector<2x512xf32>
    %44 = arith.addf %43, %41 : vector<2x512xf32>
    %45 = vector.extract_strided_slice %44 {offsets = [0, 0], sizes = [2, 384], strides = [1, 1]} : vector<2x512xf32> to vector<2x384xf32>
    %46 = arith.negf %45 : vector<2x384xf32>
    %47 = math.exp %46 : vector<2x384xf32>
    %cst_36 = arith.constant 1.000000e+00 : f32
    %48 = vector.broadcast %cst_36 : f32 to vector<2x384xf32>
    %49 = arith.addf %48, %47 : vector<2x384xf32>
    %50 = arith.divf %48, %49 : vector<2x384xf32>
    %51 = vector.extract_strided_slice %44 {offsets = [0, 384], sizes = [2, 128], strides = [1, 1]} : vector<2x512xf32> to vector<2x128xf32>
    %52 = math.tanh %51 : vector<2x128xf32>
    %53 = vector.extract_strided_slice %50 {offsets = [0, 128], sizes = [2, 128], strides = [1, 1]} : vector<2x384xf32> to vector<2x128xf32>
    %54 = arith.mulf %53, %39 : vector<2x128xf32>
    %55 = vector.extract_strided_slice %50 {offsets = [0, 0], sizes = [2, 128], strides = [1, 1]} : vector<2x384xf32> to vector<2x128xf32>
    %56 = arith.mulf %55, %52 : vector<2x128xf32>
    %57 = arith.addf %54, %56 : vector<2x128xf32>
    %58 = vector.extract_strided_slice %50 {offsets = [0, 256], sizes = [2, 128], strides = [1, 1]} : vector<2x384xf32> to vector<2x128xf32>
    %59 = math.tanh %57 : vector<2x128xf32>
    %60 = arith.mulf %58, %59 : vector<2x128xf32>
    %61 = arith.truncf %60 : vector<2x128xf32> to vector<2x128xbf16>
    %cst_37 = arith.constant dense<0.000000e+00> : vector<2x512xf32>
    %62 = tpu.matmul %61, %33, %cst_37 {dimension_numbers = #tpu.dot_dimension_numbers<[1], [0], [0], [1], [0, 0, 1, 1], [], []>} : vector<2x128xbf16>, vector<128x512xbf16>, vector<2x512xf32> -> vector<2x512xf32>
    %cst_38 = arith.constant dense<0.000000e+00> : vector<2x512xf32>
    %63 = tpu.matmul %61, %34, %cst_38 {dimension_numbers = #tpu.dot_dimension_numbers<[1], [0], [0], [1], [0, 0, 1, 1], [], []>} : vector<2x128xbf16>, vector<128x512xbf16>, vector<2x512xf32> -> vector<2x512xf32>
    %64 = arith.addf %62, %42 : vector<2x512xf32>
    %65 = arith.addf %64, %38 : vector<2x512xf32>
    %66 = vector.extract_strided_slice %65 {offsets = [0, 0], sizes = [2, 384], strides = [1, 1]} : vector<2x512xf32> to vector<2x384xf32>
    %67 = arith.negf %66 : vector<2x384xf32>
    %68 = math.exp %67 : vector<2x384xf32>
    %cst_39 = arith.constant 1.000000e+00 : f32
    %69 = vector.broadcast %cst_39 : f32 to vector<2x384xf32>
    %70 = arith.addf %69, %68 : vector<2x384xf32>
    %71 = arith.divf %69, %70 : vector<2x384xf32>
    %72 = vector.extract_strided_slice %65 {offsets = [0, 384], sizes = [2, 128], strides = [1, 1]} : vector<2x512xf32> to vector<2x128xf32>
    %73 = math.tanh %72 : vector<2x128xf32>
    %74 = vector.extract_strided_slice %71 {offsets = [0, 128], sizes = [2, 128], strides = [1, 1]} : vector<2x384xf32> to vector<2x128xf32>
    %75 = arith.mulf %74, %40 : vector<2x128xf32>
    %76 = vector.extract_strided_slice %71 {offsets = [0, 0], sizes = [2, 128], strides = [1, 1]} : vector<2x384xf32> to vector<2x128xf32>
    %77 = arith.mulf %76, %73 : vector<2x128xf32>
    %78 = arith.addf %75, %77 : vector<2x128xf32>
    %79 = vector.extract_strided_slice %71 {offsets = [0, 256], sizes = [2, 128], strides = [1, 1]} : vector<2x384xf32> to vector<2x128xf32>
    %80 = math.tanh %78 : vector<2x128xf32>
    %81 = arith.mulf %79, %80 : vector<2x128xf32>
    %82 = arith.truncf %81 : vector<2x128xf32> to vector<2x128xbf16>
    %cst_40 = arith.constant dense<0.000000e+00> : vector<2x512xf32>
    %83 = tpu.matmul %82, %35, %cst_40 {dimension_numbers = #tpu.dot_dimension_numbers<[1], [0], [0], [1], [0, 0, 1, 1], [], []>} : vector<2x128xbf16>, vector<128x512xbf16>, vector<2x512xf32> -> vector<2x512xf32>
    %c2 = arith.constant 2 : index
    %c0_41 = arith.constant 0 : index
    %84 = vector.load %arg18[%c2, %c0_41] : memref<16x512xf32, #tpu.memory_space<vmem>>, vector<2x512xf32>
    %85 = arith.addf %84, %63 : vector<2x512xf32>
    %86 = vector.extract_strided_slice %85 {offsets = [0, 0], sizes = [2, 384], strides = [1, 1]} : vector<2x512xf32> to vector<2x384xf32>
    %87 = arith.negf %86 : vector<2x384xf32>
    %88 = math.exp %87 : vector<2x384xf32>
    %cst_42 = arith.constant 1.000000e+00 : f32
    %89 = vector.broadcast %cst_42 : f32 to vector<2x384xf32>
    %90 = arith.addf %89, %88 : vector<2x384xf32>
    %91 = arith.divf %89, %90 : vector<2x384xf32>
    %92 = vector.extract_strided_slice %85 {offsets = [0, 384], sizes = [2, 128], strides = [1, 1]} : vector<2x512xf32> to vector<2x128xf32>
    %93 = math.tanh %92 : vector<2x128xf32>
    %94 = vector.extract_strided_slice %91 {offsets = [0, 128], sizes = [2, 128], strides = [1, 1]} : vector<2x384xf32> to vector<2x128xf32>
    %95 = arith.mulf %94, %57 : vector<2x128xf32>
    %96 = vector.extract_strided_slice %91 {offsets = [0, 0], sizes = [2, 128], strides = [1, 1]} : vector<2x384xf32> to vector<2x128xf32>
    %97 = arith.mulf %96, %93 : vector<2x128xf32>
    %98 = arith.addf %95, %97 : vector<2x128xf32>
    %99 = vector.extract_strided_slice %91 {offsets = [0, 256], sizes = [2, 128], strides = [1, 1]} : vector<2x384xf32> to vector<2x128xf32>
    %100 = math.tanh %98 : vector<2x128xf32>
    %101 = arith.mulf %99, %100 : vector<2x128xf32>
    %102 = arith.truncf %101 : vector<2x128xf32> to vector<2x128xbf16>
    %cst_43 = arith.constant dense<0.000000e+00> : vector<2x512xf32>
    %103 = tpu.matmul %102, %33, %cst_43 {dimension_numbers = #tpu.dot_dimension_numbers<[1], [0], [0], [1], [0, 0, 1, 1], [], []>} : vector<2x128xbf16>, vector<128x512xbf16>, vector<2x512xf32> -> vector<2x512xf32>
    %cst_44 = arith.constant dense<0.000000e+00> : vector<2x512xf32>
    %104 = tpu.matmul %102, %34, %cst_44 {dimension_numbers = #tpu.dot_dimension_numbers<[1], [0], [0], [1], [0, 0, 1, 1], [], []>} : vector<2x128xbf16>, vector<128x512xbf16>, vector<2x512xf32> -> vector<2x512xf32>
    %105 = arith.addf %103, %83 : vector<2x512xf32>
    %106 = arith.addf %105, %38 : vector<2x512xf32>
    %107 = vector.extract_strided_slice %106 {offsets = [0, 0], sizes = [2, 384], strides = [1, 1]} : vector<2x512xf32> to vector<2x384xf32>
    %108 = arith.negf %107 : vector<2x384xf32>
    %109 = math.exp %108 : vector<2x384xf32>
    %cst_45 = arith.constant 1.000000e+00 : f32
    %110 = vector.broadcast %cst_45 : f32 to vector<2x384xf32>
    %111 = arith.addf %110, %109 : vector<2x384xf32>
    %112 = arith.divf %110, %111 : vector<2x384xf32>
    %113 = vector.extract_strided_slice %106 {offsets = [0, 384], sizes = [2, 128], strides = [1, 1]} : vector<2x512xf32> to vector<2x128xf32>
    %114 = math.tanh %113 : vector<2x128xf32>
    %115 = vector.extract_strided_slice %112 {offsets = [0, 128], sizes = [2, 128], strides = [1, 1]} : vector<2x384xf32> to vector<2x128xf32>
    %116 = arith.mulf %115, %78 : vector<2x128xf32>
    %117 = vector.extract_strided_slice %112 {offsets = [0, 0], sizes = [2, 128], strides = [1, 1]} : vector<2x384xf32> to vector<2x128xf32>
    %118 = arith.mulf %117, %114 : vector<2x128xf32>
    %119 = arith.addf %116, %118 : vector<2x128xf32>
    %120 = vector.extract_strided_slice %112 {offsets = [0, 256], sizes = [2, 128], strides = [1, 1]} : vector<2x384xf32> to vector<2x128xf32>
    %121 = math.tanh %119 : vector<2x128xf32>
    %122 = arith.mulf %120, %121 : vector<2x128xf32>
    %123 = arith.truncf %122 : vector<2x128xf32> to vector<2x128xbf16>
    %cst_46 = arith.constant dense<0.000000e+00> : vector<2x512xf32>
    %124 = tpu.matmul %123, %35, %cst_46 {dimension_numbers = #tpu.dot_dimension_numbers<[1], [0], [0], [1], [0, 0, 1, 1], [], []>} : vector<2x128xbf16>, vector<128x512xbf16>, vector<2x512xf32> -> vector<2x512xf32>
    %c4 = arith.constant 4 : index
    %c0_47 = arith.constant 0 : index
    %125 = vector.load %arg18[%c4, %c0_47] : memref<16x512xf32, #tpu.memory_space<vmem>>, vector<2x512xf32>
    %126 = arith.addf %125, %104 : vector<2x512xf32>
    %127 = vector.extract_strided_slice %126 {offsets = [0, 0], sizes = [2, 384], strides = [1, 1]} : vector<2x512xf32> to vector<2x384xf32>
    %128 = arith.negf %127 : vector<2x384xf32>
    %129 = math.exp %128 : vector<2x384xf32>
    %cst_48 = arith.constant 1.000000e+00 : f32
    %130 = vector.broadcast %cst_48 : f32 to vector<2x384xf32>
    %131 = arith.addf %130, %129 : vector<2x384xf32>
    %132 = arith.divf %130, %131 : vector<2x384xf32>
    %133 = vector.extract_strided_slice %126 {offsets = [0, 384], sizes = [2, 128], strides = [1, 1]} : vector<2x512xf32> to vector<2x128xf32>
    %134 = math.tanh %133 : vector<2x128xf32>
    %135 = vector.extract_strided_slice %132 {offsets = [0, 128], sizes = [2, 128], strides = [1, 1]} : vector<2x384xf32> to vector<2x128xf32>
    %136 = arith.mulf %135, %98 : vector<2x128xf32>
    %137 = vector.extract_strided_slice %132 {offsets = [0, 0], sizes = [2, 128], strides = [1, 1]} : vector<2x384xf32> to vector<2x128xf32>
    %138 = arith.mulf %137, %134 : vector<2x128xf32>
    %139 = arith.addf %136, %138 : vector<2x128xf32>
    %140 = vector.extract_strided_slice %132 {offsets = [0, 256], sizes = [2, 128], strides = [1, 1]} : vector<2x384xf32> to vector<2x128xf32>
    %141 = math.tanh %139 : vector<2x128xf32>
    %142 = arith.mulf %140, %141 : vector<2x128xf32>
    %143 = arith.truncf %142 : vector<2x128xf32> to vector<2x128xbf16>
    %cst_49 = arith.constant dense<0.000000e+00> : vector<2x512xf32>
    %144 = tpu.matmul %143, %33, %cst_49 {dimension_numbers = #tpu.dot_dimension_numbers<[1], [0], [0], [1], [0, 0, 1, 1], [], []>} : vector<2x128xbf16>, vector<128x512xbf16>, vector<2x512xf32> -> vector<2x512xf32>
    %cst_50 = arith.constant dense<0.000000e+00> : vector<2x512xf32>
    %145 = tpu.matmul %143, %34, %cst_50 {dimension_numbers = #tpu.dot_dimension_numbers<[1], [0], [0], [1], [0, 0, 1, 1], [], []>} : vector<2x128xbf16>, vector<128x512xbf16>, vector<2x512xf32> -> vector<2x512xf32>
    %146 = arith.addf %144, %124 : vector<2x512xf32>
    %147 = arith.addf %146, %38 : vector<2x512xf32>
    %148 = vector.extract_strided_slice %147 {offsets = [0, 0], sizes = [2, 384], strides = [1, 1]} : vector<2x512xf32> to vector<2x384xf32>
    %149 = arith.negf %148 : vector<2x384xf32>
    %150 = math.exp %149 : vector<2x384xf32>
    %cst_51 = arith.constant 1.000000e+00 : f32
    %151 = vector.broadcast %cst_51 : f32 to vector<2x384xf32>
    %152 = arith.addf %151, %150 : vector<2x384xf32>
    %153 = arith.divf %151, %152 : vector<2x384xf32>
    %154 = vector.extract_strided_slice %147 {offsets = [0, 384], sizes = [2, 128], strides = [1, 1]} : vector<2x512xf32> to vector<2x128xf32>
    %155 = math.tanh %154 : vector<2x128xf32>
    %156 = vector.extract_strided_slice %153 {offsets = [0, 128], sizes = [2, 128], strides = [1, 1]} : vector<2x384xf32> to vector<2x128xf32>
    %157 = arith.mulf %156, %119 : vector<2x128xf32>
    %158 = vector.extract_strided_slice %153 {offsets = [0, 0], sizes = [2, 128], strides = [1, 1]} : vector<2x384xf32> to vector<2x128xf32>
    %159 = arith.mulf %158, %155 : vector<2x128xf32>
    %160 = arith.addf %157, %159 : vector<2x128xf32>
    %161 = vector.extract_strided_slice %153 {offsets = [0, 256], sizes = [2, 128], strides = [1, 1]} : vector<2x384xf32> to vector<2x128xf32>
    %162 = math.tanh %160 : vector<2x128xf32>
    %163 = arith.mulf %161, %162 : vector<2x128xf32>
    %164 = arith.truncf %163 : vector<2x128xf32> to vector<2x128xbf16>
    %cst_52 = arith.constant dense<0.000000e+00> : vector<2x512xf32>
    %165 = tpu.matmul %164, %35, %cst_52 {dimension_numbers = #tpu.dot_dimension_numbers<[1], [0], [0], [1], [0, 0, 1, 1], [], []>} : vector<2x128xbf16>, vector<128x512xbf16>, vector<2x512xf32> -> vector<2x512xf32>
    %c6 = arith.constant 6 : index
    %c0_53 = arith.constant 0 : index
    %166 = vector.load %arg18[%c6, %c0_53] : memref<16x512xf32, #tpu.memory_space<vmem>>, vector<2x512xf32>
    %167 = arith.addf %166, %145 : vector<2x512xf32>
    %168 = vector.extract_strided_slice %167 {offsets = [0, 0], sizes = [2, 384], strides = [1, 1]} : vector<2x512xf32> to vector<2x384xf32>
    %169 = arith.negf %168 : vector<2x384xf32>
    %170 = math.exp %169 : vector<2x384xf32>
    %cst_54 = arith.constant 1.000000e+00 : f32
    %171 = vector.broadcast %cst_54 : f32 to vector<2x384xf32>
    %172 = arith.addf %171, %170 : vector<2x384xf32>
    %173 = arith.divf %171, %172 : vector<2x384xf32>
    %174 = vector.extract_strided_slice %167 {offsets = [0, 384], sizes = [2, 128], strides = [1, 1]} : vector<2x512xf32> to vector<2x128xf32>
    %175 = math.tanh %174 : vector<2x128xf32>
    %176 = vector.extract_strided_slice %173 {offsets = [0, 128], sizes = [2, 128], strides = [1, 1]} : vector<2x384xf32> to vector<2x128xf32>
    %177 = arith.mulf %176, %139 : vector<2x128xf32>
    %178 = vector.extract_strided_slice %173 {offsets = [0, 0], sizes = [2, 128], strides = [1, 1]} : vector<2x384xf32> to vector<2x128xf32>
    %179 = arith.mulf %178, %175 : vector<2x128xf32>
    %180 = arith.addf %177, %179 : vector<2x128xf32>
    %181 = vector.extract_strided_slice %173 {offsets = [0, 256], sizes = [2, 128], strides = [1, 1]} : vector<2x384xf32> to vector<2x128xf32>
    %182 = math.tanh %180 : vector<2x128xf32>
    %183 = arith.mulf %181, %182 : vector<2x128xf32>
    %184 = arith.truncf %183 : vector<2x128xf32> to vector<2x128xbf16>
    %cst_55 = arith.constant dense<0.000000e+00> : vector<2x512xf32>
    %185 = tpu.matmul %184, %33, %cst_55 {dimension_numbers = #tpu.dot_dimension_numbers<[1], [0], [0], [1], [0, 0, 1, 1], [], []>} : vector<2x128xbf16>, vector<128x512xbf16>, vector<2x512xf32> -> vector<2x512xf32>
    %cst_56 = arith.constant dense<0.000000e+00> : vector<2x512xf32>
    %186 = tpu.matmul %184, %34, %cst_56 {dimension_numbers = #tpu.dot_dimension_numbers<[1], [0], [0], [1], [0, 0, 1, 1], [], []>} : vector<2x128xbf16>, vector<128x512xbf16>, vector<2x512xf32> -> vector<2x512xf32>
    %187 = arith.addf %185, %165 : vector<2x512xf32>
    %188 = arith.addf %187, %38 : vector<2x512xf32>
    %189 = vector.extract_strided_slice %188 {offsets = [0, 0], sizes = [2, 384], strides = [1, 1]} : vector<2x512xf32> to vector<2x384xf32>
    %190 = arith.negf %189 : vector<2x384xf32>
    %191 = math.exp %190 : vector<2x384xf32>
    %cst_57 = arith.constant 1.000000e+00 : f32
    %192 = vector.broadcast %cst_57 : f32 to vector<2x384xf32>
    %193 = arith.addf %192, %191 : vector<2x384xf32>
    %194 = arith.divf %192, %193 : vector<2x384xf32>
    %195 = vector.extract_strided_slice %188 {offsets = [0, 384], sizes = [2, 128], strides = [1, 1]} : vector<2x512xf32> to vector<2x128xf32>
    %196 = math.tanh %195 : vector<2x128xf32>
    %197 = vector.extract_strided_slice %194 {offsets = [0, 128], sizes = [2, 128], strides = [1, 1]} : vector<2x384xf32> to vector<2x128xf32>
    %198 = arith.mulf %197, %160 : vector<2x128xf32>
    %199 = vector.extract_strided_slice %194 {offsets = [0, 0], sizes = [2, 128], strides = [1, 1]} : vector<2x384xf32> to vector<2x128xf32>
    %200 = arith.mulf %199, %196 : vector<2x128xf32>
    %201 = arith.addf %198, %200 : vector<2x128xf32>
    %202 = vector.extract_strided_slice %194 {offsets = [0, 256], sizes = [2, 128], strides = [1, 1]} : vector<2x384xf32> to vector<2x128xf32>
    %203 = math.tanh %201 : vector<2x128xf32>
    %204 = arith.mulf %202, %203 : vector<2x128xf32>
    %205 = arith.truncf %204 : vector<2x128xf32> to vector<2x128xbf16>
    %cst_58 = arith.constant dense<0.000000e+00> : vector<2x512xf32>
    %206 = tpu.matmul %205, %35, %cst_58 {dimension_numbers = #tpu.dot_dimension_numbers<[1], [0], [0], [1], [0, 0, 1, 1], [], []>} : vector<2x128xbf16>, vector<128x512xbf16>, vector<2x512xf32> -> vector<2x512xf32>
    %c8 = arith.constant 8 : index
    %c0_59 = arith.constant 0 : index
    %207 = vector.load %arg18[%c8, %c0_59] : memref<16x512xf32, #tpu.memory_space<vmem>>, vector<2x512xf32>
    %208 = arith.addf %207, %186 : vector<2x512xf32>
    %209 = vector.extract_strided_slice %208 {offsets = [0, 0], sizes = [2, 384], strides = [1, 1]} : vector<2x512xf32> to vector<2x384xf32>
    %210 = arith.negf %209 : vector<2x384xf32>
    %211 = math.exp %210 : vector<2x384xf32>
    %cst_60 = arith.constant 1.000000e+00 : f32
    %212 = vector.broadcast %cst_60 : f32 to vector<2x384xf32>
    %213 = arith.addf %212, %211 : vector<2x384xf32>
    %214 = arith.divf %212, %213 : vector<2x384xf32>
    %215 = vector.extract_strided_slice %208 {offsets = [0, 384], sizes = [2, 128], strides = [1, 1]} : vector<2x512xf32> to vector<2x128xf32>
    %216 = math.tanh %215 : vector<2x128xf32>
    %217 = vector.extract_strided_slice %214 {offsets = [0, 128], sizes = [2, 128], strides = [1, 1]} : vector<2x384xf32> to vector<2x128xf32>
    %218 = arith.mulf %217, %180 : vector<2x128xf32>
    %219 = vector.extract_strided_slice %214 {offsets = [0, 0], sizes = [2, 128], strides = [1, 1]} : vector<2x384xf32> to vector<2x128xf32>
    %220 = arith.mulf %219, %216 : vector<2x128xf32>
    %221 = arith.addf %218, %220 : vector<2x128xf32>
    %222 = vector.extract_strided_slice %214 {offsets = [0, 256], sizes = [2, 128], strides = [1, 1]} : vector<2x384xf32> to vector<2x128xf32>
    %223 = math.tanh %221 : vector<2x128xf32>
    %224 = arith.mulf %222, %223 : vector<2x128xf32>
    %225 = arith.truncf %224 : vector<2x128xf32> to vector<2x128xbf16>
    %cst_61 = arith.constant dense<0.000000e+00> : vector<2x512xf32>
    %226 = tpu.matmul %225, %33, %cst_61 {dimension_numbers = #tpu.dot_dimension_numbers<[1], [0], [0], [1], [0, 0, 1, 1], [], []>} : vector<2x128xbf16>, vector<128x512xbf16>, vector<2x512xf32> -> vector<2x512xf32>
    %cst_62 = arith.constant dense<0.000000e+00> : vector<2x512xf32>
    %227 = tpu.matmul %225, %34, %cst_62 {dimension_numbers = #tpu.dot_dimension_numbers<[1], [0], [0], [1], [0, 0, 1, 1], [], []>} : vector<2x128xbf16>, vector<128x512xbf16>, vector<2x512xf32> -> vector<2x512xf32>
    %228 = arith.addf %226, %206 : vector<2x512xf32>
    %229 = arith.addf %228, %38 : vector<2x512xf32>
    %230 = vector.extract_strided_slice %229 {offsets = [0, 0], sizes = [2, 384], strides = [1, 1]} : vector<2x512xf32> to vector<2x384xf32>
    %231 = arith.negf %230 : vector<2x384xf32>
    %232 = math.exp %231 : vector<2x384xf32>
    %cst_63 = arith.constant 1.000000e+00 : f32
    %233 = vector.broadcast %cst_63 : f32 to vector<2x384xf32>
    %234 = arith.addf %233, %232 : vector<2x384xf32>
    %235 = arith.divf %233, %234 : vector<2x384xf32>
    %236 = vector.extract_strided_slice %229 {offsets = [0, 384], sizes = [2, 128], strides = [1, 1]} : vector<2x512xf32> to vector<2x128xf32>
    %237 = math.tanh %236 : vector<2x128xf32>
    %238 = vector.extract_strided_slice %235 {offsets = [0, 128], sizes = [2, 128], strides = [1, 1]} : vector<2x384xf32> to vector<2x128xf32>
    %239 = arith.mulf %238, %201 : vector<2x128xf32>
    %240 = vector.extract_strided_slice %235 {offsets = [0, 0], sizes = [2, 128], strides = [1, 1]} : vector<2x384xf32> to vector<2x128xf32>
    %241 = arith.mulf %240, %237 : vector<2x128xf32>
    %242 = arith.addf %239, %241 : vector<2x128xf32>
    %243 = vector.extract_strided_slice %235 {offsets = [0, 256], sizes = [2, 128], strides = [1, 1]} : vector<2x384xf32> to vector<2x128xf32>
    %244 = math.tanh %242 : vector<2x128xf32>
    %245 = arith.mulf %243, %244 : vector<2x128xf32>
    %246 = arith.truncf %245 : vector<2x128xf32> to vector<2x128xbf16>
    %cst_64 = arith.constant dense<0.000000e+00> : vector<2x512xf32>
    %247 = tpu.matmul %246, %35, %cst_64 {dimension_numbers = #tpu.dot_dimension_numbers<[1], [0], [0], [1], [0, 0, 1, 1], [], []>} : vector<2x128xbf16>, vector<128x512xbf16>, vector<2x512xf32> -> vector<2x512xf32>
    %c10 = arith.constant 10 : index
    %c0_65 = arith.constant 0 : index
    %248 = vector.load %arg18[%c10, %c0_65] : memref<16x512xf32, #tpu.memory_space<vmem>>, vector<2x512xf32>
    %249 = arith.addf %248, %227 : vector<2x512xf32>
    %250 = vector.extract_strided_slice %249 {offsets = [0, 0], sizes = [2, 384], strides = [1, 1]} : vector<2x512xf32> to vector<2x384xf32>
    %251 = arith.negf %250 : vector<2x384xf32>
    %252 = math.exp %251 : vector<2x384xf32>
    %cst_66 = arith.constant 1.000000e+00 : f32
    %253 = vector.broadcast %cst_66 : f32 to vector<2x384xf32>
    %254 = arith.addf %253, %252 : vector<2x384xf32>
    %255 = arith.divf %253, %254 : vector<2x384xf32>
    %256 = vector.extract_strided_slice %249 {offsets = [0, 384], sizes = [2, 128], strides = [1, 1]} : vector<2x512xf32> to vector<2x128xf32>
    %257 = math.tanh %256 : vector<2x128xf32>
    %258 = vector.extract_strided_slice %255 {offsets = [0, 128], sizes = [2, 128], strides = [1, 1]} : vector<2x384xf32> to vector<2x128xf32>
    %259 = arith.mulf %258, %221 : vector<2x128xf32>
    %260 = vector.extract_strided_slice %255 {offsets = [0, 0], sizes = [2, 128], strides = [1, 1]} : vector<2x384xf32> to vector<2x128xf32>
    %261 = arith.mulf %260, %257 : vector<2x128xf32>
    %262 = arith.addf %259, %261 : vector<2x128xf32>
    %263 = vector.extract_strided_slice %255 {offsets = [0, 256], sizes = [2, 128], strides = [1, 1]} : vector<2x384xf32> to vector<2x128xf32>
    %264 = math.tanh %262 : vector<2x128xf32>
    %265 = arith.mulf %263, %264 : vector<2x128xf32>
    %266 = arith.truncf %265 : vector<2x128xf32> to vector<2x128xbf16>
    %cst_67 = arith.constant dense<0.000000e+00> : vector<2x512xf32>
    %267 = tpu.matmul %266, %33, %cst_67 {dimension_numbers = #tpu.dot_dimension_numbers<[1], [0], [0], [1], [0, 0, 1, 1], [], []>} : vector<2x128xbf16>, vector<128x512xbf16>, vector<2x512xf32> -> vector<2x512xf32>
    %cst_68 = arith.constant dense<0.000000e+00> : vector<2x512xf32>
    %268 = tpu.matmul %266, %34, %cst_68 {dimension_numbers = #tpu.dot_dimension_numbers<[1], [0], [0], [1], [0, 0, 1, 1], [], []>} : vector<2x128xbf16>, vector<128x512xbf16>, vector<2x512xf32> -> vector<2x512xf32>
    %269 = arith.addf %267, %247 : vector<2x512xf32>
    %270 = arith.addf %269, %38 : vector<2x512xf32>
    %271 = vector.extract_strided_slice %270 {offsets = [0, 0], sizes = [2, 384], strides = [1, 1]} : vector<2x512xf32> to vector<2x384xf32>
    %272 = arith.negf %271 : vector<2x384xf32>
    %273 = math.exp %272 : vector<2x384xf32>
    %cst_69 = arith.constant 1.000000e+00 : f32
    %274 = vector.broadcast %cst_69 : f32 to vector<2x384xf32>
    %275 = arith.addf %274, %273 : vector<2x384xf32>
    %276 = arith.divf %274, %275 : vector<2x384xf32>
    %277 = vector.extract_strided_slice %270 {offsets = [0, 384], sizes = [2, 128], strides = [1, 1]} : vector<2x512xf32> to vector<2x128xf32>
    %278 = math.tanh %277 : vector<2x128xf32>
    %279 = vector.extract_strided_slice %276 {offsets = [0, 128], sizes = [2, 128], strides = [1, 1]} : vector<2x384xf32> to vector<2x128xf32>
    %280 = arith.mulf %279, %242 : vector<2x128xf32>
    %281 = vector.extract_strided_slice %276 {offsets = [0, 0], sizes = [2, 128], strides = [1, 1]} : vector<2x384xf32> to vector<2x128xf32>
    %282 = arith.mulf %281, %278 : vector<2x128xf32>
    %283 = arith.addf %280, %282 : vector<2x128xf32>
    %284 = vector.extract_strided_slice %276 {offsets = [0, 256], sizes = [2, 128], strides = [1, 1]} : vector<2x384xf32> to vector<2x128xf32>
    %285 = math.tanh %283 : vector<2x128xf32>
    %286 = arith.mulf %284, %285 : vector<2x128xf32>
    %287 = arith.truncf %286 : vector<2x128xf32> to vector<2x128xbf16>
    %cst_70 = arith.constant dense<0.000000e+00> : vector<2x512xf32>
    %288 = tpu.matmul %287, %35, %cst_70 {dimension_numbers = #tpu.dot_dimension_numbers<[1], [0], [0], [1], [0, 0, 1, 1], [], []>} : vector<2x128xbf16>, vector<128x512xbf16>, vector<2x512xf32> -> vector<2x512xf32>
    %c12 = arith.constant 12 : index
    %c0_71 = arith.constant 0 : index
    %289 = vector.load %arg18[%c12, %c0_71] : memref<16x512xf32, #tpu.memory_space<vmem>>, vector<2x512xf32>
    %290 = arith.addf %289, %268 : vector<2x512xf32>
    %291 = vector.extract_strided_slice %290 {offsets = [0, 0], sizes = [2, 384], strides = [1, 1]} : vector<2x512xf32> to vector<2x384xf32>
    %292 = arith.negf %291 : vector<2x384xf32>
    %293 = math.exp %292 : vector<2x384xf32>
    %cst_72 = arith.constant 1.000000e+00 : f32
    %294 = vector.broadcast %cst_72 : f32 to vector<2x384xf32>
    %295 = arith.addf %294, %293 : vector<2x384xf32>
    %296 = arith.divf %294, %295 : vector<2x384xf32>
    %297 = vector.extract_strided_slice %290 {offsets = [0, 384], sizes = [2, 128], strides = [1, 1]} : vector<2x512xf32> to vector<2x128xf32>
    %298 = math.tanh %297 : vector<2x128xf32>
    %299 = vector.extract_strided_slice %296 {offsets = [0, 128], sizes = [2, 128], strides = [1, 1]} : vector<2x384xf32> to vector<2x128xf32>
    %300 = arith.mulf %299, %262 : vector<2x128xf32>
    %301 = vector.extract_strided_slice %296 {offsets = [0, 0], sizes = [2, 128], strides = [1, 1]} : vector<2x384xf32> to vector<2x128xf32>
    %302 = arith.mulf %301, %298 : vector<2x128xf32>
    %303 = arith.addf %300, %302 : vector<2x128xf32>
    %304 = vector.extract_strided_slice %296 {offsets = [0, 256], sizes = [2, 128], strides = [1, 1]} : vector<2x384xf32> to vector<2x128xf32>
    %305 = math.tanh %303 : vector<2x128xf32>
    %306 = arith.mulf %304, %305 : vector<2x128xf32>
    %307 = arith.truncf %306 : vector<2x128xf32> to vector<2x128xbf16>
    %cst_73 = arith.constant dense<0.000000e+00> : vector<2x512xf32>
    %308 = tpu.matmul %307, %33, %cst_73 {dimension_numbers = #tpu.dot_dimension_numbers<[1], [0], [0], [1], [0, 0, 1, 1], [], []>} : vector<2x128xbf16>, vector<128x512xbf16>, vector<2x512xf32> -> vector<2x512xf32>
    %cst_74 = arith.constant dense<0.000000e+00> : vector<2x512xf32>
    %309 = tpu.matmul %307, %34, %cst_74 {dimension_numbers = #tpu.dot_dimension_numbers<[1], [0], [0], [1], [0, 0, 1, 1], [], []>} : vector<2x128xbf16>, vector<128x512xbf16>, vector<2x512xf32> -> vector<2x512xf32>
    %310 = arith.addf %308, %288 : vector<2x512xf32>
    %311 = arith.addf %310, %38 : vector<2x512xf32>
    %312 = vector.extract_strided_slice %311 {offsets = [0, 0], sizes = [2, 384], strides = [1, 1]} : vector<2x512xf32> to vector<2x384xf32>
    %313 = arith.negf %312 : vector<2x384xf32>
    %314 = math.exp %313 : vector<2x384xf32>
    %cst_75 = arith.constant 1.000000e+00 : f32
    %315 = vector.broadcast %cst_75 : f32 to vector<2x384xf32>
    %316 = arith.addf %315, %314 : vector<2x384xf32>
    %317 = arith.divf %315, %316 : vector<2x384xf32>
    %318 = vector.extract_strided_slice %311 {offsets = [0, 384], sizes = [2, 128], strides = [1, 1]} : vector<2x512xf32> to vector<2x128xf32>
    %319 = math.tanh %318 : vector<2x128xf32>
    %320 = vector.extract_strided_slice %317 {offsets = [0, 128], sizes = [2, 128], strides = [1, 1]} : vector<2x384xf32> to vector<2x128xf32>
    %321 = arith.mulf %320, %283 : vector<2x128xf32>
    %322 = vector.extract_strided_slice %317 {offsets = [0, 0], sizes = [2, 128], strides = [1, 1]} : vector<2x384xf32> to vector<2x128xf32>
    %323 = arith.mulf %322, %319 : vector<2x128xf32>
    %324 = arith.addf %321, %323 : vector<2x128xf32>
    %325 = vector.extract_strided_slice %317 {offsets = [0, 256], sizes = [2, 128], strides = [1, 1]} : vector<2x384xf32> to vector<2x128xf32>
    %326 = math.tanh %324 : vector<2x128xf32>
    %327 = arith.mulf %325, %326 : vector<2x128xf32>
    %328 = arith.truncf %327 : vector<2x128xf32> to vector<2x128xbf16>
    %cst_76 = arith.constant dense<0.000000e+00> : vector<2x512xf32>
    %329 = tpu.matmul %328, %35, %cst_76 {dimension_numbers = #tpu.dot_dimension_numbers<[1], [0], [0], [1], [0, 0, 1, 1], [], []>} : vector<2x128xbf16>, vector<128x512xbf16>, vector<2x512xf32> -> vector<2x512xf32>
    %c14 = arith.constant 14 : index
    %c0_77 = arith.constant 0 : index
    %330 = vector.load %arg18[%c14, %c0_77] : memref<16x512xf32, #tpu.memory_space<vmem>>, vector<2x512xf32>
    %331 = arith.addf %330, %309 : vector<2x512xf32>
    %332 = vector.extract_strided_slice %331 {offsets = [0, 0], sizes = [2, 384], strides = [1, 1]} : vector<2x512xf32> to vector<2x384xf32>
    %333 = arith.negf %332 : vector<2x384xf32>
    %334 = math.exp %333 : vector<2x384xf32>
    %cst_78 = arith.constant 1.000000e+00 : f32
    %335 = vector.broadcast %cst_78 : f32 to vector<2x384xf32>
    %336 = arith.addf %335, %334 : vector<2x384xf32>
    %337 = arith.divf %335, %336 : vector<2x384xf32>
    %338 = vector.extract_strided_slice %331 {offsets = [0, 384], sizes = [2, 128], strides = [1, 1]} : vector<2x512xf32> to vector<2x128xf32>
    %339 = math.tanh %338 : vector<2x128xf32>
    %340 = vector.extract_strided_slice %337 {offsets = [0, 128], sizes = [2, 128], strides = [1, 1]} : vector<2x384xf32> to vector<2x128xf32>
    %341 = arith.mulf %340, %303 : vector<2x128xf32>
    %342 = vector.extract_strided_slice %337 {offsets = [0, 0], sizes = [2, 128], strides = [1, 1]} : vector<2x384xf32> to vector<2x128xf32>
    %343 = arith.mulf %342, %339 : vector<2x128xf32>
    %344 = arith.addf %341, %343 : vector<2x128xf32>
    %345 = vector.extract_strided_slice %337 {offsets = [0, 256], sizes = [2, 128], strides = [1, 1]} : vector<2x384xf32> to vector<2x128xf32>
    %346 = math.tanh %344 : vector<2x128xf32>
    %347 = arith.mulf %345, %346 : vector<2x128xf32>
    %348 = arith.truncf %347 : vector<2x128xf32> to vector<2x128xbf16>
    %cst_79 = arith.constant dense<0.000000e+00> : vector<2x512xf32>
    %349 = tpu.matmul %348, %33, %cst_79 {dimension_numbers = #tpu.dot_dimension_numbers<[1], [0], [0], [1], [0, 0, 1, 1], [], []>} : vector<2x128xbf16>, vector<128x512xbf16>, vector<2x512xf32> -> vector<2x512xf32>
    %350 = arith.addf %349, %329 : vector<2x512xf32>
    %351 = arith.addf %350, %38 : vector<2x512xf32>
    %352 = vector.extract_strided_slice %351 {offsets = [0, 0], sizes = [2, 384], strides = [1, 1]} : vector<2x512xf32> to vector<2x384xf32>
    %353 = arith.negf %352 : vector<2x384xf32>
    %354 = math.exp %353 : vector<2x384xf32>
    %cst_80 = arith.constant 1.000000e+00 : f32
    %355 = vector.broadcast %cst_80 : f32 to vector<2x384xf32>
    %356 = arith.addf %355, %354 : vector<2x384xf32>
    %357 = arith.divf %355, %356 : vector<2x384xf32>
    %358 = vector.extract_strided_slice %351 {offsets = [0, 384], sizes = [2, 128], strides = [1, 1]} : vector<2x512xf32> to vector<2x128xf32>
    %359 = math.tanh %358 : vector<2x128xf32>
    %360 = vector.extract_strided_slice %357 {offsets = [0, 128], sizes = [2, 128], strides = [1, 1]} : vector<2x384xf32> to vector<2x128xf32>
    %361 = arith.mulf %360, %324 : vector<2x128xf32>
    %362 = vector.extract_strided_slice %357 {offsets = [0, 0], sizes = [2, 128], strides = [1, 1]} : vector<2x384xf32> to vector<2x128xf32>
    %363 = arith.mulf %362, %359 : vector<2x128xf32>
    %364 = arith.addf %361, %363 : vector<2x128xf32>
    %365 = vector.extract_strided_slice %357 {offsets = [0, 256], sizes = [2, 128], strides = [1, 1]} : vector<2x384xf32> to vector<2x128xf32>
    %366 = math.tanh %364 : vector<2x128xf32>
    %367 = arith.mulf %365, %366 : vector<2x128xf32>
    %c0_81 = arith.constant 0 : index
    %c0_82 = arith.constant 0 : index
    %368 = vector.load %arg11[%c0_81, %c0_82] : memref<1x128xf32, #tpu.memory_space<vmem>>, vector<1x128xf32>
    %369 = vector.broadcast %368 : vector<1x128xf32> to vector<2x128xf32>
    %370 = arith.mulf %367, %369 : vector<2x128xf32>
    %cst_83 = arith.constant dense<0.000000e+00> : vector<2xf32>
    %371 = vector.multi_reduction <add>, %370, %cst_83 [1] : vector<2x128xf32> to vector<2xf32>
    %372 = vector.shape_cast %371 : vector<2xf32> to vector<2x1xf32>
    %c0_84 = arith.constant 0 : index
    %c0_85 = arith.constant 0 : index
    %373 = vector.load %arg12[%c0_84, %c0_85] : memref<1x1xf32, #tpu.memory_space<vmem>>, vector<1x1xf32>
    %374 = vector.broadcast %373 : vector<1x1xf32> to vector<2x1xf32>
    %375 = arith.addf %372, %374 : vector<2x1xf32>
    %c0_86 = arith.constant 0 : index
    %c0_87 = arith.constant 0 : index
    %376 = vector.load %arg14[%c0_86, %c0_87] : memref<2x1xf32, #tpu.memory_space<vmem>>, vector<2x1xf32>
    tpu.vector_store %arg14[%c0_86, %c0_87], %375 {strides = array<i32>} : memref<2x1xf32, #tpu.memory_space<vmem>>, vector<2x1xf32>,
    return
  }
}

</mosaic_0001>

<bundles_post_ra>
// kernel: day_model2_forward.1
= control target key start
LH: loop header
LB: loop body
LE: loop exit
PB: predicated region body
PF: predicated region fallthrough
CT: control target
= control target key end

     0   :  { %s6783_s0 = inlined_call_operand.vmem [shape: f32[16,32], index: 0, kind: input, shape index: {}]   ;;  %s6784_s1 = inlined_call_operand.vmem [shape: f32[16,4], index: 1, kind: input, shape index: {}]   ;;  %s6785_s2 = inlined_call_operand.vmem [shape: bf16[32,128], index: 2, kind: input, shape index: {}]   ;;  %s6786_s3 = inlined_call_operand.vmem [shape: f32[1,128], index: 3, kind: input, shape index: {}]   ;;  %s6787_s4 = inlined_call_operand.vmem [shape: bf16[128,512], index: 4, kind: input, shape index: {}]   ;;  %s6788_s5 = inlined_call_operand.vmem [shape: bf16[4,512], index: 5, kind: input, shape index: {}]   ;;  %s6789_s6 = inlined_call_operand.vmem [shape: f32[1,512], index: 6, kind: input, shape index: {}]   ;;  %s6790_s8 = inlined_call_operand.vmem [shape: bf16[128,512], index: 8, kind: input, shape index: {}]   ;;  %s6791_s9 = inlined_call_operand.vmem [shape: bf16[128,512], index: 9, kind: input, shape index: {}]   ;;  %s6792_s10 = inlined_call_operand.vmem [shape: f32[1,512], index: 10, kind: input, shape index: {}]   ;;  %s6793_s11 = inlined_call_operand.vmem [shape: f32[1,128], index: 11, kind: input, shape index: {}]   ;;  %s6794_s12 = inlined_call_operand.<no memory space> [shape: f32[1,1], index: 12, kind: input, shape index: {}]   ;;  %s6795_s13 = inlined_call_operand.vmem [shape: f32[16,128], index: 13, kind: output, shape index: {0}]   ;;  %s6796_s14 = inlined_call_operand.vmem [shape: f32[2,1], index: 14, kind: output, shape index: {1}]   ;;  %s6797_s7 = inlined_call_operand.vmem [shape: bf16[128,512], index: 7, kind: input, shape index: {}]  }
   0x1   :  { %v20_v0 = vstv %s6794_s12  ;;  %v60_v1 = vld [vmem:[%s6797_s7] sm:$0xf]  ;;  %v62_v2 = vld [vmem:[%s6797_s7 + $0x10] sm:$0xf]  ;;  %v64_v3 = vld [vmem:[%s6797_s7 + $0x4] sm:$0xf] }
   0x2   :  { %21 = vst [vmem:[#allocation7] sm:$0x1] %v20_v0  ;;  %61 = vst [vmem:[#allocation2] sm:$0xf] %v60_v1  ;;  %v66_v4 = vld [vmem:[%s6797_s7 + $0x14] sm:$0xf] }
   0x3   :  { %63 = vst [vmem:[#allocation2 + $0x4] sm:$0xf] %v62_v2  ;;  %65 = vst [vmem:[#allocation2 + $0x8] sm:$0xf] %v64_v3  ;;  %v68_v5 = vld [vmem:[%s6797_s7 + $0x8] sm:$0xf] }
   0x4   :  { %v70_v6 = vld [vmem:[%s6797_s7 + $0x18] sm:$0xf]  ;;  %67 = vst [vmem:[#allocation2 + $0xc] sm:$0xf] %v66_v4  ;;  %69 = vst [vmem:[#allocation2 + $0x10] sm:$0xf] %v68_v5 }
   0x5   :  { %71 = vst [vmem:[#allocation2 + $0x14] sm:$0xf] %v70_v6  ;;  %v72_v7 = vld [vmem:[%s6797_s7 + $0xc] sm:$0xf]  ;;  %v74_v8 = vld [vmem:[%s6797_s7 + $0x1c] sm:$0xff]  }
   0x6   :  { %v78_v9 = vld [vmem:[%s6797_s7 + $0x30] sm:$0xf]  ;;  %73 = vst [vmem:[#allocation2 + $0x18] sm:$0xf] %v72_v7  ;;  %75 = vst [vmem:[#allocation2 + $0x1c] sm:$0xff] %v74_v8   ;;  %v90_v15 = vld [vmem:[%s6797_s7 + $0x3c] sm:$0xff]  }
   0x7   :  { %79 = vst [vmem:[#allocation2 + $0x24] sm:$0xf] %v78_v9  ;;  %v80_v10 = vld [vmem:[%s6797_s7 + $0x24] sm:$0xf]  ;;  %v82_v11 = vld [vmem:[%s6797_s7 + $0x34] sm:$0xf] }
   0x8   :  { %v84_v12 = vld [vmem:[%s6797_s7 + $0x28] sm:$0xf]  ;;  %81 = vst [vmem:[#allocation2 + $0x28] sm:$0xf] %v80_v10  ;;  %83 = vst [vmem:[#allocation2 + $0x2c] sm:$0xf] %v82_v11 }
   0x9   :  { %85 = vst [vmem:[#allocation2 + $0x30] sm:$0xf] %v84_v12  ;;  %v86_v13 = vld [vmem:[%s6797_s7 + $0x38] sm:$0xf]  ;;  %v88_v14 = vld [vmem:[%s6797_s7 + $0x2c] sm:$0xf] }
   0xa   :  { %87 = vst [vmem:[#allocation2 + $0x34] sm:$0xf] %v86_v13  ;;  %89 = vst [vmem:[#allocation2 + $0x38] sm:$0xf] %v88_v14  ;;  %v94_v16 = vld [vmem:[%s6797_s7 + $0x50] sm:$0xf] }
   0xb   :  { %91 = vst [vmem:[#allocation2 + $0x3c] sm:$0xff] %v90_v15   ;;  %v96_v17 = vld [vmem:[%s6797_s7 + $0x44] sm:$0xf]  ;;  %v98_v18 = vld [vmem:[%s6797_s7 + $0x54] sm:$0xf]  ;;  %v106_v22 = vld [vmem:[%s6797_s7 + $0x5c] sm:$0xff]  }
   0xc   :  { %95 = vst [vmem:[#allocation2 + $0x44] sm:$0xf] %v94_v16  ;;  %97 = vst [vmem:[#allocation2 + $0x48] sm:$0xf] %v96_v17  ;;  %v100_v19 = vld [vmem:[%s6797_s7 + $0x48] sm:$0xf] }
   0xd   :  { %99 = vst [vmem:[#allocation2 + $0x4c] sm:$0xf] %v98_v18  ;;  %v102_v20 = vld [vmem:[%s6797_s7 + $0x58] sm:$0xf]  ;;  %v104_v21 = vld [vmem:[%s6797_s7 + $0x4c] sm:$0xf] }
   0xe   :  { %101 = vst [vmem:[#allocation2 + $0x50] sm:$0xf] %v100_v19  ;;  %103 = vst [vmem:[#allocation2 + $0x54] sm:$0xf] %v102_v20  ;;  %v110_v23 = vld [vmem:[%s6797_s7 + $0x70] sm:$0xf] }
   0xf   :  { %105 = vst [vmem:[#allocation2 + $0x58] sm:$0xf] %v104_v21  ;;  %v112_v24 = vld [vmem:[%s6797_s7 + $0x64] sm:$0xf]  ;;  %107 = vst [vmem:[#allocation2 + $0x5c] sm:$0xff] %v106_v22   ;;  %v122_v29 = vld [vmem:[%s6797_s7 + $0x7c] sm:$0xff]  }
  0x10   :  { %111 = vst [vmem:[#allocation2 + $0x64] sm:$0xf] %v110_v23  ;;  %113 = vst [vmem:[#allocation2 + $0x68] sm:$0xf] %v112_v24  ;;  %v114_v25 = vld [vmem:[%s6797_s7 + $0x74] sm:$0xf] }
  0x11   :  { %v116_v26 = vld [vmem:[%s6797_s7 + $0x68] sm:$0xf]  ;;  %v118_v27 = vld [vmem:[%s6797_s7 + $0x78] sm:$0xf]  ;;  %115 = vst [vmem:[#allocation2 + $0x6c] sm:$0xf] %v114_v25 }
  0x12   :  { %117 = vst [vmem:[#allocation2 + $0x70] sm:$0xf] %v116_v26  ;;  %119 = vst [vmem:[#allocation2 + $0x74] sm:$0xf] %v118_v27  ;;  %v120_v28 = vld [vmem:[%s6797_s7 + $0x6c] sm:$0xf] }
  0x13   :  { %v126_v30 = vld [vmem:[%s6797_s7 + $0x90] sm:$0xf]  ;;  %121 = vst [vmem:[#allocation2 + $0x78] sm:$0xf] %v120_v28  ;;  %123 = vst [vmem:[#allocation2 + $0x7c] sm:$0xff] %v122_v29   ;;  %v138_v36 = vld [vmem:[%s6797_s7 + $0x9c] sm:$0xff]  }
  0x14   :  { %127 = vst [vmem:[#allocation2 + $0x84] sm:$0xf] %v126_v30  ;;  %v128_v31 = vld [vmem:[%s6797_s7 + $0x84] sm:$0xf]  ;;  %v130_v32 = vld [vmem:[%s6797_s7 + $0x94] sm:$0xf] }
  0x15   :  { %v132_v33 = vld [vmem:[%s6797_s7 + $0x88] sm:$0xf]  ;;  %129 = vst [vmem:[#allocation2 + $0x88] sm:$0xf] %v128_v31  ;;  %131 = vst [vmem:[#allocation2 + $0x8c] sm:$0xf] %v130_v32 }
  0x16   :  { %133 = vst [vmem:[#allocation2 + $0x90] sm:$0xf] %v132_v33  ;;  %v134_v34 = vld [vmem:[%s6797_s7 + $0x98] sm:$0xf]  ;;  %v136_v35 = vld [vmem:[%s6797_s7 + $0x8c] sm:$0xf] }
  0x17   :  { %135 = vst [vmem:[#allocation2 + $0x94] sm:$0xf] %v134_v34  ;;  %137 = vst [vmem:[#allocation2 + $0x98] sm:$0xf] %v136_v35  ;;  %v142_v37 = vld [vmem:[%s6797_s7 + $0xb0] sm:$0xf] }
  0x18   :  { %139 = vst [vmem:[#allocation2 + $0x9c] sm:$0xff] %v138_v36   ;;  %v144_v38 = vld [vmem:[%s6797_s7 + $0xa4] sm:$0xf]  ;;  %v146_v39 = vld [vmem:[%s6797_s7 + $0xb4] sm:$0xf]  ;;  %v154_v43 = vld [vmem:[%s6797_s7 + $0xbc] sm:$0xff]  }
  0x19   :  { %143 = vst [vmem:[#allocation2 + $0xa4] sm:$0xf] %v142_v37  ;;  %145 = vst [vmem:[#allocation2 + $0xa8] sm:$0xf] %v144_v38  ;;  %v148_v40 = vld [vmem:[%s6797_s7 + $0xa8] sm:$0xf] }
  0x1a   :  { %147 = vst [vmem:[#allocation2 + $0xac] sm:$0xf] %v146_v39  ;;  %v150_v41 = vld [vmem:[%s6797_s7 + $0xb8] sm:$0xf]  ;;  %v152_v42 = vld [vmem:[%s6797_s7 + $0xac] sm:$0xf] }
  0x1b   :  { %149 = vst [vmem:[#allocation2 + $0xb0] sm:$0xf] %v148_v40  ;;  %151 = vst [vmem:[#allocation2 + $0xb4] sm:$0xf] %v150_v41  ;;  %v158_v44 = vld [vmem:[%s6797_s7 + $0xd0] sm:$0xf] }
  0x1c   :  { %153 = vst [vmem:[#allocation2 + $0xb8] sm:$0xf] %v152_v42  ;;  %v160_v45 = vld [vmem:[%s6797_s7 + $0xc4] sm:$0xf]  ;;  %155 = vst [vmem:[#allocation2 + $0xbc] sm:$0xff] %v154_v43   ;;  %v170_v50 = vld [vmem:[%s6797_s7 + $0xdc] sm:$0xff]  }
  0x1d   :  { %159 = vst [vmem:[#allocation2 + $0xc4] sm:$0xf] %v158_v44  ;;  %161 = vst [vmem:[#allocation2 + $0xc8] sm:$0xf] %v160_v45  ;;  %v162_v46 = vld [vmem:[%s6797_s7 + $0xd4] sm:$0xf] }
  0x1e   :  { %v164_v47 = vld [vmem:[%s6797_s7 + $0xc8] sm:$0xf]  ;;  %v166_v48 = vld [vmem:[%s6797_s7 + $0xd8] sm:$0xf]  ;;  %163 = vst [vmem:[#allocation2 + $0xcc] sm:$0xf] %v162_v46 }
  0x1f   :  { %165 = vst [vmem:[#allocation2 + $0xd0] sm:$0xf] %v164_v47  ;;  %167 = vst [vmem:[#allocation2 + $0xd4] sm:$0xf] %v166_v48  ;;  %v168_v49 = vld [vmem:[%s6797_s7 + $0xcc] sm:$0xf] }
  0x20   :  { %v174_v51 = vld [vmem:[%s6797_s7 + $0xf0] sm:$0xf]  ;;  %169 = vst [vmem:[#allocation2 + $0xd8] sm:$0xf] %v168_v49  ;;  %171 = vst [vmem:[#allocation2 + $0xdc] sm:$0xff] %v170_v50  }
  0x21   :  { %175 = vst [vmem:[#allocation2 + $0xe4] sm:$0xf] %v174_v51  ;;  %v176_v52 = vld [vmem:[%s6797_s7 + $0xe4] sm:$0xf]  ;;  %v178_v53 = vld [vmem:[%s6797_s7 + $0xf4] sm:$0xf] }
  0x22   :  { %v180_v54 = vld [vmem:[%s6797_s7 + $0xe8] sm:$0xf]  ;;  %177 = vst [vmem:[#allocation2 + $0xe8] sm:$0xf] %v176_v52  ;;  %179 = vst [vmem:[#allocation2 + $0xec] sm:$0xf] %v178_v53 }
  0x23   :  { %181 = vst [vmem:[#allocation2 + $0xf0] sm:$0xf] %v180_v54  ;;  %v182_v55 = vld [vmem:[%s6797_s7 + $0xf8] sm:$0xf]  ;;  %v184_v56 = vld [vmem:[%s6797_s7 + $0xec] sm:$0xf] }
  0x24   :  { %v186_v57 = vld [vmem:[%s6797_s7 + $0xfc] sm:$0xf]  ;;  %183 = vst [vmem:[#allocation2 + $0xf4] sm:$0xf] %v182_v55  ;;  %185 = vst [vmem:[#allocation2 + $0xf8] sm:$0xf] %v184_v56 }
  0x25   :  { %187 = vst [vmem:[#allocation2 + $0xfc] sm:$0xf] %v186_v57 }
  0x26   :  { %346 = vsyncadd [#allocation6], 4096  ;;  %v365_v58 = vld [vmem:[%s6790_s8] sm:$0xf]  ;;  %v367_v59 = vld [vmem:[%s6790_s8 + $0x10] sm:$0xf] }
  0x27   :  { %366 = vst [vmem:[#allocation3] sm:$0xf] %v365_v58  ;;  %368 = vst [vmem:[#allocation3 + $0x4] sm:$0xf] %v367_v59  ;;  %v369_v60 = vld [vmem:[%s6790_s8 + $0x4] sm:$0xf] }
  0x28   :  { %v371_v61 = vld [vmem:[%s6790_s8 + $0x14] sm:$0xf]  ;;  %v373_v62 = vld [vmem:[%s6790_s8 + $0x8] sm:$0xf]  ;;  %370 = vst [vmem:[#allocation3 + $0x8] sm:$0xf] %v369_v60 }
  0x29   :  { %372 = vst [vmem:[#allocation3 + $0xc] sm:$0xf] %v371_v61  ;;  %374 = vst [vmem:[#allocation3 + $0x10] sm:$0xf] %v373_v62  ;;  %v375_v63 = vld [vmem:[%s6790_s8 + $0x18] sm:$0xf] }
  0x2a   :  { %v377_v0 = vld [vmem:[%s6790_s8 + $0xc] sm:$0xf]  ;;  %v379_v1 = vld [vmem:[%s6790_s8 + $0x1c] sm:$0xff]   ;;  %376 = vst [vmem:[#allocation3 + $0x14] sm:$0xf] %v375_v63 }
  0x2b   :  { %378 = vst [vmem:[#allocation3 + $0x18] sm:$0xf] %v377_v0  ;;  %380 = vst [vmem:[#allocation3 + $0x1c] sm:$0xff] %v379_v1   ;;  %v383_v2 = vld [vmem:[%s6790_s8 + $0x30] sm:$0xf]  ;;  %v395_v8 = vld [vmem:[%s6790_s8 + $0x3c] sm:$0xff]  }
  0x2c   :  { %v385_v3 = vld [vmem:[%s6790_s8 + $0x24] sm:$0xf]  ;;  %v387_v4 = vld [vmem:[%s6790_s8 + $0x34] sm:$0xf]  ;;  %384 = vst [vmem:[#allocation3 + $0x24] sm:$0xf] %v383_v2 }
  0x2d   :  { %386 = vst [vmem:[#allocation3 + $0x28] sm:$0xf] %v385_v3  ;;  %388 = vst [vmem:[#allocation3 + $0x2c] sm:$0xf] %v387_v4  ;;  %v389_v5 = vld [vmem:[%s6790_s8 + $0x28] sm:$0xf] }
  0x2e   :  { %v391_v6 = vld [vmem:[%s6790_s8 + $0x38] sm:$0xf]  ;;  %v393_v7 = vld [vmem:[%s6790_s8 + $0x2c] sm:$0xf]  ;;  %390 = vst [vmem:[#allocation3 + $0x30] sm:$0xf] %v389_v5 }
  0x2f   :  { %392 = vst [vmem:[#allocation3 + $0x34] sm:$0xf] %v391_v6  ;;  %394 = vst [vmem:[#allocation3 + $0x38] sm:$0xf] %v393_v7  ;;  %v399_v9 = vld [vmem:[%s6790_s8 + $0x50] sm:$0xf] }
  0x30   :  { %v401_v10 = vld [vmem:[%s6790_s8 + $0x44] sm:$0xf]  ;;  %396 = vst [vmem:[#allocation3 + $0x3c] sm:$0xff] %v395_v8   ;;  %400 = vst [vmem:[#allocation3 + $0x44] sm:$0xf] %v399_v9  ;;  %v411_v15 = vld [vmem:[%s6790_s8 + $0x5c] sm:$0xff]  }
  0x31   :  { %402 = vst [vmem:[#allocation3 + $0x48] sm:$0xf] %v401_v10  ;;  %v403_v11 = vld [vmem:[%s6790_s8 + $0x54] sm:$0xf]  ;;  %v405_v12 = vld [vmem:[%s6790_s8 + $0x48] sm:$0xf] }
  0x32   :  { %v407_v13 = vld [vmem:[%s6790_s8 + $0x58] sm:$0xf]  ;;  %404 = vst [vmem:[#allocation3 + $0x4c] sm:$0xf] %v403_v11  ;;  %406 = vst [vmem:[#allocation3 + $0x50] sm:$0xf] %v405_v12 }
  0x33   :  { %408 = vst [vmem:[#allocation3 + $0x54] sm:$0xf] %v407_v13  ;;  %v409_v14 = vld [vmem:[%s6790_s8 + $0x4c] sm:$0xf]  ;;  %v415_v16 = vld [vmem:[%s6790_s8 + $0x70] sm:$0xf] }
  0x34   :  { %410 = vst [vmem:[#allocation3 + $0x58] sm:$0xf] %v409_v14  ;;  %412 = vst [vmem:[#allocation3 + $0x5c] sm:$0xff] %v411_v15   ;;  %v417_v17 = vld [vmem:[%s6790_s8 + $0x64] sm:$0xf]  ;;  %v427_v22 = vld [vmem:[%s6790_s8 + $0x7c] sm:$0xff]  }
  0x35   :  { %416 = vst [vmem:[#allocation3 + $0x64] sm:$0xf] %v415_v16  ;;  %v419_v18 = vld [vmem:[%s6790_s8 + $0x74] sm:$0xf]  ;;  %v421_v19 = vld [vmem:[%s6790_s8 + $0x68] sm:$0xf] }
  0x36   :  { %418 = vst [vmem:[#allocation3 + $0x68] sm:$0xf] %v417_v17  ;;  %420 = vst [vmem:[#allocation3 + $0x6c] sm:$0xf] %v419_v18  ;;  %v423_v20 = vld [vmem:[%s6790_s8 + $0x78] sm:$0xf] }
  0x37   :  { %422 = vst [vmem:[#allocation3 + $0x70] sm:$0xf] %v421_v19  ;;  %v425_v21 = vld [vmem:[%s6790_s8 + $0x6c] sm:$0xf]  ;;  %424 = vst [vmem:[#allocation3 + $0x74] sm:$0xf] %v423_v20 }
  0x38   :  { %426 = vst [vmem:[#allocation3 + $0x78] sm:$0xf] %v425_v21  ;;  %428 = vst [vmem:[#allocation3 + $0x7c] sm:$0xff] %v427_v22   ;;  %v431_v23 = vld [vmem:[%s6790_s8 + $0x90] sm:$0xf]  ;;  %v443_v29 = vld [vmem:[%s6790_s8 + $0x9c] sm:$0xff]  }
  0x39   :  { %v433_v24 = vld [vmem:[%s6790_s8 + $0x84] sm:$0xf]  ;;  %v435_v25 = vld [vmem:[%s6790_s8 + $0x94] sm:$0xf]  ;;  %432 = vst [vmem:[#allocation3 + $0x84] sm:$0xf] %v431_v23 }
  0x3a   :  { %434 = vst [vmem:[#allocation3 + $0x88] sm:$0xf] %v433_v24  ;;  %436 = vst [vmem:[#allocation3 + $0x8c] sm:$0xf] %v435_v25  ;;  %v437_v26 = vld [vmem:[%s6790_s8 + $0x88] sm:$0xf] }
  0x3b   :  { %v439_v27 = vld [vmem:[%s6790_s8 + $0x98] sm:$0xf]  ;;  %v441_v28 = vld [vmem:[%s6790_s8 + $0x8c] sm:$0xf]  ;;  %438 = vst [vmem:[#allocation3 + $0x90] sm:$0xf] %v437_v26 }
  0x3c   :  { %440 = vst [vmem:[#allocation3 + $0x94] sm:$0xf] %v439_v27  ;;  %442 = vst [vmem:[#allocation3 + $0x98] sm:$0xf] %v441_v28  ;;  %v447_v30 = vld [vmem:[%s6790_s8 + $0xb0] sm:$0xf] }
  0x3d   :  { %v449_v31 = vld [vmem:[%s6790_s8 + $0xa4] sm:$0xf]  ;;  %444 = vst [vmem:[#allocation3 + $0x9c] sm:$0xff] %v443_v29   ;;  %448 = vst [vmem:[#allocation3 + $0xa4] sm:$0xf] %v447_v30  ;;  %v459_v36 = vld [vmem:[%s6790_s8 + $0xbc] sm:$0xff]  }
  0x3e   :  { %450 = vst [vmem:[#allocation3 + $0xa8] sm:$0xf] %v449_v31  ;;  %v451_v32 = vld [vmem:[%s6790_s8 + $0xb4] sm:$0xf]  ;;  %v453_v33 = vld [vmem:[%s6790_s8 + $0xa8] sm:$0xf] }
  0x3f   :  { %v455_v34 = vld [vmem:[%s6790_s8 + $0xb8] sm:$0xf]  ;;  %452 = vst [vmem:[#allocation3 + $0xac] sm:$0xf] %v451_v32  ;;  %454 = vst [vmem:[#allocation3 + $0xb0] sm:$0xf] %v453_v33 }
  0x40   :  { %456 = vst [vmem:[#allocation3 + $0xb4] sm:$0xf] %v455_v34  ;;  %v457_v35 = vld [vmem:[%s6790_s8 + $0xac] sm:$0xf]  ;;  %v463_v37 = vld [vmem:[%s6790_s8 + $0xd0] sm:$0xf] }
  0x41   :  { %458 = vst [vmem:[#allocation3 + $0xb8] sm:$0xf] %v457_v35  ;;  %460 = vst [vmem:[#allocation3 + $0xbc] sm:$0xff] %v459_v36   ;;  %v465_v38 = vld [vmem:[%s6790_s8 + $0xc4] sm:$0xf]  ;;  %v475_v43 = vld [vmem:[%s6790_s8 + $0xdc] sm:$0xff]  }
  0x42   :  { %464 = vst [vmem:[#allocation3 + $0xc4] sm:$0xf] %v463_v37  ;;  %v467_v39 = vld [vmem:[%s6790_s8 + $0xd4] sm:$0xf]  ;;  %v469_v40 = vld [vmem:[%s6790_s8 + $0xc8] sm:$0xf] }
  0x43   :  { %466 = vst [vmem:[#allocation3 + $0xc8] sm:$0xf] %v465_v38  ;;  %468 = vst [vmem:[#allocation3 + $0xcc] sm:$0xf] %v467_v39  ;;  %v471_v41 = vld [vmem:[%s6790_s8 + $0xd8] sm:$0xf] }
  0x44   :  { %470 = vst [vmem:[#allocation3 + $0xd0] sm:$0xf] %v469_v40  ;;  %v473_v42 = vld [vmem:[%s6790_s8 + $0xcc] sm:$0xf]  ;;  %472 = vst [vmem:[#allocation3 + $0xd4] sm:$0xf] %v471_v41 }
  0x45   :  { %474 = vst [vmem:[#allocation3 + $0xd8] sm:$0xf] %v473_v42  ;;  %476 = vst [vmem:[#allocation3 + $0xdc] sm:$0xff] %v475_v43   ;;  %v479_v44 = vld [vmem:[%s6790_s8 + $0xf0] sm:$0xf] }
  0x46   :  { %v481_v45 = vld [vmem:[%s6790_s8 + $0xe4] sm:$0xf]  ;;  %v483_v46 = vld [vmem:[%s6790_s8 + $0xf4] sm:$0xf]  ;;  %480 = vst [vmem:[#allocation3 + $0xe4] sm:$0xf] %v479_v44 }
  0x47   :  { %482 = vst [vmem:[#allocation3 + $0xe8] sm:$0xf] %v481_v45  ;;  %484 = vst [vmem:[#allocation3 + $0xec] sm:$0xf] %v483_v46  ;;  %v485_v47 = vld [vmem:[%s6790_s8 + $0xe8] sm:$0xf] }
  0x48   :  { %v487_v48 = vld [vmem:[%s6790_s8 + $0xf8] sm:$0xf]  ;;  %v489_v49 = vld [vmem:[%s6790_s8 + $0xec] sm:$0xf]  ;;  %486 = vst [vmem:[#allocation3 + $0xf0] sm:$0xf] %v485_v47 }
  0x49   :  { %488 = vst [vmem:[#allocation3 + $0xf4] sm:$0xf] %v487_v48  ;;  %490 = vst [vmem:[#allocation3 + $0xf8] sm:$0xf] %v489_v49  ;;  %v491_v50 = vld [vmem:[%s6790_s8 + $0xfc] sm:$0xf] }
  0x4a   :  { %492 = vst [vmem:[#allocation3 + $0xfc] sm:$0xf] %v491_v50 }
  0x4b   :  { %651 = vsyncadd [#allocation6 + $0x1], 4096  ;;  %v670_v51 = vld [vmem:[%s6791_s9] sm:$0xf]  ;;  %v672_v52 = vld [vmem:[%s6791_s9 + $0x10] sm:$0xf] }
  0x4c   :  { %671 = vst [vmem:[#allocation4] sm:$0xf] %v670_v51  ;;  %673 = vst [vmem:[#allocation4 + $0x4] sm:$0xf] %v672_v52  ;;  %v674_v53 = vld [vmem:[%s6791_s9 + $0x4] sm:$0xf] }
  0x4d   :  { %v676_v54 = vld [vmem:[%s6791_s9 + $0x14] sm:$0xf]  ;;  %v678_v55 = vld [vmem:[%s6791_s9 + $0x8] sm:$0xf]  ;;  %675 = vst [vmem:[#allocation4 + $0x8] sm:$0xf] %v674_v53 }
  0x4e   :  { %677 = vst [vmem:[#allocation4 + $0xc] sm:$0xf] %v676_v54  ;;  %679 = vst [vmem:[#allocation4 + $0x10] sm:$0xf] %v678_v55  ;;  %v680_v56 = vld [vmem:[%s6791_s9 + $0x18] sm:$0xf] }
  0x4f   :  { %v682_v57 = vld [vmem:[%s6791_s9 + $0xc] sm:$0xf]  ;;  %v684_v58 = vld [vmem:[%s6791_s9 + $0x1c] sm:$0xff]   ;;  %681 = vst [vmem:[#allocation4 + $0x14] sm:$0xf] %v680_v56 }
  0x50   :  { %683 = vst [vmem:[#allocation4 + $0x18] sm:$0xf] %v682_v57  ;;  %685 = vst [vmem:[#allocation4 + $0x1c] sm:$0xff] %v684_v58   ;;  %v688_v59 = vld [vmem:[%s6791_s9 + $0x30] sm:$0xf]  ;;  %v700_v1 = vld [vmem:[%s6791_s9 + $0x3c] sm:$0xff]  }
  0x51   :  { %v690_v60 = vld [vmem:[%s6791_s9 + $0x24] sm:$0xf]  ;;  %v692_v61 = vld [vmem:[%s6791_s9 + $0x34] sm:$0xf]  ;;  %689 = vst [vmem:[#allocation4 + $0x24] sm:$0xf] %v688_v59 }
  0x52   :  { %691 = vst [vmem:[#allocation4 + $0x28] sm:$0xf] %v690_v60  ;;  %693 = vst [vmem:[#allocation4 + $0x2c] sm:$0xf] %v692_v61  ;;  %v694_v62 = vld [vmem:[%s6791_s9 + $0x28] sm:$0xf] }
  0x53   :  { %v696_v63 = vld [vmem:[%s6791_s9 + $0x38] sm:$0xf]  ;;  %v698_v0 = vld [vmem:[%s6791_s9 + $0x2c] sm:$0xf]  ;;  %695 = vst [vmem:[#allocation4 + $0x30] sm:$0xf] %v694_v62 }
  0x54   :  { %697 = vst [vmem:[#allocation4 + $0x34] sm:$0xf] %v696_v63  ;;  %699 = vst [vmem:[#allocation4 + $0x38] sm:$0xf] %v698_v0  ;;  %v704_v2 = vld [vmem:[%s6791_s9 + $0x50] sm:$0xf] }
  0x55   :  { %v706_v3 = vld [vmem:[%s6791_s9 + $0x44] sm:$0xf]  ;;  %701 = vst [vmem:[#allocation4 + $0x3c] sm:$0xff] %v700_v1   ;;  %705 = vst [vmem:[#allocation4 + $0x44] sm:$0xf] %v704_v2  ;;  %v716_v8 = vld [vmem:[%s6791_s9 + $0x5c] sm:$0xff]  }
  0x56   :  { %707 = vst [vmem:[#allocation4 + $0x48] sm:$0xf] %v706_v3  ;;  %v708_v4 = vld [vmem:[%s6791_s9 + $0x54] sm:$0xf]  ;;  %v710_v5 = vld [vmem:[%s6791_s9 + $0x48] sm:$0xf] }
  0x57   :  { %v712_v6 = vld [vmem:[%s6791_s9 + $0x58] sm:$0xf]  ;;  %709 = vst [vmem:[#allocation4 + $0x4c] sm:$0xf] %v708_v4  ;;  %711 = vst [vmem:[#allocation4 + $0x50] sm:$0xf] %v710_v5 }
  0x58   :  { %713 = vst [vmem:[#allocation4 + $0x54] sm:$0xf] %v712_v6  ;;  %v714_v7 = vld [vmem:[%s6791_s9 + $0x4c] sm:$0xf]  ;;  %v720_v9 = vld [vmem:[%s6791_s9 + $0x70] sm:$0xf] }
  0x59   :  { %715 = vst [vmem:[#allocation4 + $0x58] sm:$0xf] %v714_v7  ;;  %717 = vst [vmem:[#allocation4 + $0x5c] sm:$0xff] %v716_v8   ;;  %v722_v10 = vld [vmem:[%s6791_s9 + $0x64] sm:$0xf]  ;;  %v732_v15 = vld [vmem:[%s6791_s9 + $0x7c] sm:$0xff]  }
  0x5a   :  { %721 = vst [vmem:[#allocation4 + $0x64] sm:$0xf] %v720_v9  ;;  %v724_v11 = vld [vmem:[%s6791_s9 + $0x74] sm:$0xf]  ;;  %v726_v12 = vld [vmem:[%s6791_s9 + $0x68] sm:$0xf] }
  0x5b   :  { %723 = vst [vmem:[#allocation4 + $0x68] sm:$0xf] %v722_v10  ;;  %725 = vst [vmem:[#allocation4 + $0x6c] sm:$0xf] %v724_v11  ;;  %v728_v13 = vld [vmem:[%s6791_s9 + $0x78] sm:$0xf] }
  0x5c   :  { %727 = vst [vmem:[#allocation4 + $0x70] sm:$0xf] %v726_v12  ;;  %v730_v14 = vld [vmem:[%s6791_s9 + $0x6c] sm:$0xf]  ;;  %729 = vst [vmem:[#allocation4 + $0x74] sm:$0xf] %v728_v13 }
  0x5d   :  { %731 = vst [vmem:[#allocation4 + $0x78] sm:$0xf] %v730_v14  ;;  %733 = vst [vmem:[#allocation4 + $0x7c] sm:$0xff] %v732_v15   ;;  %v736_v16 = vld [vmem:[%s6791_s9 + $0x90] sm:$0xf]  ;;  %v748_v22 = vld [vmem:[%s6791_s9 + $0x9c] sm:$0xff]  }
  0x5e   :  { %v738_v17 = vld [vmem:[%s6791_s9 + $0x84] sm:$0xf]  ;;  %v740_v18 = vld [vmem:[%s6791_s9 + $0x94] sm:$0xf]  ;;  %737 = vst [vmem:[#allocation4 + $0x84] sm:$0xf] %v736_v16 }
  0x5f   :  { %739 = vst [vmem:[#allocation4 + $0x88] sm:$0xf] %v738_v17  ;;  %741 = vst [vmem:[#allocation4 + $0x8c] sm:$0xf] %v740_v18  ;;  %v742_v19 = vld [vmem:[%s6791_s9 + $0x88] sm:$0xf] }
  0x60   :  { %v744_v20 = vld [vmem:[%s6791_s9 + $0x98] sm:$0xf]  ;;  %v746_v21 = vld [vmem:[%s6791_s9 + $0x8c] sm:$0xf]  ;;  %743 = vst [vmem:[#allocation4 + $0x90] sm:$0xf] %v742_v19 }
  0x61   :  { %745 = vst [vmem:[#allocation4 + $0x94] sm:$0xf] %v744_v20  ;;  %747 = vst [vmem:[#allocation4 + $0x98] sm:$0xf] %v746_v21  ;;  %v752_v23 = vld [vmem:[%s6791_s9 + $0xb0] sm:$0xf] }
  0x62   :  { %v754_v24 = vld [vmem:[%s6791_s9 + $0xa4] sm:$0xf]  ;;  %749 = vst [vmem:[#allocation4 + $0x9c] sm:$0xff] %v748_v22   ;;  %753 = vst [vmem:[#allocation4 + $0xa4] sm:$0xf] %v752_v23  ;;  %v764_v29 = vld [vmem:[%s6791_s9 + $0xbc] sm:$0xff]  }
  0x63   :  { %755 = vst [vmem:[#allocation4 + $0xa8] sm:$0xf] %v754_v24  ;;  %v756_v25 = vld [vmem:[%s6791_s9 + $0xb4] sm:$0xf]  ;;  %v758_v26 = vld [vmem:[%s6791_s9 + $0xa8] sm:$0xf] }
  0x64   :  { %v760_v27 = vld [vmem:[%s6791_s9 + $0xb8] sm:$0xf]  ;;  %757 = vst [vmem:[#allocation4 + $0xac] sm:$0xf] %v756_v25  ;;  %759 = vst [vmem:[#allocation4 + $0xb0] sm:$0xf] %v758_v26 }
  0x65   :  { %761 = vst [vmem:[#allocation4 + $0xb4] sm:$0xf] %v760_v27  ;;  %v762_v28 = vld [vmem:[%s6791_s9 + $0xac] sm:$0xf]  ;;  %v768_v30 = vld [vmem:[%s6791_s9 + $0xd0] sm:$0xf] }
  0x66   :  { %763 = vst [vmem:[#allocation4 + $0xb8] sm:$0xf] %v762_v28  ;;  %765 = vst [vmem:[#allocation4 + $0xbc] sm:$0xff] %v764_v29   ;;  %v770_v31 = vld [vmem:[%s6791_s9 + $0xc4] sm:$0xf]  ;;  %v780_v36 = vld [vmem:[%s6791_s9 + $0xdc] sm:$0xff]  }
  0x67   :  { %769 = vst [vmem:[#allocation4 + $0xc4] sm:$0xf] %v768_v30  ;;  %v772_v32 = vld [vmem:[%s6791_s9 + $0xd4] sm:$0xf]  ;;  %v774_v33 = vld [vmem:[%s6791_s9 + $0xc8] sm:$0xf] }
  0x68   :  { %771 = vst [vmem:[#allocation4 + $0xc8] sm:$0xf] %v770_v31  ;;  %773 = vst [vmem:[#allocation4 + $0xcc] sm:$0xf] %v772_v32  ;;  %v776_v34 = vld [vmem:[%s6791_s9 + $0xd8] sm:$0xf] }
  0x69   :  { %775 = vst [vmem:[#allocation4 + $0xd0] sm:$0xf] %v774_v33  ;;  %v778_v35 = vld [vmem:[%s6791_s9 + $0xcc] sm:$0xf]  ;;  %777 = vst [vmem:[#allocation4 + $0xd4] sm:$0xf] %v776_v34 }
  0x6a   :  { %779 = vst [vmem:[#allocation4 + $0xd8] sm:$0xf] %v778_v35  ;;  %781 = vst [vmem:[#allocation4 + $0xdc] sm:$0xff] %v780_v36   ;;  %v784_v37 = vld [vmem:[%s6791_s9 + $0xf0] sm:$0xf] }
  0x6b   :  { %v786_v38 = vld [vmem:[%s6791_s9 + $0xe4] sm:$0xf]  ;;  %v788_v39 = vld [vmem:[%s6791_s9 + $0xf4] sm:$0xf]  ;;  %785 = vst [vmem:[#allocation4 + $0xe4] sm:$0xf] %v784_v37 }
  0x6c   :  { %787 = vst [vmem:[#allocation4 + $0xe8] sm:$0xf] %v786_v38  ;;  %789 = vst [vmem:[#allocation4 + $0xec] sm:$0xf] %v788_v39  ;;  %v790_v40 = vld [vmem:[%s6791_s9 + $0xe8] sm:$0xf] }
  0x6d   :  { %v792_v41 = vld [vmem:[%s6791_s9 + $0xf8] sm:$0xf]  ;;  %v794_v42 = vld [vmem:[%s6791_s9 + $0xec] sm:$0xf]  ;;  %791 = vst [vmem:[#allocation4 + $0xf0] sm:$0xf] %v790_v40 }
  0x6e   :  { %793 = vst [vmem:[#allocation4 + $0xf4] sm:$0xf] %v792_v41  ;;  %795 = vst [vmem:[#allocation4 + $0xf8] sm:$0xf] %v794_v42  ;;  %v796_v43 = vld [vmem:[%s6791_s9 + $0xfc] sm:$0xf] }
  0x6f   :  { %797 = vst [vmem:[#allocation4 + $0xfc] sm:$0xf] %v796_v43 }
  0x70   :  { %956 = vsyncadd [#allocation6 + $0x2], 4096  ;;  %v4213_v44 = vld [vmem:[%s6785_s2] sm:$0xff]   ;;  %v1074_v45 = vlaneseq  ;;  %v4722_v46 = vmov 0.0   ;;  %v4214_v47 = vld [vmem:[%s6785_s2 + $0x8] sm:$0xff]   ;;  %vm4723_vm0 = vmmov 0  }
  0x71   :  { %4193 = vmatprep.subr.bf16.mxu0 %v4722_v46  ;;  %v957_v48 = vld [vmem:[%s6783_s0] sm:$0xff]  ;;  %v958_v49 = vld [vmem:[%s6783_s0 + $0x8] sm:$0xff]  ;;  %4197 = vmatprep.mubr.msk.bf16.mxu0 %vm4723_vm0, %v4722_v46  ;;  %v4724_v50 = vmov 1983009808   ;;  %v6802_v53 = vmov 0   ;;  %vm983_vm1 = vcmask 261120  }
  0x72   :  { %4194 = vmatpush3.bf16.msra.mxu0 %v4213_v44  ;;  %v1072_v51 = vunpack.c.l.s4 %v4724_v50  ;;  %v5329_v52 = vshrl.u32 %v1074_v45, 7  ;;  %1136 = vmatprep.mubr.bf16.mxu1 %v6802_v53  ;;  %v959_v54 = vpack.c.bf16 %v958_v49, %v957_v48  ;;  %v1068_v55 = vld [vmem:[%s6788_s5] sm:$0xff]  ;;  %vm1091_vm2 = vcmask 1041408   ;;  %v1033_v60 = vld [vmem:[%s6784_s1 + $0x8] sm:$0xff] }
  0x73   :  { %4195 = vmatprep.subr.bf16.mxu0 %v4722_v46  ;;  %v1070_v56 = vcombine.high %v1068_v55, %v1068_v55  ;;  %v1032_v59 = vld [vmem:[%s6784_s1] sm:$0xff]  ;;  %vm1087_vm3 = vcmask 31744   ;;  %v4242_v20 = vld [vmem:[%s6787_s4 + $0xc] ss:$16 sps:$4 sm:$0xff]   ;;  %v4240_v30 = vld [vmem:[%s6787_s4 + $0x8] ss:$16 sps:$4 sm:$0xff]  }
  0x74   :  { %v1073_v57 = vunpack.c.0.s8 %v1072_v51  ;;  %v1034_v2 = vpack.c.bf16 %v1033_v60, %v1032_v59  ;;  %v4218_v3 = vld [vmem:[%s6787_s4 + $0x4] ss:$16 sps:$4 sm:$0xff]   ;;  %v4216_v5 = vld [vmem:[%s6787_s4] ss:$16 sps:$4 sm:$0xff]   ;;  %v4245_v32 = vld [vmem:[%s6787_s4 + $0x2c] ss:$16 sps:$4 sm:$0xff]  }
  0x75   :  { %v4221_v6 = vld [vmem:[%s6787_s4 + $0x24] ss:$16 sps:$4 sm:$0xff]   ;;  %v4219_v7 = vld [vmem:[%s6787_s4 + $0x20] ss:$16 sps:$4 sm:$0xff]   ;;  %v4243_v33 = vld [vmem:[%s6787_s4 + $0x28] ss:$16 sps:$4 sm:$0xff]  }
  0x76   :  { %4196 = vmatpush3.bf16.msra.mxu0 %v4214_v47  ;;  %v1076_v58 = vsub.s32 %v1073_v57, %v5329_v52  ;;  %v4224_v8 = vld [vmem:[%s6787_s4 + $0x44] ss:$16 sps:$4 sm:$0xff]   ;;  %v4222_v9 = vld [vmem:[%s6787_s4 + $0x40] ss:$16 sps:$4 sm:$0xff]   ;;  %v4248_v34 = vld [vmem:[%s6787_s4 + $0x4c] ss:$16 sps:$4 sm:$0xff]  }
  0x77   :  { %v4227_v10 = vld [vmem:[%s6787_s4 + $0x64] ss:$16 sps:$4 sm:$0xff]   ;;  %v4225_v11 = vld [vmem:[%s6787_s4 + $0x60] ss:$16 sps:$4 sm:$0xff]   ;;  %v4246_v35 = vld [vmem:[%s6787_s4 + $0x48] ss:$16 sps:$4 sm:$0xff]  }
  0x78   :  { %v1077_v61 = vrot.slane %v1068_v55, %v1076_v58  ;;  %v1084_v62 = vrot.slane %v1070_v56, %v1076_v58  ;;  %v4230_v12 = vld [vmem:[%s6787_s4 + $0x84] ss:$16 sps:$4 sm:$0xff]   ;;  %v4228_v13 = vld [vmem:[%s6787_s4 + $0x80] ss:$16 sps:$4 sm:$0xff]   ;;  %v4251_v36 = vld [vmem:[%s6787_s4 + $0x6c] ss:$16 sps:$4 sm:$0xff]  }
  0x79   :  { %4198 = vmatmul.mubr.msk.bf16.vlgmr.msra.gmra.mrb[0].mxu0 %vm983_vm1, %v959_v54  ;;  %v4233_v14 = vld [vmem:[%s6787_s4 + $0xa4] ss:$16 sps:$4 sm:$0xff]   ;;  %v4231_v15 = vld [vmem:[%s6787_s4 + $0xa0] ss:$16 sps:$4 sm:$0xff]   ;;  %v4249_v37 = vld [vmem:[%s6787_s4 + $0x68] ss:$16 sps:$4 sm:$0xff]  }
  0x7a   :  { %v1085_v63 = vcombine.high %v1077_v61, %v1077_v61  ;;  %v1093_v0 = vsel %vm1091_vm2, %v1077_v61, 0  ;;  %v1086_v1 = vcombine.high %v1084_v62, %v1084_v62  ;;  %v1099_v4 = vsel %vm1091_vm2, %v1084_v62, 0  ;;  %v4236_v16 = vld [vmem:[%s6787_s4 + $0xc4] ss:$16 sps:$4 sm:$0xff]   ;;  %v4234_v17 = vld [vmem:[%s6787_s4 + $0xc0] ss:$16 sps:$4 sm:$0xff]  }
  0x7b   :  { %v4239_v18 = vld [vmem:[%s6787_s4 + $0xe4] ss:$16 sps:$4 sm:$0xff]   ;;  %v4237_v19 = vld [vmem:[%s6787_s4 + $0xe0] ss:$16 sps:$4 sm:$0xff]   ;;  %v4254_v38 = vld [vmem:[%s6787_s4 + $0x8c] ss:$16 sps:$4 sm:$0xff]  }
  0x7c   :  { %4101 = vmatprep.subr.msk.bf16.mxu1 %vm1091_vm2, %v1085_v63  ;;  %v4097_v21 = vld [vmem:[%s6786_s3] ss:$0 sm:$0xff]  ;;  %v4252_v39 = vld [vmem:[%s6787_s4 + $0x88] ss:$16 sps:$4 sm:$0xff]   ;;  %v4257_v40 = vld [vmem:[%s6787_s4 + $0xac] ss:$16 sps:$4 sm:$0xff]  }
  0x7d   :  { %1105 = vmatpush1.bf16.msra.mxu1 %v1093_v0  ;;  %v4255_v41 = vld [vmem:[%s6787_s4 + $0xa8] ss:$16 sps:$4 sm:$0xff]   ;;  %v4260_v42 = vld [vmem:[%s6787_s4 + $0xcc] ss:$16 sps:$4 sm:$0xff]   ;;  %v6801_v46 = vsub.s32 0, %v5329_v52  ;;  %v6800_v48 = vsub.s32 1, %v5329_v52 }
  0x7e   :  { %4103 = vmatprep.subr.msk.bf16.mxu1 %vm1091_vm2, %v1086_v1  ;;  %v4258_v43 = vld [vmem:[%s6787_s4 + $0xc8] ss:$16 sps:$4 sm:$0xff]   ;;  %v4263_v44 = vld [vmem:[%s6787_s4 + $0xec] ss:$16 sps:$4 sm:$0xff]   ;;  %v1436_v47 = vld [vmem:[%s6789_s6] sm:$0xf] }
  0x7f   :  { %v4261_v45 = vld [vmem:[%s6787_s4 + $0xe8] ss:$16 sps:$4 sm:$0xff]   ;;  %v1441_v49 = vrot.slane %v1436_v47, %v6801_v46  ;;  %v1445_v50 = vrot.slane %v1436_v47, %v6800_v48  ;;  %v6799_v61 = vsub.s32 2, %v5329_v52  ;;  %v6798_v62 = vsub.s32 3, %v5329_v52 }
  0x80   :  { %4102 = vmatmul.mubr.msk.bf16.vlgmr.msra.gmra.mrb[0].mxu1 %vm1087_vm3, %v1034_v2 }
  0x81   :  { %1148 = vmatpush1.bf16.msra.mxu1 %v1099_v4  ;;  %1179 = vmatprep.mubr.bf16.mxu1 %v6802_v53  ;;  %v1449_v63 = vrot.slane %v1436_v47, %v6799_v61  ;;  %v1453_v0 = vrot.slane %v1436_v47, %v6798_v62 }
  0x82   :  { %1350 = vmatprep.subr.bf16.mxu1 %v4218_v3 }
  0x88   :  { %4104 = vmatmul.mubr.msk.bf16.vlgmr.msra.gmra.mrb[4].mxu1 %vm1087_vm3, %v1034_v2 }
  0x89   :  { %1351 = vmatpush1.bf16.msra.mxu1 %v4216_v5  ;;  %1382 = vmatprep.mubr.bf16.mxu1 %v6802_v53 }
  0x8a   :  { %1352 = vmatprep.subr.bf16.mxu1 %v4221_v6 }
  0x8d   :  { %1353 = vmatpush1.bf16.msra.mxu1 %v4219_v7 }
  0x8e   :  { %1354 = vmatprep.subr.bf16.mxu1 %v4224_v8 }
  0x91   :  { %1355 = vmatpush1.bf16.msra.mxu1 %v4222_v9 }
  0x92   :  { %1356 = vmatprep.subr.bf16.mxu1 %v4227_v10 }
  0x95   :  { %1357 = vmatpush1.bf16.msra.mxu1 %v4225_v11 }
  0x96   :  { %1358 = vmatprep.subr.bf16.mxu1 %v4230_v12 }
  0x99   :  { %1359 = vmatpush1.bf16.msra.mxu1 %v4228_v13 }
  0x9a   :  { %1360 = vmatprep.subr.bf16.mxu1 %v4233_v14 }
  0x9d   :  { %1361 = vmatpush1.bf16.msra.mxu1 %v4231_v15 }
  0x9e   :  { %1362 = vmatprep.subr.bf16.mxu1 %v4236_v16 }
  0xa1   :  { %1363 = vmatpush1.bf16.msra.mxu1 %v4234_v17 }
  0xa2   :  { %1364 = vmatprep.subr.bf16.mxu1 %v4239_v18 }
  0xa5   :  { %1365 = vmatpush1.bf16.msra.mxu1 %v4237_v19 }
  0xa6   :  { %1393 = vmatprep.subr.bf16.mxu1 %v4242_v20 }
 0x14c   :  { %v1021_v22 = vpop.f32.mrb[0].mxu0 }
 0x14d   :  { %v1022_v23 = vadd.f32 %v4097_v21, %v1021_v22  ;;  %v4199_v24 = vpop.f32.mrb[1].mxu0 }
 0x14e   :  { %v1024_v25 = vpop.f32.mrb[2].mxu0 }
 0x14f   :  { %4264 = vtanh.f32 %v1022_v23  ;;  %v1025_v26 = vadd.f32 %v4097_v21, %v1024_v25  ;;  %v4200_v27 = vpop.f32.mrb[3].mxu0 }
 0x151   :  { %4266 = vtanh.f32 %v1025_v26 }
 0x159   :  { %v4265_v28 = vpop.eup %4264 }
 0x15a   :  { %1030 = vst [vmem:[%s6795_s13] sm:$0xff] %v4265_v28 }
 0x15b   :  { %v4267_v29 = vpop.eup %4266 }
 0x15c   :  { %1031 = vst [vmem:[%s6795_s13 + $0x8] sm:$0xff] %v4267_v29  ;;  %v1035_v31 = vpack.c.bf16 %v4267_v29, %v4265_v28 }
 0x15e   :  { %1383 = vmatmul.mubr.bf16.vlgmr.msra.gmra.mrb[0].mxu1 %v1035_v31 }
 0x15f   :  { %1394 = vmatpush1.bf16.msra.mxu1 %v4240_v30  ;;  %1425 = vmatprep.mubr.bf16.mxu1 %v6802_v53 }
 0x160   :  { %1395 = vmatprep.subr.bf16.mxu1 %v4245_v32 }
 0x163   :  { %1396 = vmatpush1.bf16.msra.mxu1 %v4243_v33 }
 0x164   :  { %1397 = vmatprep.subr.bf16.mxu1 %v4248_v34 }
 0x167   :  { %1398 = vmatpush1.bf16.msra.mxu1 %v4246_v35 }
 0x168   :  { %1399 = vmatprep.subr.bf16.mxu1 %v4251_v36 }
 0x16b   :  { %1400 = vmatpush1.bf16.msra.mxu1 %v4249_v37 }
 0x16c   :  { %1401 = vmatprep.subr.bf16.mxu1 %v4254_v38 }
 0x16f   :  { %1402 = vmatpush1.bf16.msra.mxu1 %v4252_v39 }
 0x170   :  { %1403 = vmatprep.subr.bf16.mxu1 %v4257_v40 }
 0x173   :  { %1404 = vmatpush1.bf16.msra.mxu1 %v4255_v41 }
 0x174   :  { %1405 = vmatprep.subr.bf16.mxu1 %v4260_v42 }
 0x177   :  { %1406 = vmatpush1.bf16.msra.mxu1 %v4258_v43 }
 0x178   :  { %1407 = vmatprep.subr.bf16.mxu1 %v4263_v44 }
 0x17b   :  { %1408 = vmatpush1.bf16.msra.mxu1 %v4261_v45 }
 0x17e   :  { %1426 = vmatmul.mubr.bf16.vlgmr.msra.gmra.mrb[4].mxu1 %v1035_v31 }
 0x231   :  { %v1384_v51 = vpop.f32.mrb[0].mxu1 }
 0x232   :  { %v1458_v54 = vadd.f32 %v1441_v49, %v1384_v51  ;;  %v1386_v55 = vpop.f32.mrb[1].mxu1 }
 0x233   :  { %v1459_v56 = vadd.f32 %v1445_v50, %v1386_v55  ;;  %v1388_v57 = vpop.f32.mrb[2].mxu1 }
 0x234   :  { %1466 = vst [vmem:[#allocation5] sm:$0xff] %v1458_v54  ;;  %v1462_v58 = vadd.f32 %v1441_v49, %v1388_v57  ;;  %v1390_v59 = vpop.f32.mrb[3].mxu1 }
 0x235   :  { %1467 = vst [vmem:[#allocation5 + $0x8] sm:$0xff] %v1459_v56  ;;  %v1463_v60 = vadd.f32 %v1445_v50, %v1390_v59 }
 0x236   :  { %1470 = vst [vmem:[#allocation5 + $0x20] sm:$0xff] %v1462_v58 }
 0x237   :  { %1471 = vst [vmem:[#allocation5 + $0x28] sm:$0xff] %v1463_v60 }
 0x251   :  { %v1427_v1 = vpop.f32.mrb[4].mxu1 }
 0x252   :  { %v1460_v2 = vadd.f32 %v1449_v63, %v1427_v1  ;;  %v1429_v3 = vpop.f32.mrb[5].mxu1 }
 0x253   :  { %v1461_v4 = vadd.f32 %v1453_v0, %v1429_v3  ;;  %v1431_v5 = vpop.f32.mrb[6].mxu1 }
 0x254   :  { %1468 = vst [vmem:[#allocation5 + $0x10] sm:$0xff] %v1460_v2  ;;  %v1464_v6 = vadd.f32 %v1449_v63, %v1431_v5  ;;  %v1433_v7 = vpop.f32.mrb[7].mxu1 }
 0x255   :  { %1469 = vst [vmem:[#allocation5 + $0x18] sm:$0xff] %v1461_v4  ;;  %v1465_v8 = vadd.f32 %v1453_v0, %v1433_v7 }
 0x256   :  { %1472 = vst [vmem:[#allocation5 + $0x30] sm:$0xff] %v1464_v6 }
 0x257   :  { %1473 = vst [vmem:[#allocation5 + $0x38] sm:$0xff] %v1465_v8 }
 0x258   :  { %4716 = dma.done.wait [#allocation6], 4096 }
 0x259   :  { %4717 = vsyncadd [#allocation6], 4294963200 }
 0x25a   :  { %4718 = dma.done.wait [#allocation6 + $0x1], 4096 }
 0x25b   :  { %4719 = vsyncadd [#allocation6 + $0x1], 4294963200 }
 0x25c   :  { %4720 = dma.done.wait [#allocation6 + $0x2], 4096 }
 0x25d   :  { %4721 = vsyncadd [#allocation6 + $0x2], 4294963200  ;;  %1665 = vmatprep.mubr.bf16.mxu0 %v6802_v53  ;;  %1788 = vmatprep.mubr.bf16.mxu1 %v6802_v53  ;;  %v5471_v9 = vld [vmem:[#allocation3 + $0x8] sm:$0xff]  ;;  %v5473_v10 = vld [vmem:[#allocation3] sm:$0xff]  ;;  %vm4025_vm4 = vcmask 1024  }
 0x25e   :  { %7019 = vst [vmem:[#allocation14_spill] sm:$0xff] %v5471_v9  ;;  %v5475_v11 = vld [vmem:[#allocation3 + $0x28] sm:$0xff]  ;;  %1633 = vmatprep.subr.bf16.mxu0 %v5471_v9  ;;  %v5480_v12 = vld [vmem:[#allocation3 + $0x20] sm:$0xff]  ;;  %v1602_v22 = vld [vmem:[#allocation5 + $0x10] sm:$0x3] }
 0x25f   :  { %1634 = vmatpush1.bf16.msra.mxu0 %v5473_v10  ;;  %v5482_v13 = vld [vmem:[#allocation3 + $0x48] sm:$0xff]  ;;  %v1600_v14 = vld [vmem:[#allocation5] sm:$0x3]  ;;  %v4139_v24 = vmul.f32 -1.442695, %v1602_v22  ;;  %v5500_v25 = vld [vmem:[#allocation2 + $0x18] sm:$0xff] }
 0x260   :  { %1635 = vmatprep.subr.bf16.mxu0 %v5475_v11  ;;  %v1601_v15 = vld [vmem:[#allocation5 + $0x8] sm:$0x3]  ;;  %v5486_v16 = vld [vmem:[#allocation3 + $0x40] sm:$0xff]  ;;  %v4137_v17 = vmul.f32 -1.442695, %v1600_v14  ;;  %1756 = vmatprep.subr.bf16.mxu1 %v5500_v25  ;;  %v5505_v27 = vld [vmem:[#allocation2 + $0x10] sm:$0xff] }
 0x261   :  { %v4138_v18 = vmul.f32 -1.442695, %v1601_v15  ;;  %v5488_v19 = vld [vmem:[#allocation3 + $0x68] sm:$0xff]  ;;  %v5492_v20 = vld [vmem:[#allocation3 + $0x60] sm:$0xff]  ;;  %v5507_v28 = vld [vmem:[#allocation2 + $0x38] sm:$0xff]  ;;  %1757 = vmatpush1.bf16.msra.mxu1 %v5505_v27 }
 0x262   :  { %4268 = vpow2.f32 %v4137_v17  ;;  %v5494_v21 = vld [vmem:[#allocation3 + $0x88] sm:$0xff]  ;;  %v5498_v23 = vld [vmem:[#allocation3 + $0x80] sm:$0xff]  ;;  %v1603_v29 = vld [vmem:[#allocation5 + $0x18] sm:$0x3]  ;;  %1758 = vmatprep.subr.bf16.mxu1 %v5507_v28 }
 0x263   :  { %1636 = vmatpush1.bf16.msra.mxu0 %v5480_v12  ;;  %4270 = vpow2.f32 %v4138_v18  ;;  %v5502_v26 = vld [vmem:[#allocation3 + $0xa8] sm:$0xff]  ;;  %v5512_v30 = vld [vmem:[#allocation2 + $0x30] sm:$0xff]  ;;  %v5515_v32 = vld [vmem:[#allocation3 + $0xa0] sm:$0xff] }
 0x264   :  { %1637 = vmatprep.subr.bf16.mxu0 %v5482_v13  ;;  %4272 = vpow2.f32 %v4139_v24  ;;  %v5517_v33 = vld [vmem:[#allocation2 + $0x58] sm:$0xff]  ;;  %v5519_v35 = vld [vmem:[#allocation3 + $0xc8] sm:$0xff]  ;;  %v5524_v38 = vld [vmem:[#allocation2 + $0x50] sm:$0xff] }
 0x265   :  { %7020 = vst [vmem:[#allocation15_spill] sm:$0xff] %v5517_v33  ;;  %4274 = vtanh.f32 %v1603_v29  ;;  %1759 = vmatpush1.bf16.msra.mxu1 %v5512_v30  ;;  %7021 = vst [vmem:[#allocation16_spill] sm:$0xff] %v5524_v38  ;;  %v5527_v39 = vld [vmem:[#allocation3 + $0xc0] sm:$0xff]  ;;  %v5529_v40 = vld [vmem:[#allocation2 + $0x78] sm:$0xff] }
 0x266   :  { %1760 = vmatprep.subr.bf16.mxu1 %v5517_v33  ;;  %7022 = vst [vmem:[#allocation17_spill] sm:$0xff] %v5529_v40  ;;  %v5531_v41 = vld [vmem:[#allocation3 + $0xe8] sm:$0xff]  ;;  %v5536_v42 = vld [vmem:[#allocation2 + $0x70] sm:$0xff]  ;;  %v5539_v43 = vld [vmem:[#allocation3 + $0xe0] sm:$0xff] }
 0x267   :  { %1638 = vmatpush1.bf16.msra.mxu0 %v5486_v16  ;;  %7023 = vst [vmem:[#allocation18_spill] sm:$0xff] %v5536_v42  ;;  %v5541_v44 = vld [vmem:[#allocation2 + $0x98] sm:$0xff]  ;;  %v5548_v50 = vld [vmem:[#allocation2 + $0x90] sm:$0xff]  ;;  %v5649_v62 = vld [vmem:[#allocation2 + $0x88] sm:$0xff] }
 0x268   :  { %1639 = vmatprep.subr.bf16.mxu0 %v5488_v19  ;;  %7024 = vst [vmem:[#allocation19_spill] sm:$0xff] %v5541_v44  ;;  %v5543_v45 = vld [vmem:[#allocation3 + $0x18] sm:$0xff]  ;;  %7026 = vst [vmem:[#allocation21_spill] sm:$0xff] %v5548_v50  ;;  %v5555_v59 = vld [vmem:[#allocation2 + $0xb0] sm:$0xff] }
 0x269   :  { %1761 = vmatpush1.bf16.msra.mxu1 %v5524_v38  ;;  %7025 = vst [vmem:[#allocation20_spill] sm:$0xff] %v5543_v45  ;;  %v5551_v51 = vld [vmem:[#allocation2 + $0xb8] sm:$0xff]  ;;  %7028 = vst [vmem:[#allocation23_spill] sm:$0xff] %v5555_v59  ;;  %v5564_v0 = vld [vmem:[#allocation2 + $0xd0] sm:$0xff] }
 0x26a   :  { %1762 = vmatprep.subr.bf16.mxu1 %v5529_v40  ;;  %7027 = vst [vmem:[#allocation22_spill] sm:$0xff] %v5551_v51  ;;  %v5557_v60 = vld [vmem:[#allocation2 + $0xd8] sm:$0xff]  ;;  %7030 = vst [vmem:[#allocation25_spill] sm:$0xff] %v5564_v0  ;;  %v5570_v2 = vld [vmem:[#allocation2 + $0xf0] sm:$0xff] }
 0x26b   :  { %1640 = vmatpush1.bf16.msra.mxu0 %v5492_v20  ;;  %7029 = vst [vmem:[#allocation24_spill] sm:$0xff] %v5557_v60  ;;  %v5566_v1 = vld [vmem:[#allocation2 + $0xf8] sm:$0xff]  ;;  %7032 = vst [vmem:[#allocation27_spill] sm:$0xff] %v5570_v2  ;;  %v5575_v7 = vld [vmem:[#allocation3 + $0x10] sm:$0xff] }
 0x26c   :  { %1641 = vmatprep.subr.bf16.mxu0 %v5494_v21  ;;  %v4269_v31 = vpop.eup %4268  ;;  %7031 = vst [vmem:[#allocation26_spill] sm:$0xff] %v5566_v1  ;;  %v5577_v8 = vld [vmem:[#allocation3 + $0x38] sm:$0xff]  ;;  %v5584_v14 = vld [vmem:[#allocation3 + $0x30] sm:$0xff]  ;;  %7037 = vst [vmem:[#allocation32_spill] sm:$0xff] %v5649_v62 }
 0x26d   :  { %v4271_v34 = vpop.eup %4270  ;;  %v1617_v36 = vadd.f32 1.0, %v4269_v31  ;;  %1763 = vmatpush1.bf16.msra.mxu1 %v5536_v42  ;;  %v5587_v15 = vld [vmem:[#allocation3 + $0x58] sm:$0xff]  ;;  %v5591_v17 = vld [vmem:[#allocation3 + $0x50] sm:$0xff]  ;;  %v5653_v61 = vld [vmem:[#allocation2 + $0x80] sm:$0xff] }
 0x26e   :  { %v1618_v37 = vadd.f32 1.0, %v4271_v34  ;;  %v4273_v47 = vpop.eup %4272  ;;  %1764 = vmatprep.subr.bf16.mxu1 %v5541_v44  ;;  %v5593_v18 = vld [vmem:[#allocation3 + $0x78] sm:$0xff]  ;;  %v5597_v22 = vld [vmem:[#allocation3 + $0x70] sm:$0xff]  ;;  %7038 = vst [vmem:[#allocation33_spill] sm:$0xff] %v5653_v61  ;;  %v5655_v48 = vld [vmem:[#allocation2 + $0xa8] sm:$0xff] }
 0x26f   :  { %1642 = vmatpush1.bf16.msra.mxu0 %v5498_v23  ;;  %4276 = vrcp.f32 %v1617_v36  ;;  %v4275_v49 = vpop.eup %4274  ;;  %v1619_v55 = vadd.f32 1.0, %v4273_v47  ;;  %v5599_v24 = vld [vmem:[#allocation3 + $0x98] sm:$0xff]  ;;  %v5603_v29 = vld [vmem:[#allocation3 + $0x90] sm:$0xff]  ;;  %7039 = vst [vmem:[#allocation34_spill] sm:$0xff] %v5655_v48  ;;  %v5659_v46 = vld [vmem:[#allocation2 + $0xa0] sm:$0xff] }
 0x270   :  { %1643 = vmatprep.subr.bf16.mxu0 %v5502_v26  ;;  %4278 = vrcp.f32 %v1618_v37  ;;  %v5605_v31 = vld [vmem:[#allocation3 + $0xb8] sm:$0xff]  ;;  %v5609_v34 = vld [vmem:[#allocation3 + $0xb0] sm:$0xff]  ;;  %7040 = vst [vmem:[#allocation35_spill] sm:$0xff] %v5659_v46 }
 0x271   :  { %1765 = vmatpush1.bf16.msra.mxu1 %v5548_v50  ;;  %4280 = vrcp.f32 %v1619_v55  ;;  %v5611_v36 = vld [vmem:[#allocation3 + $0xd8] sm:$0xff]  ;;  %v5615_v37 = vld [vmem:[#allocation3 + $0xd0] sm:$0xff]  ;;  %v5627_v55 = vld [vmem:[#allocation2] sm:$0xff] }
 0x272   :  { %1766 = vmatprep.subr.bf16.mxu1 %v5551_v51  ;;  %v5617_v47 = vld [vmem:[#allocation3 + $0xf8] sm:$0xff] }
 0x273   :  { %1644 = vmatpush1.bf16.msra.mxu0 %v5515_v32  ;;  %v5748_v51 = vld [vmem:[#allocation4 + $0xd8] sm:$0xff] }
 0x274   :  { %1645 = vmatprep.subr.bf16.mxu0 %v5519_v35  ;;  %7071 = vst [vmem:[#allocation65_spill] sm:$0xff] %v5748_v51 }
 0x275   :  { %1767 = vmatpush1.bf16.msra.mxu1 %v5555_v59  ;;  %v5676_v59 = vld [vmem:[#allocation4 + $0x8] sm:$0xff] }
 0x276   :  { %1768 = vmatprep.subr.bf16.mxu1 %v5557_v60  ;;  %v7045_v60 = vmov 0   ;;  %7046 = vst [vmem:[#allocation40_spill] sm:$0xff] %v5676_v59 }
 0x277   :  { %1646 = vmatpush1.bf16.msra.mxu0 %v5527_v39 }
 0x278   :  { %1647 = vmatprep.subr.bf16.mxu0 %v5531_v41 }
 0x279   :  { %v4277_v54 = vpop.eup %4276  ;;  %1769 = vmatpush1.bf16.msra.mxu1 %v5564_v0  ;;  %v5671_v0 = vld [vmem:[#allocation2 + $0xe0] sm:$0xff] }
 0x27a   :  { %v4279_v56 = vpop.eup %4278  ;;  %v1628_v57 = vmul.f32 %v4277_v54, %v4275_v49  ;;  %1770 = vmatprep.subr.bf16.mxu1 %v5566_v1  ;;  %v5621_v49 = vld [vmem:[#allocation3 + $0xf0] sm:$0xff]  ;;  %v5623_v54 = vld [vmem:[#allocation2 + $0x8] sm:$0xff]  ;;  %7044 = vst [vmem:[#allocation39_spill] sm:$0xff] %v5671_v0 }
 0x27b   :  { %1648 = vmatpush1.bf16.msra.mxu0 %v5539_v43  ;;  %v1627_v58 = vmul.f32 0.0, %v4279_v56  ;;  %v4281_v3 = vpop.eup %4280  ;;  %v5629_v56 = vld [vmem:[#allocation2 + $0x28] sm:$0xff] }
 0x27c   :  { %1674 = vmatprep.subr.bf16.mxu0 %v5543_v45  ;;  %v5667_v1 = vld [vmem:[#allocation2 + $0xe8] sm:$0xff] }
 0x27d   :  { %v5559_v63 = vadd.f32 %v1628_v57, %v1627_v58  ;;  %1771 = vmatpush1.bf16.msra.mxu1 %v5570_v2  ;;  %v5635_v57 = vld [vmem:[#allocation2 + $0x20] sm:$0xff]  ;;  %v5637_v58 = vld [vmem:[#allocation2 + $0x48] sm:$0xff]  ;;  %7043 = vst [vmem:[#allocation38_spill] sm:$0xff] %v5667_v1 }
 0x27e   :  { %7033 = vst [vmem:[#allocation28_spill] sm:$0xff] %v5637_v58  ;;  %v5665_v2 = vld [vmem:[#allocation2 + $0xc0] sm:$0xff] }
 0x27f   :  { %4282 = vtanh.f32 %v5559_v63  ;;  %7042 = vst [vmem:[#allocation37_spill] sm:$0xff] %v5665_v2 }
 0x289   :  { %v4283_v4 = vpop.eup %4282 }
 0x28a   :  { %v1631_v5 = vmul.f32 %v4283_v4, %v4281_v3  ;;  %v5641_v3 = vld [vmem:[#allocation2 + $0x40] sm:$0xff]  ;;  %v5643_v4 = vld [vmem:[#allocation2 + $0x68] sm:$0xff] }
 0x28b   :  { %7034 = vst [vmem:[#allocation29_spill] sm:$0xff] %v5641_v3  ;;  %7035 = vst [vmem:[#allocation30_spill] sm:$0xff] %v5643_v4 }
 0x28c   :  { %v5573_v6 = vpack.c.bf16 %v1631_v5, %v1631_v5  ;;  %v5647_v5 = vld [vmem:[#allocation2 + $0x60] sm:$0xff] }
 0x28d   :  { %7036 = vst [vmem:[#allocation31_spill] sm:$0xff] %v5647_v5 }
 0x28e   :  { %1666 = vmatmul.mubr.bf16.vlgmr.msra.gmra.mrb[4].mxu0 %v5573_v6  ;;  %1789 = vmatmul.mubr.bf16.vlgmr.msra.gmra.mrb[8].mxu1 %v5573_v6 }
 0x28f   :  { %1675 = vmatpush1.bf16.msra.mxu0 %v5575_v7  ;;  %1706 = vmatprep.mubr.bf16.mxu0 %v6802_v53 }
 0x290   :  { %1676 = vmatprep.subr.bf16.mxu0 %v5577_v8  ;;  %1895 = vmatprep.mubr.bf16.mxu1 %v6802_v53 }
 0x293   :  { %1677 = vmatpush1.bf16.msra.mxu0 %v5584_v14 }
 0x294   :  { %1678 = vmatprep.subr.bf16.mxu0 %v5587_v15 }
 0x297   :  { %1679 = vmatpush1.bf16.msra.mxu0 %v5591_v17 }
 0x298   :  { %1680 = vmatprep.subr.bf16.mxu0 %v5593_v18 }
 0x29b   :  { %1681 = vmatpush1.bf16.msra.mxu0 %v5597_v22 }
 0x29c   :  { %1682 = vmatprep.subr.bf16.mxu0 %v5599_v24 }
 0x29f   :  { %1683 = vmatpush1.bf16.msra.mxu0 %v5603_v29 }
 0x2a0   :  { %1684 = vmatprep.subr.bf16.mxu0 %v5605_v31 }
 0x2a3   :  { %1685 = vmatpush1.bf16.msra.mxu0 %v5609_v34 }
 0x2a4   :  { %1686 = vmatprep.subr.bf16.mxu0 %v5611_v36 }
 0x2a7   :  { %1687 = vmatpush1.bf16.msra.mxu0 %v5615_v37 }
 0x2a8   :  { %1688 = vmatprep.subr.bf16.mxu0 %v5617_v47 }
 0x2ab   :  { %1689 = vmatpush1.bf16.msra.mxu0 %v5621_v49 }
 0x2ac   :  { %1715 = vmatprep.subr.bf16.mxu0 %v5623_v54 }
 0x2ae   :  { %1707 = vmatmul.mubr.bf16.vlgmr.msra.gmra.mrb[8].mxu0 %v5573_v6 }
 0x2af   :  { %1716 = vmatpush1.bf16.msra.mxu0 %v5627_v55  ;;  %1747 = vmatprep.mubr.bf16.mxu0 %v6802_v53  ;;  %v5661_v53 = vld [vmem:[#allocation2 + $0xc8] sm:$0xff] }
 0x2b0   :  { %1717 = vmatprep.subr.bf16.mxu0 %v5629_v56  ;;  %7041 = vst [vmem:[#allocation36_spill] sm:$0xff] %v5661_v53 }
 0x2b3   :  { %1718 = vmatpush1.bf16.msra.mxu0 %v5635_v57 }
 0x2b4   :  { %1719 = vmatprep.subr.bf16.mxu0 %v5637_v58 }
 0x2b7   :  { %1720 = vmatpush1.bf16.msra.mxu0 %v5641_v3  ;;  %v1906_v3 = vld [vmem:[#allocation5 + $0x10] sm:$0xc] }
 0x2b8   :  { %1721 = vmatprep.subr.bf16.mxu0 %v5643_v4 }
 0x2bb   :  { %1722 = vmatpush1.bf16.msra.mxu0 %v5647_v5 }
 0x2bc   :  { %1723 = vmatprep.subr.bf16.mxu0 %v5649_v62  ;;  %v1905_v62 = vld [vmem:[#allocation5 + $0x8] sm:$0xc] }
 0x2bf   :  { %1724 = vmatpush1.bf16.msra.mxu0 %v5653_v61 }
 0x2c0   :  { %1725 = vmatprep.subr.bf16.mxu0 %v5655_v48 }
 0x2c3   :  { %1726 = vmatpush1.bf16.msra.mxu0 %v5659_v46  ;;  %v5678_v46 = vld [vmem:[#allocation4 + $0x18] sm:$0xff] }
 0x2c4   :  { %1727 = vmatprep.subr.bf16.mxu0 %v5661_v53  ;;  %7047 = vst [vmem:[#allocation41_spill] sm:$0xff] %v5678_v46  ;;  %1863 = vmatprep.subr.bf16.mxu1 %v5678_v46  ;;  %v5682_v53 = vld [vmem:[#allocation4] sm:$0xff]  ;;  %v5700_v46 = vld [vmem:[#allocation4 + $0x48] sm:$0xff] }
 0x2c5   :  { %7048 = vst [vmem:[#allocation42_spill] sm:$0xff] %v5682_v53  ;;  %7054 = vst [vmem:[#allocation48_spill] sm:$0xff] %v5700_v46 }
 0x2c7   :  { %1728 = vmatpush1.bf16.msra.mxu0 %v5665_v2  ;;  %v5684_v2 = vld [vmem:[#allocation4 + $0x10] sm:$0xff] }
 0x2c8   :  { %1729 = vmatprep.subr.bf16.mxu0 %v5667_v1  ;;  %7049 = vst [vmem:[#allocation43_spill] sm:$0xff] %v5684_v2  ;;  %1864 = vmatpush1.bf16.msra.mxu1 %v5684_v2  ;;  %v5694_v1 = vld [vmem:[#allocation4 + $0x20] sm:$0xff] }
 0x2c9   :  { %7052 = vst [vmem:[#allocation46_spill] sm:$0xff] %v5694_v1  ;;  %v5706_v2 = vld [vmem:[#allocation4 + $0x40] sm:$0xff] }
 0x2ca   :  { %7056 = vst [vmem:[#allocation50_spill] sm:$0xff] %v5706_v2 }
 0x2cb   :  { %1730 = vmatpush1.bf16.msra.mxu0 %v5671_v0  ;;  %v5688_v0 = vld [vmem:[#allocation4 + $0x28] sm:$0xff] }
 0x2cc   :  { %1822 = vmatprep.subr.bf16.mxu0 %v5676_v59  ;;  %7050 = vst [vmem:[#allocation44_spill] sm:$0xff] %v5688_v0  ;;  %v5696_v59 = vld [vmem:[#allocation4 + $0x30] sm:$0xff] }
 0x2cd   :  { %7053 = vst [vmem:[#allocation47_spill] sm:$0xff] %v5696_v59 }
 0x2ce   :  { %1748 = vmatmul.mubr.bf16.vlgmr.msra.gmra.mrb[12].mxu0 %v5573_v6  ;;  %v5690_v6 = vld [vmem:[#allocation4 + $0x38] sm:$0xff] }
 0x2cf   :  { %1854 = vmatprep.mubr.bf16.mxu0 %v7045_v60  ;;  %1823 = vmatpush1.bf16.msra.mxu0 %v5682_v53  ;;  %7051 = vst [vmem:[#allocation45_spill] sm:$0xff] %v5690_v6  ;;  %v5702_v53 = vld [vmem:[#allocation4 + $0x58] sm:$0xff] }
 0x2d0   :  { %1824 = vmatprep.subr.bf16.mxu0 %v5688_v0  ;;  %1865 = vmatprep.subr.bf16.mxu1 %v5690_v6  ;;  %7055 = vst [vmem:[#allocation49_spill] sm:$0xff] %v5702_v53  ;;  %v5708_v0 = vld [vmem:[#allocation4 + $0x50] sm:$0xff]  ;;  %v5712_v6 = vld [vmem:[#allocation4 + $0x68] sm:$0xff] }
 0x2d1   :  { %1866 = vmatpush1.bf16.msra.mxu1 %v5696_v59  ;;  %7057 = vst [vmem:[#allocation51_spill] sm:$0xff] %v5708_v0  ;;  %7058 = vst [vmem:[#allocation52_spill] sm:$0xff] %v5712_v6  ;;  %v5718_v59 = vld [vmem:[#allocation4 + $0x60] sm:$0xff] }
 0x2d2   :  { %1867 = vmatprep.subr.bf16.mxu1 %v5702_v53  ;;  %7060 = vst [vmem:[#allocation54_spill] sm:$0xff] %v5718_v59  ;;  %v5724_v53 = vld [vmem:[#allocation4 + $0x88] sm:$0xff] }
 0x2d3   :  { %1825 = vmatpush1.bf16.msra.mxu0 %v5694_v1  ;;  %v5714_v1 = vld [vmem:[#allocation4 + $0x78] sm:$0xff]  ;;  %7062 = vst [vmem:[#allocation56_spill] sm:$0xff] %v5724_v53 }
 0x2d4   :  { %1826 = vmatprep.subr.bf16.mxu0 %v5700_v46  ;;  %7059 = vst [vmem:[#allocation53_spill] sm:$0xff] %v5714_v1  ;;  %v5720_v46 = vld [vmem:[#allocation4 + $0x70] sm:$0xff] }
 0x2d5   :  { %1868 = vmatpush1.bf16.msra.mxu1 %v5708_v0  ;;  %7061 = vst [vmem:[#allocation55_spill] sm:$0xff] %v5720_v46  ;;  %v5730_v0 = vld [vmem:[#allocation4 + $0x80] sm:$0xff] }
 0x2d6   :  { %1869 = vmatprep.subr.bf16.mxu1 %v5714_v1  ;;  %7064 = vst [vmem:[#allocation58_spill] sm:$0xff] %v5730_v0  ;;  %v5736_v1 = vld [vmem:[#allocation4 + $0xa8] sm:$0xff] }
 0x2d7   :  { %1827 = vmatpush1.bf16.msra.mxu0 %v5706_v2  ;;  %v5726_v2 = vld [vmem:[#allocation4 + $0x98] sm:$0xff]  ;;  %7066 = vst [vmem:[#allocation60_spill] sm:$0xff] %v5736_v1 }
 0x2d8   :  { %1828 = vmatprep.subr.bf16.mxu0 %v5712_v6  ;;  %7063 = vst [vmem:[#allocation57_spill] sm:$0xff] %v5726_v2  ;;  %v5732_v6 = vld [vmem:[#allocation4 + $0x90] sm:$0xff] }
 0x2d9   :  { %1870 = vmatpush1.bf16.msra.mxu1 %v5720_v46  ;;  %7065 = vst [vmem:[#allocation59_spill] sm:$0xff] %v5732_v6  ;;  %v5740_v46 = vld [vmem:[#allocation4 + $0xa0] sm:$0xff] }
 0x2da   :  { %1871 = vmatprep.subr.bf16.mxu1 %v5726_v2  ;;  %7068 = vst [vmem:[#allocation62_spill] sm:$0xff] %v5740_v46  ;;  %v5746_v2 = vld [vmem:[#allocation4 + $0xc8] sm:$0xff] }
 0x2db   :  { %1829 = vmatpush1.bf16.msra.mxu0 %v5718_v59  ;;  %v5738_v59 = vld [vmem:[#allocation4 + $0xb8] sm:$0xff]  ;;  %7070 = vst [vmem:[#allocation64_spill] sm:$0xff] %v5746_v2 }
 0x2dc   :  { %1830 = vmatprep.subr.bf16.mxu0 %v5724_v53  ;;  %7067 = vst [vmem:[#allocation61_spill] sm:$0xff] %v5738_v59  ;;  %v5744_v53 = vld [vmem:[#allocation4 + $0xb0] sm:$0xff] }
 0x2dd   :  { %1872 = vmatpush1.bf16.msra.mxu1 %v5732_v6  ;;  %7069 = vst [vmem:[#allocation63_spill] sm:$0xff] %v5744_v53  ;;  %v5754_v6 = vld [vmem:[#allocation4 + $0xc0] sm:$0xff] }
 0x2de   :  { %1873 = vmatprep.subr.bf16.mxu1 %v5738_v59  ;;  %7072 = vst [vmem:[#allocation66_spill] sm:$0xff] %v5754_v6  ;;  %v5760_v59 = vld [vmem:[#allocation4 + $0xf8] sm:$0xff] }
 0x2df   :  { %1831 = vmatpush1.bf16.msra.mxu0 %v5730_v0  ;;  %v5756_v0 = vld [vmem:[#allocation4 + $0xd0] sm:$0xff]  ;;  %7075 = vst [vmem:[#allocation69_spill] sm:$0xff] %v5760_v59 }
 0x2e0   :  { %1832 = vmatprep.subr.bf16.mxu0 %v5736_v1  ;;  %7073 = vst [vmem:[#allocation67_spill] sm:$0xff] %v5756_v0  ;;  %v5758_v1 = vld [vmem:[#allocation4 + $0xe8] sm:$0xff] }
 0x2e1   :  { %1874 = vmatpush1.bf16.msra.mxu1 %v5744_v53  ;;  %7074 = vst [vmem:[#allocation68_spill] sm:$0xff] %v5758_v1  ;;  %v5766_v53 = vld [vmem:[#allocation4 + $0xe0] sm:$0xff] }
 0x2e2   :  { %1875 = vmatprep.subr.bf16.mxu1 %v5748_v51  ;;  %7076 = vst [vmem:[#allocation70_spill] sm:$0xff] %v5766_v53 }
 0x2e3   :  { %1833 = vmatpush1.bf16.msra.mxu0 %v5740_v46 }
 0x2e4   :  { %1834 = vmatprep.subr.bf16.mxu0 %v5746_v2  ;;  %v5768_v2 = vld [vmem:[#allocation4 + $0xf0] sm:$0xff] }
 0x2e5   :  { %1876 = vmatpush1.bf16.msra.mxu1 %v5756_v0  ;;  %7077 = vst [vmem:[#allocation71_spill] sm:$0xff] %v5768_v2 }
 0x2e6   :  { %1877 = vmatprep.subr.bf16.mxu1 %v5760_v59 }
 0x2e7   :  { %1835 = vmatpush1.bf16.msra.mxu0 %v5754_v6 }
 0x2e8   :  { %1836 = vmatprep.subr.bf16.mxu0 %v5758_v1 }
 0x2e9   :  { %1878 = vmatpush1.bf16.msra.mxu1 %v5768_v2 }
 0x2ea   :  { %1996 = vmatprep.subr.bf16.mxu1 %v5543_v45 }
 0x2eb   :  { %1837 = vmatpush1.bf16.msra.mxu0 %v5766_v53  ;;  %v1904_v53 = vld [vmem:[#allocation5] sm:$0xc] }
 0x2ec   :  { %1955 = vmatprep.subr.bf16.mxu0 %v5471_v9 }
 0x361   :  { %v1667_v51 = vpop.f32.mrb[4].mxu0  ;;  %v5774_v6 = vpop.f32.mrb[8].mxu1 }
 0x362   :  { %v1669_v0 = vpop.f32.mrb[5].mxu0  ;;  %v5776_v46 = vpop.f32.mrb[9].mxu1  ;;  %v1912_v44 = vrot.slane %v1667_v51, 6 }
 0x363   :  { %v1671_v1 = vpop.f32.mrb[6].mxu0  ;;  %v1794_v59 = vpop.f32.mrb[10].mxu1  ;;  %v1913_v61 = vrot.slane %v1669_v0, 6 }
 0x364   :  { %v1672_v48 = vpop.f32.mrb[7].mxu0  ;;  %v1795_v50 = vpop.f32.mrb[11].mxu1  ;;  %v1920_v2 = vadd.f32 %v1912_v44, %v1904_v53 }
 0x365   :  { %v1921_v42 = vadd.f32 %v1913_v61, %v1905_v62  ;;  %v1907_v48 = vld [vmem:[#allocation5 + $0x18] sm:$0xc]  ;;  %v1944_v62 = vrot.slane %v5559_v63, 6 }
 0x366   :  { %v4143_v9 = vmul.f32 -1.442695, %v1920_v2 }
 0x367   :  { %v4144_v5 = vmul.f32 -1.442695, %v1921_v42 }
 0x369   :  { %4284 = vpow2.f32 %v4144_v5 }
 0x36a   :  { %4286 = vpow2.f32 %v4143_v9 }
 0x373   :  { %v4285_v45 = vpop.eup %4284 }
 0x374   :  { %v4287_v40 = vpop.eup %4286  ;;  %v1934_v4 = vadd.f32 1.0, %v4285_v45 }
 0x375   :  { %v1933_v33 = vadd.f32 1.0, %v4287_v40 }
 0x376   :  { %4288 = vrcp.f32 %v1934_v4  ;;  %v7079_v4 = vsub.s32 1, %v5329_v52 }
 0x377   :  { %4290 = vrcp.f32 %v1933_v33  ;;  %v1578_v33 = vld [vmem:[%s6792_s10] sm:$0xf] }
 0x380   :  { %v4289_v9 = vpop.eup %4288 }
 0x381   :  { %v1708_v38 = vpop.f32.mrb[8].mxu0  ;;  %v4291_v42 = vpop.eup %4290  ;;  %v1946_v40 = vmul.f32 %v4289_v9, %v1944_v62 }
 0x382   :  { %v1914_v1 = vrot.slane %v1708_v38, 6  ;;  %v1710_v59 = vpop.f32.mrb[9].mxu0 }
 0x383   :  { %v1915_v50 = vrot.slane %v1710_v59, 6  ;;  %v1712_v0 = vpop.f32.mrb[10].mxu0 }
 0x384   :  { %v1922_v51 = vadd.f32 %v1914_v1, %v1906_v3  ;;  %v1713_v58 = vpop.f32.mrb[11].mxu0  ;;  %v5791_v1 = vrot.slane %v1578_v33, %v7079_v4 }
 0x385   :  { %v1923_v61 = vadd.f32 %v1915_v50, %v1907_v48  ;;  %v7078_v58 = vsub.s32 0, %v5329_v52 }
 0x386   :  { %v4145_v53 = vmul.f32 -1.442695, %v1922_v51 }
 0x387   :  { %4292 = vtanh.f32 %v1923_v61  ;;  %v5787_v3 = vrot.slane %v1578_v33, %v7078_v58 }
 0x388   :  { %4294 = vpow2.f32 %v4145_v53 }
 0x391   :  { %v4293_v44 = vpop.eup %4292 }
 0x392   :  { %v4295_v45 = vpop.eup %4294  ;;  %v1947_v38 = vmul.f32 %v4293_v44, %v4291_v42  ;;  %v7080_v42 = vsub.s32 2, %v5329_v52 }
 0x393   :  { %v1935_v2 = vadd.f32 1.0, %v4295_v45 }
 0x394   :  { %v5779_v5 = vadd.f32 %v1947_v38, %v1946_v40  ;;  %v5799_v44 = vrot.slane %v1578_v33, %v7080_v42  ;;  %v7081_v38 = vsub.s32 3, %v5329_v52 }
 0x395   :  { %4296 = vrcp.f32 %v1935_v2 }
 0x396   :  { %4298 = vtanh.f32 %v5779_v5  ;;  %v1791_v40 = vadd.f32 %v5774_v6, %v5799_v44  ;;  %v5805_v2 = vrot.slane %v1578_v33, %v7081_v38  ;;  %v7097_v38 = vld [vmem:[#allocation23_spill] sm:$0xff] }
 0x398   :  { %v4142_v58 = vmul.f32 -1.442695, %v1791_v40 }
 0x39f   :  { %v4297_v63 = vpop.eup %4296 }
 0x3a0   :  { %v4299_v59 = vpop.eup %4298 }
 0x3a1   :  { %v1749_v48 = vpop.f32.mrb[12].mxu0  ;;  %v5793_v50 = vmul.f32 %v4299_v59, %v4297_v63  ;;  %v1793_v63 = vadd.f32 %v5776_v46, %v5805_v2 }
 0x3a2   :  { %v1750_v0 = vadd.f32 %v1749_v48, %v5787_v3  ;;  %v1751_v51 = vpop.f32.mrb[13].mxu0 }
 0x3a3   :  { %v1752_v61 = vadd.f32 %v1751_v51, %v5791_v1  ;;  %v1753_v53 = vpop.f32.mrb[14].mxu0 }
 0x3a4   :  { %v4140_v62 = vmul.f32 -1.442695, %v1750_v0  ;;  %v1754_v9 = vpop.f32.mrb[15].mxu0 }
 0x3a5   :  { %v4141_v45 = vmul.f32 -1.442695, %v1752_v61 }
 0x3a6   :  { %4300 = vpow2.f32 %v4140_v62 }
 0x3a7   :  { %4302 = vpow2.f32 %v4141_v45 }
 0x3a8   :  { %4304 = vpow2.f32 %v4142_v58  ;;  %v7098_v58 = vld [vmem:[#allocation36_spill] sm:$0xff] }
 0x3a9   :  { %4306 = vtanh.f32 %v1793_v63  ;;  %v7099_v63 = vld [vmem:[#allocation24_spill] sm:$0xff] }
 0x3b0   :  { %v4301_v4 = vpop.eup %4300 }
 0x3b1   :  { %v4303_v59 = vpop.eup %4302  ;;  %v1806_v48 = vadd.f32 1.0, %v4301_v4  ;;  %v7100_v4 = vld [vmem:[#allocation37_spill] sm:$0xff] }
 0x3b2   :  { %v1807_v0 = vadd.f32 1.0, %v4303_v59  ;;  %v4305_v51 = vpop.eup %4304  ;;  %v7101_v59 = vld [vmem:[#allocation25_spill] sm:$0xff] }
 0x3b3   :  { %4308 = vrcp.f32 %v1806_v48  ;;  %v4307_v61 = vpop.eup %4306  ;;  %v1808_v6 = vadd.f32 1.0, %v4305_v51  ;;  %v7102_v48 = vld [vmem:[#allocation38_spill] sm:$0xff]  ;;  %v7104_v51 = vld [vmem:[#allocation39_spill] sm:$0xff] }
 0x3b4   :  { %4310 = vrcp.f32 %v1807_v0  ;;  %v7103_v0 = vld [vmem:[#allocation26_spill] sm:$0xff] }
 0x3b5   :  { %4312 = vrcp.f32 %v1808_v6  ;;  %v7107_v6 = vld [vmem:[#allocation41_spill] sm:$0xff] }
 0x3bd   :  { %v4309_v53 = vpop.eup %4308 }
 0x3be   :  { %v4311_v62 = vpop.eup %4310  ;;  %v1817_v52 = vmul.f32 %v4309_v53, %v4307_v61  ;;  %v7105_v61 = vld [vmem:[#allocation27_spill] sm:$0xff]  ;;  %v7106_v53 = vld [vmem:[#allocation40_spill] sm:$0xff] }
 0x3bf   :  { %v1816_v33 = vmul.f32 0.0, %v4311_v62  ;;  %v4313_v46 = vpop.eup %4312  ;;  %v7108_v62 = vld [vmem:[#allocation42_spill] sm:$0xff] }
 0x3c1   :  { %v5809_v9 = vadd.f32 %v1817_v52, %v1816_v33  ;;  %v7109_v52 = vld [vmem:[#allocation43_spill] sm:$0xff]  ;;  %v7110_v33 = vld [vmem:[#allocation44_spill] sm:$0xff] }
 0x3c3   :  { %4314 = vtanh.f32 %v5809_v9 }
 0x3cd   :  { %v4315_v42 = vpop.eup %4314 }
 0x3ce   :  { %v1820_v45 = vmul.f32 %v4315_v42, %v4313_v46  ;;  %v7111_v46 = vld [vmem:[#allocation45_spill] sm:$0xff]  ;;  %v7112_v42 = vld [vmem:[#allocation46_spill] sm:$0xff] }
 0x3d0   :  { %v1821_v40 = vpack.c.bf16 %v1820_v45, %v1820_v45  ;;  %v7113_v45 = vld [vmem:[#allocation47_spill] sm:$0xff] }
 0x3d2   :  { %1855 = vmatmul.mubr.bf16.vlgmr.msra.gmra.mrb[16].mxu0 %v1821_v40  ;;  %1896 = vmatmul.mubr.bf16.vlgmr.msra.gmra.mrb[12].mxu1 %v1821_v40  ;;  %v7114_v40 = vld [vmem:[#allocation48_spill] sm:$0xff] }
 0x3d3   :  { %1956 = vmatpush1.bf16.msra.mxu0 %v5473_v10  ;;  %1997 = vmatpush1.bf16.msra.mxu1 %v5575_v7  ;;  %v1951_v10 = vpack.c.bf16 %v5793_v50, %v5793_v50  ;;  %v7096_v50 = vld [vmem:[#allocation35_spill] sm:$0xff] }
 0x3d4   :  { %1957 = vmatprep.subr.bf16.mxu0 %v5475_v11  ;;  %1998 = vmatprep.subr.bf16.mxu1 %v5577_v8 }
 0x3d5   :  { %1987 = vmatprep.mubr.bf16.mxu0 %v7045_v60  ;;  %2028 = vmatprep.mubr.bf16.mxu1 %v7045_v60  ;;  %v1953_v11 = vrot.slane %v1951_v10, 1  ;;  %v7115_v10 = vld [vmem:[#allocation49_spill] sm:$0xff] }
 0x3d7   :  { %1958 = vmatpush1.bf16.msra.mxu0 %v5480_v12  ;;  %1999 = vmatpush1.bf16.msra.mxu1 %v5584_v14  ;;  %v7082_v12 = vld [vmem:[#allocation28_spill] sm:$0xff] }
 0x3d8   :  { %1959 = vmatprep.subr.bf16.mxu0 %v5482_v13  ;;  %2000 = vmatprep.subr.bf16.mxu1 %v5587_v15  ;;  %v7083_v13 = vld [vmem:[#allocation15_spill] sm:$0xff] }
 0x3db   :  { %1960 = vmatpush1.bf16.msra.mxu0 %v5486_v16  ;;  %2001 = vmatpush1.bf16.msra.mxu1 %v5591_v17  ;;  %v7084_v16 = vld [vmem:[#allocation29_spill] sm:$0xff] }
 0x3dc   :  { %1961 = vmatprep.subr.bf16.mxu0 %v5488_v19  ;;  %2002 = vmatprep.subr.bf16.mxu1 %v5593_v18  ;;  %v7085_v19 = vld [vmem:[#allocation16_spill] sm:$0xff] }
 0x3df   :  { %1962 = vmatpush1.bf16.msra.mxu0 %v5492_v20  ;;  %2003 = vmatpush1.bf16.msra.mxu1 %v5597_v22  ;;  %v7086_v20 = vld [vmem:[#allocation30_spill] sm:$0xff] }
 0x3e0   :  { %1963 = vmatprep.subr.bf16.mxu0 %v5494_v21  ;;  %2004 = vmatprep.subr.bf16.mxu1 %v5599_v24  ;;  %v7087_v21 = vld [vmem:[#allocation17_spill] sm:$0xff] }
 0x3e3   :  { %1964 = vmatpush1.bf16.msra.mxu0 %v5498_v23  ;;  %2005 = vmatpush1.bf16.msra.mxu1 %v5603_v29  ;;  %v7088_v23 = vld [vmem:[#allocation31_spill] sm:$0xff] }
 0x3e4   :  { %1965 = vmatprep.subr.bf16.mxu0 %v5502_v26  ;;  %2006 = vmatprep.subr.bf16.mxu1 %v5605_v31  ;;  %v7090_v26 = vld [vmem:[#allocation32_spill] sm:$0xff] }
 0x3e7   :  { %1966 = vmatpush1.bf16.msra.mxu0 %v5515_v32  ;;  %2007 = vmatpush1.bf16.msra.mxu1 %v5609_v34  ;;  %v7094_v32 = vld [vmem:[#allocation34_spill] sm:$0xff] }
 0x3e8   :  { %1967 = vmatprep.subr.bf16.mxu0 %v5519_v35  ;;  %2008 = vmatprep.subr.bf16.mxu1 %v5611_v36  ;;  %v7095_v35 = vld [vmem:[#allocation22_spill] sm:$0xff] }
 0x3eb   :  { %1968 = vmatpush1.bf16.msra.mxu0 %v5527_v39  ;;  %2009 = vmatpush1.bf16.msra.mxu1 %v5615_v37 }
 0x3ec   :  { %1969 = vmatprep.subr.bf16.mxu0 %v5531_v41  ;;  %2010 = vmatprep.subr.bf16.mxu1 %v5617_v47 }
 0x3ef   :  { %1970 = vmatpush1.bf16.msra.mxu0 %v5539_v43  ;;  %2011 = vmatpush1.bf16.msra.mxu1 %v5621_v49 }
 0x3f0   :  { %2037 = vmatprep.subr.bf16.mxu0 %v5623_v54  ;;  %2078 = vmatprep.subr.bf16.mxu1 %v5500_v25  ;;  %v7089_v25 = vld [vmem:[#allocation18_spill] sm:$0xff] }
 0x3f2   :  { %1988 = vmatmul.mubr.bf16.vlgmr.msra.gmra.mrb[20].mxu0 %v1953_v11  ;;  %2029 = vmatmul.mubr.bf16.vlgmr.msra.gmra.mrb[16].mxu1 %v1953_v11 }
 0x3f3   :  { %2038 = vmatpush1.bf16.msra.mxu0 %v5627_v55  ;;  %2079 = vmatpush1.bf16.msra.mxu1 %v5505_v27  ;;  %v7091_v27 = vld [vmem:[#allocation19_spill] sm:$0xff] }
 0x3f4   :  { %2039 = vmatprep.subr.bf16.mxu0 %v5629_v56  ;;  %2080 = vmatprep.subr.bf16.mxu1 %v5507_v28  ;;  %v7092_v28 = vld [vmem:[#allocation33_spill] sm:$0xff] }
 0x3f5   :  { %2069 = vmatprep.mubr.bf16.mxu0 %v7045_v60  ;;  %2110 = vmatprep.mubr.bf16.mxu1 %v7045_v60 }
 0x3f7   :  { %2040 = vmatpush1.bf16.msra.mxu0 %v5635_v57  ;;  %2081 = vmatpush1.bf16.msra.mxu1 %v5512_v30  ;;  %v7093_v30 = vld [vmem:[#allocation21_spill] sm:$0xff] }
 0x3f8   :  { %2041 = vmatprep.subr.bf16.mxu0 %v7082_v12  ;;  %2082 = vmatprep.subr.bf16.mxu1 %v7083_v13  ;;  %v7117_v13 = vld [vmem:[#allocation51_spill] sm:$0xff] }
 0x3fb   :  { %2042 = vmatpush1.bf16.msra.mxu0 %v7084_v16  ;;  %2083 = vmatpush1.bf16.msra.mxu1 %v7085_v19  ;;  %v7118_v19 = vld [vmem:[#allocation52_spill] sm:$0xff] }
 0x3fc   :  { %2043 = vmatprep.subr.bf16.mxu0 %v7086_v20  ;;  %2084 = vmatprep.subr.bf16.mxu1 %v7087_v21  ;;  %v7119_v21 = vld [vmem:[#allocation53_spill] sm:$0xff] }
 0x3ff   :  { %2044 = vmatpush1.bf16.msra.mxu0 %v7088_v23  ;;  %2085 = vmatpush1.bf16.msra.mxu1 %v7089_v25  ;;  %v7120_v25 = vld [vmem:[#allocation54_spill] sm:$0xff] }
 0x400   :  { %2045 = vmatprep.subr.bf16.mxu0 %v7090_v26  ;;  %2086 = vmatprep.subr.bf16.mxu1 %v7091_v27  ;;  %v7121_v27 = vld [vmem:[#allocation55_spill] sm:$0xff] }
 0x403   :  { %2046 = vmatpush1.bf16.msra.mxu0 %v7092_v28  ;;  %2087 = vmatpush1.bf16.msra.mxu1 %v7093_v30  ;;  %v7122_v30 = vld [vmem:[#allocation56_spill] sm:$0xff] }
 0x404   :  { %2047 = vmatprep.subr.bf16.mxu0 %v7094_v32  ;;  %2088 = vmatprep.subr.bf16.mxu1 %v7095_v35  ;;  %v7123_v35 = vld [vmem:[#allocation57_spill] sm:$0xff] }
 0x407   :  { %2048 = vmatpush1.bf16.msra.mxu0 %v7096_v50  ;;  %2089 = vmatpush1.bf16.msra.mxu1 %v7097_v38  ;;  %v7124_v38 = vld [vmem:[#allocation58_spill] sm:$0xff] }
 0x408   :  { %2049 = vmatprep.subr.bf16.mxu0 %v7098_v58  ;;  %2090 = vmatprep.subr.bf16.mxu1 %v7099_v63  ;;  %v7125_v63 = vld [vmem:[#allocation59_spill] sm:$0xff] }
 0x40b   :  { %2050 = vmatpush1.bf16.msra.mxu0 %v7100_v4  ;;  %2091 = vmatpush1.bf16.msra.mxu1 %v7101_v59  ;;  %v7126_v59 = vld [vmem:[#allocation60_spill] sm:$0xff] }
 0x40c   :  { %2051 = vmatprep.subr.bf16.mxu0 %v7102_v48  ;;  %2092 = vmatprep.subr.bf16.mxu1 %v7103_v0  ;;  %v7127_v0 = vld [vmem:[#allocation61_spill] sm:$0xff] }
 0x40d   :  { %v2233_v48 = vld [vmem:[#allocation5 + $0x18] sm:$0x30] }
 0x40f   :  { %2052 = vmatpush1.bf16.msra.mxu0 %v7104_v51  ;;  %2093 = vmatpush1.bf16.msra.mxu1 %v7105_v61  ;;  %v7128_v61 = vld [vmem:[#allocation62_spill] sm:$0xff] }
 0x410   :  { %2148 = vmatprep.subr.bf16.mxu0 %v7106_v53  ;;  %2189 = vmatprep.subr.bf16.mxu1 %v7107_v6 }
 0x412   :  { %2070 = vmatmul.mubr.bf16.vlgmr.msra.gmra.mrb[24].mxu0 %v1953_v11  ;;  %2111 = vmatmul.mubr.bf16.vlgmr.msra.gmra.mrb[20].mxu1 %v1953_v11  ;;  %v7116_v11 = vld [vmem:[#allocation50_spill] sm:$0xff] }
 0x413   :  { %2149 = vmatpush1.bf16.msra.mxu0 %v7108_v62  ;;  %2190 = vmatpush1.bf16.msra.mxu1 %v7109_v52 }
 0x414   :  { %2150 = vmatprep.subr.bf16.mxu0 %v7110_v33  ;;  %2191 = vmatprep.subr.bf16.mxu1 %v7111_v46 }
 0x415   :  { %2180 = vmatprep.mubr.bf16.mxu0 %v7045_v60  ;;  %2221 = vmatprep.mubr.bf16.mxu1 %v7045_v60 }
 0x417   :  { %2151 = vmatpush1.bf16.msra.mxu0 %v7112_v42  ;;  %2192 = vmatpush1.bf16.msra.mxu1 %v7113_v45 }
 0x418   :  { %2152 = vmatprep.subr.bf16.mxu0 %v7114_v40  ;;  %2193 = vmatprep.subr.bf16.mxu1 %v7115_v10 }
 0x41b   :  { %2153 = vmatpush1.bf16.msra.mxu0 %v7116_v11  ;;  %2194 = vmatpush1.bf16.msra.mxu1 %v7117_v13 }
 0x41c   :  { %2154 = vmatprep.subr.bf16.mxu0 %v7118_v19  ;;  %2195 = vmatprep.subr.bf16.mxu1 %v7119_v21  ;;  %v7129_v19 = vld [vmem:[#allocation63_spill] sm:$0xff]  ;;  %v7130_v21 = vld [vmem:[#allocation64_spill] sm:$0xff] }
 0x41f   :  { %2155 = vmatpush1.bf16.msra.mxu0 %v7120_v25  ;;  %2196 = vmatpush1.bf16.msra.mxu1 %v7121_v27  ;;  %v7131_v25 = vld [vmem:[#allocation65_spill] sm:$0xff]  ;;  %v7132_v27 = vld [vmem:[#allocation66_spill] sm:$0xff] }
 0x420   :  { %2156 = vmatprep.subr.bf16.mxu0 %v7122_v30  ;;  %2197 = vmatprep.subr.bf16.mxu1 %v7123_v35  ;;  %v7133_v30 = vld [vmem:[#allocation67_spill] sm:$0xff]  ;;  %v7134_v35 = vld [vmem:[#allocation68_spill] sm:$0xff] }
 0x423   :  { %2157 = vmatpush1.bf16.msra.mxu0 %v7124_v38  ;;  %2198 = vmatpush1.bf16.msra.mxu1 %v7125_v63  ;;  %v7135_v38 = vld [vmem:[#allocation69_spill] sm:$0xff]  ;;  %v7136_v63 = vld [vmem:[#allocation70_spill] sm:$0xff] }
 0x424   :  { %2158 = vmatprep.subr.bf16.mxu0 %v7126_v59  ;;  %2199 = vmatprep.subr.bf16.mxu1 %v7127_v0  ;;  %v7137_v59 = vld [vmem:[#allocation71_spill] sm:$0xff]  ;;  %v7138_v0 = vld [vmem:[#allocation14_spill] sm:$0xff] }
 0x427   :  { %2159 = vmatpush1.bf16.msra.mxu0 %v7128_v61  ;;  %2200 = vmatpush1.bf16.msra.mxu1 %v7129_v19  ;;  %v7139_v61 = vld [vmem:[#allocation20_spill] sm:$0xff] }
 0x428   :  { %2160 = vmatprep.subr.bf16.mxu0 %v7130_v21  ;;  %2201 = vmatprep.subr.bf16.mxu1 %v7131_v25 }
 0x42b   :  { %2161 = vmatpush1.bf16.msra.mxu0 %v7132_v27  ;;  %2202 = vmatpush1.bf16.msra.mxu1 %v7133_v30 }
 0x42c   :  { %2162 = vmatprep.subr.bf16.mxu0 %v7134_v35  ;;  %2203 = vmatprep.subr.bf16.mxu1 %v7135_v38  ;;  %v2230_v35 = vld [vmem:[#allocation5] sm:$0x30] }
 0x42f   :  { %2163 = vmatpush1.bf16.msra.mxu0 %v7136_v63  ;;  %2204 = vmatpush1.bf16.msra.mxu1 %v7137_v59  ;;  %v2231_v63 = vld [vmem:[#allocation5 + $0x8] sm:$0x30] }
 0x430   :  { %2281 = vmatprep.subr.bf16.mxu0 %v7138_v0  ;;  %2322 = vmatprep.subr.bf16.mxu1 %v7139_v61 }
 0x4a5   :  { %v1856_v19 = vpop.f32.mrb[16].mxu0  ;;  %v1897_v21 = vpop.f32.mrb[12].mxu1 }
 0x4a6   :  { %v1858_v13 = vpop.f32.mrb[17].mxu0  ;;  %v1899_v25 = vpop.f32.mrb[13].mxu1 }
 0x4a7   :  { %v1860_v11 = vpop.f32.mrb[18].mxu0  ;;  %v1901_v27 = vpop.f32.mrb[14].mxu1 }
 0x4a8   :  { %v1861_v10 = vpop.f32.mrb[19].mxu0  ;;  %v1902_v30 = vpop.f32.mrb[15].mxu1 }
 0x4a9   :  { %v2232_v10 = vld [vmem:[#allocation5 + $0x10] sm:$0x30] }
 0x4c5   :  { %v1989_v40 = vpop.f32.mrb[20].mxu0  ;;  %v2030_v45 = vpop.f32.mrb[16].mxu1 }
 0x4c6   :  { %v2238_v38 = vrot.slane %v1989_v40, 4  ;;  %v1991_v42 = vpop.f32.mrb[21].mxu0  ;;  %v2032_v46 = vpop.f32.mrb[17].mxu1  ;;  %v2240_v11 = vrot.slane %v2030_v45, 4 }
 0x4c7   :  { %v2239_v59 = vrot.slane %v1991_v42, 4  ;;  %v1993_v33 = vpop.f32.mrb[22].mxu0  ;;  %v2034_v0 = vpop.f32.mrb[18].mxu1  ;;  %v2241_v27 = vrot.slane %v2032_v46, 4 }
 0x4c8   :  { %v2246_v52 = vadd.f32 %v2238_v38, %v2230_v35  ;;  %v1994_v61 = vpop.f32.mrb[23].mxu0  ;;  %v2035_v62 = vpop.f32.mrb[19].mxu1  ;;  %v2248_v30 = vadd.f32 %v2240_v11, %v2232_v10 }
 0x4c9   :  { %v2247_v6 = vadd.f32 %v2239_v59, %v2231_v63  ;;  %v2249_v40 = vadd.f32 %v2241_v27, %v2233_v48 }
 0x4ca   :  { %v4149_v53 = vmul.f32 -1.442695, %v2246_v52  ;;  %v4151_v4 = vmul.f32 -1.442695, %v2248_v30 }
 0x4cb   :  { %v4150_v51 = vmul.f32 -1.442695, %v2247_v6 }
 0x4cc   :  { %4316 = vpow2.f32 %v4149_v53  ;;  %v2270_v53 = vrot.slane %v5779_v5, 6 }
 0x4cd   :  { %4318 = vpow2.f32 %v4150_v51 }
 0x4ce   :  { %4320 = vtanh.f32 %v2249_v40 }
 0x4cf   :  { %4322 = vpow2.f32 %v4151_v4 }
 0x4d6   :  { %v4317_v58 = vpop.eup %4316 }
 0x4d7   :  { %v2259_v50 = vadd.f32 1.0, %v4317_v58  ;;  %v4319_v33 = vpop.eup %4318 }
 0x4d8   :  { %v2260_v42 = vadd.f32 1.0, %v4319_v33  ;;  %v4321_v62 = vpop.eup %4320 }
 0x4d9   :  { %4324 = vrcp.f32 %v2259_v50  ;;  %v4323_v52 = vpop.eup %4322 }
 0x4da   :  { %4326 = vrcp.f32 %v2260_v42  ;;  %v2261_v46 = vadd.f32 1.0, %v4323_v52 }
 0x4dc   :  { %4328 = vrcp.f32 %v2261_v46 }
 0x4e3   :  { %v4325_v6 = vpop.eup %4324 }
 0x4e4   :  { %v2273_v45 = vmul.f32 %v4325_v6, %v4321_v62  ;;  %v4327_v51 = vpop.eup %4326 }
 0x4e5   :  { %v2071_v35 = vpop.f32.mrb[24].mxu0  ;;  %v2112_v38 = vpop.f32.mrb[20].mxu1  ;;  %v2272_v48 = vmul.f32 %v4327_v51, %v2270_v53 }
 0x4e6   :  { %v2072_v63 = vadd.f32 %v2071_v35, %v1856_v19  ;;  %v2113_v59 = vadd.f32 %v2112_v38, %v1897_v21  ;;  %v2073_v58 = vpop.f32.mrb[25].mxu0  ;;  %v2114_v0 = vpop.f32.mrb[21].mxu1 }
 0x4e7   :  { %v2074_v61 = vadd.f32 %v2073_v58, %v1858_v13  ;;  %v2115_v4 = vadd.f32 %v2114_v0, %v1899_v25  ;;  %v2075_v50 = vpop.f32.mrb[26].mxu0  ;;  %v2116_v11 = vpop.f32.mrb[22].mxu1  ;;  %v5917_v10 = vadd.f32 %v2273_v45, %v2272_v48 }
 0x4e8   :  { %v2119_v27 = vadd.f32 %v2072_v63, %v5787_v3  ;;  %v2076_v30 = vpop.f32.mrb[27].mxu0  ;;  %v2117_v5 = vpop.f32.mrb[23].mxu1  ;;  %v2121_v13 = vadd.f32 %v2113_v59, %v5799_v44 }
 0x4e9   :  { %v2120_v40 = vadd.f32 %v2074_v61, %v5791_v1  ;;  %4330 = vtanh.f32 %v5917_v10  ;;  %v4329_v21 = vpop.eup %4328  ;;  %v2122_v25 = vadd.f32 %v2115_v4, %v5805_v2  ;;  %v5934_v30 = vld [vmem:[#allocation3 + $0x28] sm:$0xff] }
 0x4ea   :  { %v4146_v33 = vmul.f32 -1.442695, %v2119_v27  ;;  %v4148_v62 = vmul.f32 -1.442695, %v2121_v13  ;;  %v5930_v27 = vld [vmem:[#allocation3] sm:$0xff]  ;;  %v5944_v5 = vld [vmem:[#allocation3 + $0x48] sm:$0xff] }
 0x4eb   :  { %v4147_v19 = vmul.f32 -1.442695, %v2120_v40  ;;  %v5956_v40 = vld [vmem:[#allocation3 + $0x60] sm:$0xff] }
 0x4ec   :  { %4332 = vpow2.f32 %v4146_v33  ;;  %v6051_v33 = vld [vmem:[#allocation2 + $0xf0] sm:$0xff]  ;;  %v7161_v13 = vld [vmem:[#allocation41_spill] sm:$0xff] }
 0x4ed   :  { %4334 = vpow2.f32 %v4147_v19  ;;  %7159 = vst [vmem:[#allocation23_spill] sm:$0xff] %v6051_v33  ;;  %v7160_v19 = vld [vmem:[#allocation40_spill] sm:$0xff] }
 0x4ee   :  { %4336 = vtanh.f32 %v2122_v25  ;;  %v7163_v25 = vld [vmem:[#allocation43_spill] sm:$0xff] }
 0x4ef   :  { %4338 = vpow2.f32 %v4148_v62  ;;  %v7165_v62 = vld [vmem:[#allocation45_spill] sm:$0xff] }
 0x4f3   :  { %v4331_v42 = vpop.eup %4330 }
 0x4f4   :  { %v5924_v52 = vmul.f32 %v4331_v42, %v4329_v21  ;;  %v7162_v21 = vld [vmem:[#allocation42_spill] sm:$0xff]  ;;  %v7164_v42 = vld [vmem:[#allocation44_spill] sm:$0xff] }
 0x4f6   :  { %v4333_v6 = vpop.eup %4332 }
 0x4f7   :  { %v2132_v53 = vadd.f32 1.0, %v4333_v6  ;;  %v4335_v45 = vpop.eup %4334  ;;  %v7167_v6 = vld [vmem:[#allocation47_spill] sm:$0xff] }
 0x4f8   :  { %v2133_v51 = vadd.f32 1.0, %v4335_v45  ;;  %v4337_v46 = vpop.eup %4336  ;;  %v7169_v45 = vld [vmem:[#allocation49_spill] sm:$0xff] }
 0x4f9   :  { %4340 = vrcp.f32 %v2132_v53  ;;  %v4339_v35 = vpop.eup %4338  ;;  %v7168_v53 = vld [vmem:[#allocation48_spill] sm:$0xff] }
 0x4fa   :  { %4342 = vrcp.f32 %v2133_v51  ;;  %v2134_v59 = vadd.f32 1.0, %v4339_v35  ;;  %v7170_v51 = vld [vmem:[#allocation50_spill] sm:$0xff]  ;;  %v7172_v35 = vld [vmem:[#allocation52_spill] sm:$0xff] }
 0x4fc   :  { %4344 = vrcp.f32 %v2134_v59  ;;  %v7176_v59 = vld [vmem:[#allocation56_spill] sm:$0xff] }
 0x503   :  { %v4341_v38 = vpop.eup %4340 }
 0x504   :  { %v2143_v48 = vmul.f32 %v4341_v38, %v4337_v46  ;;  %v4343_v63 = vpop.eup %4342  ;;  %v7171_v46 = vld [vmem:[#allocation51_spill] sm:$0xff]  ;;  %v7173_v38 = vld [vmem:[#allocation53_spill] sm:$0xff] }
 0x505   :  { %v2142_v58 = vmul.f32 %v4343_v63, %v5809_v9  ;;  %v5940_v9 = vld [vmem:[#allocation3 + $0x20] sm:$0xff]  ;;  %v7175_v63 = vld [vmem:[#allocation55_spill] sm:$0xff] }
 0x506   :  { %v4345_v61 = vpop.eup %4344 }
 0x507   :  { %v5927_v0 = vadd.f32 %v2143_v48, %v2142_v58  ;;  %v7174_v48 = vld [vmem:[#allocation54_spill] sm:$0xff]  ;;  %v7177_v58 = vld [vmem:[#allocation57_spill] sm:$0xff] }
 0x509   :  { %4346 = vtanh.f32 %v5927_v0 }
 0x513   :  { %v4347_v4 = vpop.eup %4346 }
 0x514   :  { %v2146_v50 = vmul.f32 %v4347_v4, %v4345_v61  ;;  %v7178_v61 = vld [vmem:[#allocation58_spill] sm:$0xff]  ;;  %v7179_v4 = vld [vmem:[#allocation59_spill] sm:$0xff] }
 0x516   :  { %v2147_v11 = vpack.c.bf16 %v2146_v50, %v2146_v50  ;;  %v7180_v50 = vld [vmem:[#allocation60_spill] sm:$0xff] }
 0x518   :  { %2181 = vmatmul.mubr.bf16.vlgmr.msra.gmra.mrb[28].mxu0 %v2147_v11  ;;  %2222 = vmatmul.mubr.bf16.vlgmr.msra.gmra.mrb[24].mxu1 %v2147_v11  ;;  %v7181_v11 = vld [vmem:[#allocation61_spill] sm:$0xff] }
 0x519   :  { %2282 = vmatpush1.bf16.msra.mxu0 %v5930_v27  ;;  %2323 = vmatpush1.bf16.msra.mxu1 %v5575_v7  ;;  %v5948_v7 = vld [vmem:[#allocation3 + $0x40] sm:$0xff] }
 0x51a   :  { %2283 = vmatprep.subr.bf16.mxu0 %v5934_v30  ;;  %2324 = vmatprep.subr.bf16.mxu1 %v5577_v8  ;;  %v5952_v8 = vld [vmem:[#allocation3 + $0x68] sm:$0xff] }
 0x51b   :  { %2313 = vmatprep.mubr.bf16.mxu0 %v7045_v60  ;;  %2354 = vmatprep.mubr.bf16.mxu1 %v7045_v60 }
 0x51d   :  { %2284 = vmatpush1.bf16.msra.mxu0 %v5940_v9  ;;  %2325 = vmatpush1.bf16.msra.mxu1 %v5584_v14  ;;  %v5960_v14 = vld [vmem:[#allocation3 + $0x88] sm:$0xff] }
 0x51e   :  { %2285 = vmatprep.subr.bf16.mxu0 %v5944_v5  ;;  %2326 = vmatprep.subr.bf16.mxu1 %v5587_v15  ;;  %v5964_v15 = vld [vmem:[#allocation3 + $0x80] sm:$0xff] }
 0x521   :  { %2286 = vmatpush1.bf16.msra.mxu0 %v5948_v7  ;;  %2327 = vmatpush1.bf16.msra.mxu1 %v5591_v17  ;;  %v5968_v17 = vld [vmem:[#allocation3 + $0xa8] sm:$0xff] }
 0x522   :  { %2287 = vmatprep.subr.bf16.mxu0 %v5952_v8  ;;  %2328 = vmatprep.subr.bf16.mxu1 %v5593_v18  ;;  %v5972_v18 = vld [vmem:[#allocation3 + $0xa0] sm:$0xff] }
 0x525   :  { %2288 = vmatpush1.bf16.msra.mxu0 %v5956_v40  ;;  %2329 = vmatpush1.bf16.msra.mxu1 %v5597_v22  ;;  %v5976_v22 = vld [vmem:[#allocation3 + $0xc8] sm:$0xff] }
 0x526   :  { %2289 = vmatprep.subr.bf16.mxu0 %v5960_v14  ;;  %2330 = vmatprep.subr.bf16.mxu1 %v5599_v24  ;;  %v2277_v24 = vpack.c.bf16 %v5924_v52, %v5924_v52  ;;  %v7166_v52 = vld [vmem:[#allocation46_spill] sm:$0xff] }
 0x529   :  { %2290 = vmatpush1.bf16.msra.mxu0 %v5964_v15  ;;  %2331 = vmatpush1.bf16.msra.mxu1 %v5603_v29  ;;  %v2279_v29 = vrot.slane %v2277_v24, 2  ;;  %v7182_v24 = vld [vmem:[#allocation62_spill] sm:$0xff] }
 0x52a   :  { %2291 = vmatprep.subr.bf16.mxu0 %v5968_v17  ;;  %2332 = vmatprep.subr.bf16.mxu1 %v5605_v31  ;;  %v5989_v31 = vld [vmem:[#allocation2 + $0x18] sm:$0xff] }
 0x52d   :  { %2292 = vmatpush1.bf16.msra.mxu0 %v5972_v18  ;;  %2333 = vmatpush1.bf16.msra.mxu1 %v5609_v34  ;;  %v6007_v34 = vld [vmem:[#allocation2 + $0x58] sm:$0xff] }
 0x52e   :  { %2293 = vmatprep.subr.bf16.mxu0 %v5976_v22  ;;  %2334 = vmatprep.subr.bf16.mxu1 %v5611_v36  ;;  %7143 = vst [vmem:[#allocation16_spill] sm:$0xff] %v6007_v34  ;;  %v6011_v36 = vld [vmem:[#allocation2 + $0x50] sm:$0xff] }
 0x52f   :  { %7144 = vst [vmem:[#allocation30_spill] sm:$0xff] %v6011_v36 }
 0x531   :  { %2294 = vmatpush1.bf16.msra.mxu0 %v5527_v39  ;;  %2335 = vmatpush1.bf16.msra.mxu1 %v5615_v37  ;;  %v5993_v39 = vld [vmem:[#allocation2 + $0x10] sm:$0xff]  ;;  %v6015_v37 = vld [vmem:[#allocation2 + $0x78] sm:$0xff] }
 0x532   :  { %2295 = vmatprep.subr.bf16.mxu0 %v5531_v41  ;;  %2336 = vmatprep.subr.bf16.mxu1 %v5617_v47  ;;  %7140 = vst [vmem:[#allocation28_spill] sm:$0xff] %v5993_v39  ;;  %v5997_v41 = vld [vmem:[#allocation2 + $0x38] sm:$0xff]  ;;  %7145 = vst [vmem:[#allocation17_spill] sm:$0xff] %v6015_v37  ;;  %v6019_v47 = vld [vmem:[#allocation2 + $0x70] sm:$0xff] }
 0x533   :  { %7141 = vst [vmem:[#allocation15_spill] sm:$0xff] %v5997_v41  ;;  %7146 = vst [vmem:[#allocation31_spill] sm:$0xff] %v6019_v47 }
 0x535   :  { %2296 = vmatpush1.bf16.msra.mxu0 %v5539_v43  ;;  %2337 = vmatpush1.bf16.msra.mxu1 %v5621_v49  ;;  %v6003_v43 = vld [vmem:[#allocation2 + $0x30] sm:$0xff]  ;;  %v6023_v49 = vld [vmem:[#allocation2 + $0x98] sm:$0xff] }
 0x536   :  { %2363 = vmatprep.subr.bf16.mxu0 %v5623_v54  ;;  %2404 = vmatprep.subr.bf16.mxu1 %v5989_v31  ;;  %7142 = vst [vmem:[#allocation29_spill] sm:$0xff] %v6003_v43  ;;  %7147 = vst [vmem:[#allocation18_spill] sm:$0xff] %v6023_v49  ;;  %v6027_v54 = vld [vmem:[#allocation2 + $0x90] sm:$0xff] }
 0x537   :  { %7148 = vst [vmem:[#allocation32_spill] sm:$0xff] %v6027_v54 }
 0x538   :  { %2314 = vmatmul.mubr.bf16.vlgmr.msra.gmra.mrb[32].mxu0 %v2279_v29  ;;  %2355 = vmatmul.mubr.bf16.vlgmr.msra.gmra.mrb[28].mxu1 %v2279_v29 }
 0x539   :  { %2364 = vmatpush1.bf16.msra.mxu0 %v5627_v55  ;;  %2405 = vmatpush1.bf16.msra.mxu1 %v5993_v39  ;;  %v6031_v55 = vld [vmem:[#allocation2 + $0xb8] sm:$0xff] }
 0x53a   :  { %2365 = vmatprep.subr.bf16.mxu0 %v5629_v56  ;;  %2406 = vmatprep.subr.bf16.mxu1 %v5997_v41  ;;  %7149 = vst [vmem:[#allocation19_spill] sm:$0xff] %v6031_v55  ;;  %v7150_v56 = vld [vmem:[#allocation35_spill] sm:$0xff] }
 0x53b   :  { %2395 = vmatprep.mubr.bf16.mxu0 %v7045_v60  ;;  %2436 = vmatprep.mubr.bf16.mxu1 %v7045_v60 }
 0x53d   :  { %2366 = vmatpush1.bf16.msra.mxu0 %v5635_v57  ;;  %2407 = vmatpush1.bf16.msra.mxu1 %v6003_v43  ;;  %v6035_v57 = vld [vmem:[#allocation2 + $0xb0] sm:$0xff] }
 0x53e   :  { %2367 = vmatprep.subr.bf16.mxu0 %v7082_v12  ;;  %2408 = vmatprep.subr.bf16.mxu1 %v6007_v34  ;;  %7151 = vst [vmem:[#allocation33_spill] sm:$0xff] %v6035_v57  ;;  %v7152_v12 = vld [vmem:[#allocation36_spill] sm:$0xff] }
 0x541   :  { %2368 = vmatpush1.bf16.msra.mxu0 %v7084_v16  ;;  %2409 = vmatpush1.bf16.msra.mxu1 %v6011_v36  ;;  %v6039_v16 = vld [vmem:[#allocation2 + $0xd8] sm:$0xff] }
 0x542   :  { %2369 = vmatprep.subr.bf16.mxu0 %v7086_v20  ;;  %2410 = vmatprep.subr.bf16.mxu1 %v6015_v37  ;;  %7153 = vst [vmem:[#allocation21_spill] sm:$0xff] %v6039_v16  ;;  %v7154_v20 = vld [vmem:[#allocation37_spill] sm:$0xff] }
 0x545   :  { %2370 = vmatpush1.bf16.msra.mxu0 %v7088_v23  ;;  %2411 = vmatpush1.bf16.msra.mxu1 %v6019_v47  ;;  %v6043_v23 = vld [vmem:[#allocation2 + $0xd0] sm:$0xff] }
 0x546   :  { %2371 = vmatprep.subr.bf16.mxu0 %v7090_v26  ;;  %2412 = vmatprep.subr.bf16.mxu1 %v6023_v49  ;;  %7155 = vst [vmem:[#allocation34_spill] sm:$0xff] %v6043_v23  ;;  %v7156_v26 = vld [vmem:[#allocation38_spill] sm:$0xff] }
 0x549   :  { %2372 = vmatpush1.bf16.msra.mxu0 %v7092_v28  ;;  %2413 = vmatpush1.bf16.msra.mxu1 %v6027_v54  ;;  %v6047_v28 = vld [vmem:[#allocation2 + $0xf8] sm:$0xff] }
 0x54a   :  { %2373 = vmatprep.subr.bf16.mxu0 %v7094_v32  ;;  %2414 = vmatprep.subr.bf16.mxu1 %v6031_v55  ;;  %7157 = vst [vmem:[#allocation22_spill] sm:$0xff] %v6047_v28  ;;  %v7158_v32 = vld [vmem:[#allocation39_spill] sm:$0xff] }
 0x54d   :  { %2374 = vmatpush1.bf16.msra.mxu0 %v7150_v56  ;;  %2415 = vmatpush1.bf16.msra.mxu1 %v6035_v57  ;;  %v7184_v56 = vld [vmem:[#allocation64_spill] sm:$0xff] }
 0x54e   :  { %2375 = vmatprep.subr.bf16.mxu0 %v7152_v12  ;;  %2416 = vmatprep.subr.bf16.mxu1 %v6039_v16  ;;  %v7185_v12 = vld [vmem:[#allocation65_spill] sm:$0xff] }
 0x551   :  { %2376 = vmatpush1.bf16.msra.mxu0 %v7154_v20  ;;  %2417 = vmatpush1.bf16.msra.mxu1 %v6043_v23  ;;  %v7186_v20 = vld [vmem:[#allocation66_spill] sm:$0xff] }
 0x552   :  { %2377 = vmatprep.subr.bf16.mxu0 %v7156_v26  ;;  %2418 = vmatprep.subr.bf16.mxu1 %v6047_v28  ;;  %v7187_v26 = vld [vmem:[#allocation67_spill] sm:$0xff] }
 0x555   :  { %2378 = vmatpush1.bf16.msra.mxu0 %v7158_v32  ;;  %2419 = vmatpush1.bf16.msra.mxu1 %v6051_v33  ;;  %v7188_v32 = vld [vmem:[#allocation68_spill] sm:$0xff] }
 0x556   :  { %2474 = vmatprep.subr.bf16.mxu0 %v7160_v19  ;;  %2515 = vmatprep.subr.bf16.mxu1 %v7161_v13  ;;  %v7189_v19 = vld [vmem:[#allocation69_spill] sm:$0xff]  ;;  %v7190_v13 = vld [vmem:[#allocation70_spill] sm:$0xff] }
 0x558   :  { %2396 = vmatmul.mubr.bf16.vlgmr.msra.gmra.mrb[36].mxu0 %v2279_v29  ;;  %2437 = vmatmul.mubr.bf16.vlgmr.msra.gmra.mrb[32].mxu1 %v2279_v29  ;;  %v7183_v29 = vld [vmem:[#allocation63_spill] sm:$0xff] }
 0x559   :  { %2475 = vmatpush1.bf16.msra.mxu0 %v7162_v21  ;;  %2516 = vmatpush1.bf16.msra.mxu1 %v7163_v25  ;;  %v7191_v21 = vld [vmem:[#allocation71_spill] sm:$0xff] }
 0x55a   :  { %2476 = vmatprep.subr.bf16.mxu0 %v7164_v42  ;;  %2517 = vmatprep.subr.bf16.mxu1 %v7165_v62  ;;  %v6088_v25 = vld [vmem:[#allocation3 + $0x8] sm:$0xff]  ;;  %v6091_v42 = vld [vmem:[#allocation3 + $0x18] sm:$0xff] }
 0x55b   :  { %2506 = vmatprep.mubr.bf16.mxu0 %v7045_v60  ;;  %2547 = vmatprep.mubr.bf16.mxu1 %v7045_v60  ;;  %7192 = vst [vmem:[#allocation24_spill] sm:$0xff] %v6088_v25  ;;  %7193 = vst [vmem:[#allocation25_spill] sm:$0xff] %v6091_v42 }
 0x55d   :  { %2477 = vmatpush1.bf16.msra.mxu0 %v7166_v52  ;;  %2518 = vmatpush1.bf16.msra.mxu1 %v7167_v6 }
 0x55e   :  { %2478 = vmatprep.subr.bf16.mxu0 %v7168_v53  ;;  %2519 = vmatprep.subr.bf16.mxu1 %v7169_v45 }
 0x561   :  { %2479 = vmatpush1.bf16.msra.mxu0 %v7170_v51  ;;  %2520 = vmatpush1.bf16.msra.mxu1 %v7171_v46 }
 0x562   :  { %2480 = vmatprep.subr.bf16.mxu0 %v7172_v35  ;;  %2521 = vmatprep.subr.bf16.mxu1 %v7173_v38 }
 0x565   :  { %2481 = vmatpush1.bf16.msra.mxu0 %v7174_v48  ;;  %2522 = vmatpush1.bf16.msra.mxu1 %v7175_v63  ;;  %v2556_v48 = vld [vmem:[#allocation5] sm:$0xc0] }
 0x566   :  { %2482 = vmatprep.subr.bf16.mxu0 %v7176_v59  ;;  %2523 = vmatprep.subr.bf16.mxu1 %v7177_v58 }
 0x569   :  { %2483 = vmatpush1.bf16.msra.mxu0 %v7178_v61  ;;  %2524 = vmatpush1.bf16.msra.mxu1 %v7179_v4  ;;  %v2557_v61 = vld [vmem:[#allocation5 + $0x8] sm:$0xc0] }
 0x56a   :  { %2484 = vmatprep.subr.bf16.mxu0 %v7180_v50  ;;  %2525 = vmatprep.subr.bf16.mxu1 %v7181_v11 }
 0x56d   :  { %2485 = vmatpush1.bf16.msra.mxu0 %v7182_v24  ;;  %2526 = vmatpush1.bf16.msra.mxu1 %v7183_v29 }
 0x56e   :  { %2486 = vmatprep.subr.bf16.mxu0 %v7184_v56  ;;  %2527 = vmatprep.subr.bf16.mxu1 %v7185_v12 }
 0x571   :  { %2487 = vmatpush1.bf16.msra.mxu0 %v7186_v20  ;;  %2528 = vmatpush1.bf16.msra.mxu1 %v7187_v26 }
 0x572   :  { %2488 = vmatprep.subr.bf16.mxu0 %v7188_v32  ;;  %2529 = vmatprep.subr.bf16.mxu1 %v7189_v19 }
 0x575   :  { %2489 = vmatpush1.bf16.msra.mxu0 %v7190_v13  ;;  %2530 = vmatpush1.bf16.msra.mxu1 %v7191_v21  ;;  %v2558_v13 = vld [vmem:[#allocation5 + $0x10] sm:$0xc0] }
 0x576   :  { %2607 = vmatprep.subr.bf16.mxu0 %v6088_v25  ;;  %2648 = vmatprep.subr.bf16.mxu1 %v6091_v42 }
 0x5eb   :  { %v2182_v62 = vpop.f32.mrb[28].mxu0  ;;  %v2223_v52 = vpop.f32.mrb[24].mxu1 }
 0x5ec   :  { %v2184_v6 = vpop.f32.mrb[29].mxu0  ;;  %v2225_v53 = vpop.f32.mrb[25].mxu1 }
 0x5ed   :  { %v2186_v45 = vpop.f32.mrb[30].mxu0  ;;  %v2227_v51 = vpop.f32.mrb[26].mxu1 }
 0x5ee   :  { %v2187_v46 = vpop.f32.mrb[31].mxu0  ;;  %v2228_v35 = vpop.f32.mrb[27].mxu1  ;;  %v2559_v51 = vld [vmem:[#allocation5 + $0x18] sm:$0xc0] }
 0x60b   :  { %v2315_v38 = vpop.f32.mrb[32].mxu0  ;;  %v2356_v63 = vpop.f32.mrb[28].mxu1 }
 0x60c   :  { %v2564_v59 = vrot.slane %v2315_v38, 2  ;;  %v2317_v58 = vpop.f32.mrb[33].mxu0  ;;  %v2358_v4 = vpop.f32.mrb[29].mxu1  ;;  %v2566_v19 = vrot.slane %v2356_v63, 2  ;;  %v2596_v63 = vrot.slane %v5917_v10, 6 }
 0x60d   :  { %v2565_v50 = vrot.slane %v2317_v58, 2  ;;  %v2319_v11 = vpop.f32.mrb[34].mxu0  ;;  %v2360_v24 = vpop.f32.mrb[30].mxu1  ;;  %v2567_v21 = vrot.slane %v2358_v4, 2 }
 0x60e   :  { %v2572_v29 = vadd.f32 %v2564_v59, %v2556_v48  ;;  %v2320_v56 = vpop.f32.mrb[35].mxu0  ;;  %v2361_v12 = vpop.f32.mrb[31].mxu1  ;;  %v2574_v45 = vadd.f32 %v2566_v19, %v2558_v13 }
 0x60f   :  { %v2573_v20 = vadd.f32 %v2565_v50, %v2557_v61  ;;  %v2575_v46 = vadd.f32 %v2567_v21, %v2559_v51 }
 0x610   :  { %v4155_v26 = vmul.f32 -1.442695, %v2572_v29  ;;  %v4157_v35 = vmul.f32 -1.442695, %v2574_v45 }
 0x611   :  { %v4156_v32 = vmul.f32 -1.442695, %v2573_v20 }
 0x612   :  { %4348 = vpow2.f32 %v4155_v26 }
 0x613   :  { %4350 = vpow2.f32 %v4156_v32 }
 0x614   :  { %4352 = vtanh.f32 %v2575_v46 }
 0x615   :  { %4354 = vpow2.f32 %v4157_v35 }
 0x61c   :  { %v4349_v38 = vpop.eup %4348 }
 0x61d   :  { %v2585_v42 = vadd.f32 1.0, %v4349_v38  ;;  %v4351_v58 = vpop.eup %4350 }
 0x61e   :  { %v2586_v48 = vadd.f32 1.0, %v4351_v58  ;;  %v4353_v59 = vpop.eup %4352 }
 0x61f   :  { %4356 = vrcp.f32 %v2585_v42  ;;  %v4355_v61 = vpop.eup %4354 }
 0x620   :  { %4358 = vrcp.f32 %v2586_v48  ;;  %v2587_v4 = vadd.f32 1.0, %v4355_v61 }
 0x622   :  { %4360 = vrcp.f32 %v2587_v4 }
 0x629   :  { %v4357_v50 = vpop.eup %4356 }
 0x62a   :  { %v2599_v11 = vmul.f32 %v4357_v50, %v4353_v59  ;;  %v4359_v24 = vpop.eup %4358 }
 0x62b   :  { %v2397_v29 = vpop.f32.mrb[36].mxu0  ;;  %v2438_v56 = vpop.f32.mrb[32].mxu1  ;;  %v2598_v12 = vmul.f32 %v4359_v24, %v2596_v63 }
 0x62c   :  { %v2398_v20 = vadd.f32 %v2397_v29, %v2182_v62  ;;  %v2439_v26 = vadd.f32 %v2438_v56, %v2223_v52  ;;  %v2399_v32 = vpop.f32.mrb[37].mxu0  ;;  %v2440_v19 = vpop.f32.mrb[33].mxu1 }
 0x62d   :  { %v2400_v13 = vadd.f32 %v2399_v32, %v2184_v6  ;;  %v2441_v21 = vadd.f32 %v2440_v19, %v2225_v53  ;;  %v2401_v42 = vpop.f32.mrb[38].mxu0  ;;  %v2442_v45 = vpop.f32.mrb[34].mxu1  ;;  %v6095_v51 = vadd.f32 %v2599_v11, %v2598_v12 }
 0x62e   :  { %v2445_v46 = vadd.f32 %v2398_v20, %v5787_v3  ;;  %v2402_v35 = vpop.f32.mrb[39].mxu0  ;;  %v2443_v10 = vpop.f32.mrb[35].mxu1  ;;  %v2447_v52 = vadd.f32 %v2439_v26, %v5799_v44 }
 0x62f   :  { %v2446_v38 = vadd.f32 %v2400_v13, %v5791_v1  ;;  %4362 = vtanh.f32 %v6095_v51  ;;  %v4361_v6 = vpop.eup %4360  ;;  %v2448_v53 = vadd.f32 %v2441_v21, %v5805_v2  ;;  %v6119_v35 = vld [vmem:[#allocation3 + $0x30] sm:$0xff]  ;;  %v6123_v10 = vld [vmem:[#allocation3 + $0x58] sm:$0xff] }
 0x630   :  { %v4152_v58 = vmul.f32 -1.442695, %v2445_v46  ;;  %v4154_v59 = vmul.f32 -1.442695, %v2447_v52  ;;  %v6109_v46 = vld [vmem:[#allocation3 + $0x10] sm:$0xff]  ;;  %v6139_v52 = vld [vmem:[#allocation3 + $0x98] sm:$0xff] }
 0x631   :  { %v4153_v62 = vmul.f32 -1.442695, %v2446_v38  ;;  %v6127_v38 = vld [vmem:[#allocation3 + $0x50] sm:$0xff] }
 0x632   :  { %4364 = vpow2.f32 %v4152_v58  ;;  %v6131_v58 = vld [vmem:[#allocation3 + $0x78] sm:$0xff] }
 0x633   :  { %4366 = vpow2.f32 %v4153_v62  ;;  %v6135_v62 = vld [vmem:[#allocation3 + $0x70] sm:$0xff] }
 0x634   :  { %4368 = vtanh.f32 %v2448_v53  ;;  %v6147_v53 = vld [vmem:[#allocation3 + $0xb8] sm:$0xff] }
 0x635   :  { %4370 = vpow2.f32 %v4154_v59  ;;  %v6155_v59 = vld [vmem:[#allocation3 + $0xd8] sm:$0xff] }
 0x639   :  { %v4363_v48 = vpop.eup %4362 }
 0x63a   :  { %v6102_v61 = vmul.f32 %v4363_v48, %v4361_v6  ;;  %v6143_v6 = vld [vmem:[#allocation3 + $0x90] sm:$0xff] }
 0x63b   :  { %v6151_v48 = vld [vmem:[#allocation3 + $0xb0] sm:$0xff] }
 0x63c   :  { %v4365_v50 = vpop.eup %4364 }
 0x63d   :  { %v2458_v63 = vadd.f32 1.0, %v4365_v50  ;;  %v4367_v11 = vpop.eup %4366  ;;  %v6158_v50 = vld [vmem:[#allocation3 + $0xc0] sm:$0xff] }
 0x63e   :  { %v2459_v24 = vadd.f32 1.0, %v4367_v11  ;;  %v4369_v4 = vpop.eup %4368  ;;  %v6164_v11 = vld [vmem:[#allocation3 + $0xe8] sm:$0xff] }
 0x63f   :  { %4372 = vrcp.f32 %v2458_v63  ;;  %v4371_v29 = vpop.eup %4370  ;;  %v6161_v63 = vld [vmem:[#allocation3 + $0xd0] sm:$0xff] }
 0x640   :  { %4374 = vrcp.f32 %v2459_v24  ;;  %v2460_v26 = vadd.f32 1.0, %v4371_v29  ;;  %v6167_v24 = vld [vmem:[#allocation3 + $0xf8] sm:$0xff]  ;;  %v6172_v29 = vld [vmem:[#allocation3 + $0xe0] sm:$0xff] }
 0x642   :  { %4376 = vrcp.f32 %v2460_v26  ;;  %v6182_v26 = vld [vmem:[#allocation2] sm:$0xff] }
 0x643   :  { %7194 = vst [vmem:[#allocation26_spill] sm:$0xff] %v6182_v26 }
 0x649   :  { %v4373_v56 = vpop.eup %4372 }
 0x64a   :  { %v2469_v12 = vmul.f32 %v4373_v56, %v4369_v4  ;;  %v4375_v20 = vpop.eup %4374  ;;  %v2603_v4 = vpack.c.bf16 %v6102_v61, %v6102_v61  ;;  %v6175_v56 = vld [vmem:[#allocation3 + $0xf0] sm:$0xff]  ;;  %v6186_v61 = vld [vmem:[#allocation2 + $0x28] sm:$0xff] }
 0x64b   :  { %v2468_v32 = vmul.f32 %v4375_v20, %v5927_v0  ;;  %v6113_v0 = vld [vmem:[#allocation3 + $0x38] sm:$0xff]  ;;  %v6178_v20 = vld [vmem:[#allocation2 + $0x8] sm:$0xff]  ;;  %7195 = vst [vmem:[#allocation27_spill] sm:$0xff] %v6186_v61 }
 0x64c   :  { %v4377_v13 = vpop.eup %4376 }
 0x64d   :  { %v6105_v19 = vadd.f32 %v2469_v12, %v2468_v32  ;;  %v2605_v12 = vrot.slane %v2603_v4, 3  ;;  %v6192_v32 = vld [vmem:[#allocation2 + $0x20] sm:$0xff]  ;;  %v6212_v4 = vld [vmem:[#allocation2 + $0x88] sm:$0xff] }
 0x64e   :  { %7196 = vst [vmem:[#allocation14_spill] sm:$0xff] %v6192_v32  ;;  %7201 = vst [vmem:[#allocation38_spill] sm:$0xff] %v6212_v4 }
 0x64f   :  { %4378 = vtanh.f32 %v6105_v19 }
 0x659   :  { %v4379_v21 = vpop.eup %4378 }
 0x65a   :  { %v2472_v42 = vmul.f32 %v4379_v21, %v4377_v13  ;;  %v6196_v13 = vld [vmem:[#allocation2 + $0x48] sm:$0xff]  ;;  %v6200_v21 = vld [vmem:[#allocation2 + $0x40] sm:$0xff] }
 0x65b   :  { %7197 = vst [vmem:[#allocation20_spill] sm:$0xff] %v6196_v13  ;;  %7198 = vst [vmem:[#allocation35_spill] sm:$0xff] %v6200_v21 }
 0x65c   :  { %v2473_v45 = vpack.c.bf16 %v2472_v42, %v2472_v42  ;;  %v6204_v42 = vld [vmem:[#allocation2 + $0x68] sm:$0xff] }
 0x65d   :  { %7199 = vst [vmem:[#allocation36_spill] sm:$0xff] %v6204_v42 }
 0x65e   :  { %2507 = vmatmul.mubr.bf16.vlgmr.msra.gmra.mrb[40].mxu0 %v2473_v45  ;;  %2548 = vmatmul.mubr.bf16.vlgmr.msra.gmra.mrb[36].mxu1 %v2473_v45  ;;  %v6208_v45 = vld [vmem:[#allocation2 + $0x60] sm:$0xff] }
 0x65f   :  { %2608 = vmatpush1.bf16.msra.mxu0 %v5930_v27  ;;  %2649 = vmatpush1.bf16.msra.mxu1 %v6109_v46  ;;  %7200 = vst [vmem:[#allocation37_spill] sm:$0xff] %v6208_v45 }
 0x660   :  { %2609 = vmatprep.subr.bf16.mxu0 %v5934_v30  ;;  %2650 = vmatprep.subr.bf16.mxu1 %v6113_v0 }
 0x661   :  { %2639 = vmatprep.mubr.bf16.mxu0 %v7045_v60  ;;  %2680 = vmatprep.mubr.bf16.mxu1 %v7045_v60 }
 0x663   :  { %2610 = vmatpush1.bf16.msra.mxu0 %v5940_v9  ;;  %2651 = vmatpush1.bf16.msra.mxu1 %v6119_v35 }
 0x664   :  { %2611 = vmatprep.subr.bf16.mxu0 %v5944_v5  ;;  %2652 = vmatprep.subr.bf16.mxu1 %v6123_v10 }
 0x667   :  { %2612 = vmatpush1.bf16.msra.mxu0 %v5948_v7  ;;  %2653 = vmatpush1.bf16.msra.mxu1 %v6127_v38 }
 0x668   :  { %2613 = vmatprep.subr.bf16.mxu0 %v5952_v8  ;;  %2654 = vmatprep.subr.bf16.mxu1 %v6131_v58 }
 0x66b   :  { %2614 = vmatpush1.bf16.msra.mxu0 %v5956_v40  ;;  %2655 = vmatpush1.bf16.msra.mxu1 %v6135_v62 }
 0x66c   :  { %2615 = vmatprep.subr.bf16.mxu0 %v5960_v14  ;;  %2656 = vmatprep.subr.bf16.mxu1 %v6139_v52 }
 0x66f   :  { %2616 = vmatpush1.bf16.msra.mxu0 %v5964_v15  ;;  %2657 = vmatpush1.bf16.msra.mxu1 %v6143_v6 }
 0x670   :  { %2617 = vmatprep.subr.bf16.mxu0 %v5968_v17  ;;  %2658 = vmatprep.subr.bf16.mxu1 %v6147_v53 }
 0x673   :  { %2618 = vmatpush1.bf16.msra.mxu0 %v5972_v18  ;;  %2659 = vmatpush1.bf16.msra.mxu1 %v6151_v48 }
 0x674   :  { %2619 = vmatprep.subr.bf16.mxu0 %v5976_v22  ;;  %2660 = vmatprep.subr.bf16.mxu1 %v6155_v59 }
 0x677   :  { %2620 = vmatpush1.bf16.msra.mxu0 %v6158_v50  ;;  %2661 = vmatpush1.bf16.msra.mxu1 %v6161_v63 }
 0x678   :  { %2621 = vmatprep.subr.bf16.mxu0 %v6164_v11  ;;  %2662 = vmatprep.subr.bf16.mxu1 %v6167_v24 }
 0x67b   :  { %2622 = vmatpush1.bf16.msra.mxu0 %v6172_v29  ;;  %2663 = vmatpush1.bf16.msra.mxu1 %v6175_v56 }
 0x67c   :  { %2689 = vmatprep.subr.bf16.mxu0 %v6178_v20  ;;  %2730 = vmatprep.subr.bf16.mxu1 %v5989_v31 }
 0x67e   :  { %2640 = vmatmul.mubr.bf16.vlgmr.msra.gmra.mrb[44].mxu0 %v2605_v12  ;;  %2681 = vmatmul.mubr.bf16.vlgmr.msra.gmra.mrb[40].mxu1 %v2605_v12 }
 0x67f   :  { %2690 = vmatpush1.bf16.msra.mxu0 %v6182_v26  ;;  %2731 = vmatpush1.bf16.msra.mxu1 %v5993_v39 }
 0x680   :  { %2691 = vmatprep.subr.bf16.mxu0 %v6186_v61  ;;  %2732 = vmatprep.subr.bf16.mxu1 %v5997_v41  ;;  %v2884_v61 = vld [vmem:[#allocation5 + $0x30] sm:$0x3] }
 0x681   :  { %2721 = vmatprep.mubr.bf16.mxu0 %v7045_v60  ;;  %2762 = vmatprep.mubr.bf16.mxu1 %v7045_v60 }
 0x683   :  { %2692 = vmatpush1.bf16.msra.mxu0 %v6192_v32  ;;  %2733 = vmatpush1.bf16.msra.mxu1 %v6003_v43 }
 0x684   :  { %2693 = vmatprep.subr.bf16.mxu0 %v6196_v13  ;;  %2734 = vmatprep.subr.bf16.mxu1 %v6007_v34 }
 0x687   :  { %2694 = vmatpush1.bf16.msra.mxu0 %v6200_v21  ;;  %2735 = vmatpush1.bf16.msra.mxu1 %v6011_v36  ;;  %v6216_v21 = vld [vmem:[#allocation2 + $0x80] sm:$0xff] }
 0x688   :  { %2695 = vmatprep.subr.bf16.mxu0 %v6204_v42  ;;  %2736 = vmatprep.subr.bf16.mxu1 %v6015_v37  ;;  %7202 = vst [vmem:[#allocation39_spill] sm:$0xff] %v6216_v21  ;;  %v6220_v42 = vld [vmem:[#allocation2 + $0xa8] sm:$0xff] }
 0x689   :  { %7203 = vst [vmem:[#allocation40_spill] sm:$0xff] %v6220_v42 }
 0x68b   :  { %2696 = vmatpush1.bf16.msra.mxu0 %v6208_v45  ;;  %2737 = vmatpush1.bf16.msra.mxu1 %v6019_v47  ;;  %v6224_v45 = vld [vmem:[#allocation2 + $0xa0] sm:$0xff] }
 0x68c   :  { %2697 = vmatprep.subr.bf16.mxu0 %v6212_v4  ;;  %2738 = vmatprep.subr.bf16.mxu1 %v6023_v49  ;;  %7204 = vst [vmem:[#allocation41_spill] sm:$0xff] %v6224_v45  ;;  %v6228_v4 = vld [vmem:[#allocation2 + $0xc8] sm:$0xff] }
 0x68d   :  { %7205 = vst [vmem:[#allocation42_spill] sm:$0xff] %v6228_v4  ;;  %v2883_v49 = vld [vmem:[#allocation5 + $0x28] sm:$0x3] }
 0x68f   :  { %2698 = vmatpush1.bf16.msra.mxu0 %v6216_v21  ;;  %2739 = vmatpush1.bf16.msra.mxu1 %v6027_v54  ;;  %v6232_v21 = vld [vmem:[#allocation2 + $0xc0] sm:$0xff] }
 0x690   :  { %2699 = vmatprep.subr.bf16.mxu0 %v6220_v42  ;;  %2740 = vmatprep.subr.bf16.mxu1 %v6031_v55  ;;  %7206 = vst [vmem:[#allocation43_spill] sm:$0xff] %v6232_v21  ;;  %v6236_v42 = vld [vmem:[#allocation2 + $0xe8] sm:$0xff]  ;;  %v2882_v54 = vld [vmem:[#allocation5 + $0x20] sm:$0x3] }
 0x691   :  { %7207 = vst [vmem:[#allocation44_spill] sm:$0xff] %v6236_v42 }
 0x693   :  { %2700 = vmatpush1.bf16.msra.mxu0 %v6224_v45  ;;  %2741 = vmatpush1.bf16.msra.mxu1 %v6035_v57  ;;  %v6240_v45 = vld [vmem:[#allocation2 + $0xe0] sm:$0xff] }
 0x694   :  { %2701 = vmatprep.subr.bf16.mxu0 %v6228_v4  ;;  %2742 = vmatprep.subr.bf16.mxu1 %v6039_v16  ;;  %7208 = vst [vmem:[#allocation45_spill] sm:$0xff] %v6240_v45  ;;  %v6244_v4 = vld [vmem:[#allocation4 + $0x8] sm:$0xff]  ;;  %v6247_v16 = vld [vmem:[#allocation4 + $0x18] sm:$0xff] }
 0x695   :  { %7209 = vst [vmem:[#allocation46_spill] sm:$0xff] %v6244_v4  ;;  %7210 = vst [vmem:[#allocation47_spill] sm:$0xff] %v6247_v16 }
 0x697   :  { %2702 = vmatpush1.bf16.msra.mxu0 %v6232_v21  ;;  %2743 = vmatpush1.bf16.msra.mxu1 %v6043_v23  ;;  %v6250_v23 = vld [vmem:[#allocation4] sm:$0xff] }
 0x698   :  { %2703 = vmatprep.subr.bf16.mxu0 %v6236_v42  ;;  %2744 = vmatprep.subr.bf16.mxu1 %v6047_v28  ;;  %7211 = vst [vmem:[#allocation48_spill] sm:$0xff] %v6250_v23  ;;  %v6253_v28 = vld [vmem:[#allocation4 + $0x10] sm:$0xff] }
 0x699   :  { %7212 = vst [vmem:[#allocation49_spill] sm:$0xff] %v6253_v28 }
 0x69b   :  { %2704 = vmatpush1.bf16.msra.mxu0 %v6240_v45  ;;  %2745 = vmatpush1.bf16.msra.mxu1 %v6051_v33  ;;  %v6256_v45 = vld [vmem:[#allocation4 + $0x28] sm:$0xff]  ;;  %v6259_v33 = vld [vmem:[#allocation4 + $0x38] sm:$0xff] }
 0x69c   :  { %2800 = vmatprep.subr.bf16.mxu0 %v6244_v4  ;;  %2841 = vmatprep.subr.bf16.mxu1 %v6247_v16  ;;  %7213 = vst [vmem:[#allocation50_spill] sm:$0xff] %v6256_v45  ;;  %7214 = vst [vmem:[#allocation51_spill] sm:$0xff] %v6259_v33  ;;  %v6279_v16 = vld [vmem:[#allocation4 + $0x50] sm:$0xff] }
 0x69d   :  { %7220 = vst [vmem:[#allocation57_spill] sm:$0xff] %v6279_v16 }
 0x69e   :  { %2722 = vmatmul.mubr.bf16.vlgmr.msra.gmra.mrb[48].mxu0 %v2605_v12  ;;  %2763 = vmatmul.mubr.bf16.vlgmr.msra.gmra.mrb[44].mxu1 %v2605_v12  ;;  %v6264_v12 = vld [vmem:[#allocation4 + $0x20] sm:$0xff] }
 0x69f   :  { %2801 = vmatpush1.bf16.msra.mxu0 %v6250_v23  ;;  %2842 = vmatpush1.bf16.msra.mxu1 %v6253_v28  ;;  %7215 = vst [vmem:[#allocation52_spill] sm:$0xff] %v6264_v12  ;;  %v6267_v23 = vld [vmem:[#allocation4 + $0x30] sm:$0xff]  ;;  %v6270_v28 = vld [vmem:[#allocation4 + $0x48] sm:$0xff] }
 0x6a0   :  { %2802 = vmatprep.subr.bf16.mxu0 %v6256_v45  ;;  %2843 = vmatprep.subr.bf16.mxu1 %v6259_v33  ;;  %7216 = vst [vmem:[#allocation53_spill] sm:$0xff] %v6267_v23  ;;  %7217 = vst [vmem:[#allocation54_spill] sm:$0xff] %v6270_v28  ;;  %v6273_v45 = vld [vmem:[#allocation4 + $0x58] sm:$0xff]  ;;  %v6276_v33 = vld [vmem:[#allocation4 + $0x40] sm:$0xff] }
 0x6a1   :  { %2832 = vmatprep.mubr.bf16.mxu0 %v7045_v60  ;;  %2873 = vmatprep.mubr.bf16.mxu1 %v7045_v60  ;;  %7218 = vst [vmem:[#allocation55_spill] sm:$0xff] %v6273_v45  ;;  %7219 = vst [vmem:[#allocation56_spill] sm:$0xff] %v6276_v33 }
 0x6a3   :  { %2803 = vmatpush1.bf16.msra.mxu0 %v6264_v12  ;;  %2844 = vmatpush1.bf16.msra.mxu1 %v6267_v23  ;;  %v6282_v12 = vld [vmem:[#allocation4 + $0x68] sm:$0xff]  ;;  %v6285_v23 = vld [vmem:[#allocation4 + $0x78] sm:$0xff] }
 0x6a4   :  { %2804 = vmatprep.subr.bf16.mxu0 %v6270_v28  ;;  %2845 = vmatprep.subr.bf16.mxu1 %v6273_v45  ;;  %7221 = vst [vmem:[#allocation58_spill] sm:$0xff] %v6282_v12  ;;  %7222 = vst [vmem:[#allocation59_spill] sm:$0xff] %v6285_v23  ;;  %v6288_v28 = vld [vmem:[#allocation4 + $0x60] sm:$0xff]  ;;  %v6291_v45 = vld [vmem:[#allocation4 + $0x70] sm:$0xff] }
 0x6a5   :  { %7223 = vst [vmem:[#allocation60_spill] sm:$0xff] %v6288_v28  ;;  %7224 = vst [vmem:[#allocation61_spill] sm:$0xff] %v6291_v45 }
 0x6a7   :  { %2805 = vmatpush1.bf16.msra.mxu0 %v6276_v33  ;;  %2846 = vmatpush1.bf16.msra.mxu1 %v6279_v16  ;;  %v6294_v33 = vld [vmem:[#allocation4 + $0x88] sm:$0xff]  ;;  %v6297_v16 = vld [vmem:[#allocation4 + $0x98] sm:$0xff] }
 0x6a8   :  { %2806 = vmatprep.subr.bf16.mxu0 %v6282_v12  ;;  %2847 = vmatprep.subr.bf16.mxu1 %v6285_v23  ;;  %7225 = vst [vmem:[#allocation62_spill] sm:$0xff] %v6294_v33  ;;  %7226 = vst [vmem:[#allocation63_spill] sm:$0xff] %v6297_v16  ;;  %v6300_v12 = vld [vmem:[#allocation4 + $0x80] sm:$0xff]  ;;  %v6303_v23 = vld [vmem:[#allocation4 + $0x90] sm:$0xff] }
 0x6a9   :  { %7227 = vst [vmem:[#allocation64_spill] sm:$0xff] %v6300_v12  ;;  %7228 = vst [vmem:[#allocation65_spill] sm:$0xff] %v6303_v23 }
 0x6ab   :  { %2807 = vmatpush1.bf16.msra.mxu0 %v6288_v28  ;;  %2848 = vmatpush1.bf16.msra.mxu1 %v6291_v45  ;;  %v6306_v28 = vld [vmem:[#allocation4 + $0xa8] sm:$0xff]  ;;  %v6309_v45 = vld [vmem:[#allocation4 + $0xb8] sm:$0xff] }
 0x6ac   :  { %2808 = vmatprep.subr.bf16.mxu0 %v6294_v33  ;;  %2849 = vmatprep.subr.bf16.mxu1 %v6297_v16  ;;  %7229 = vst [vmem:[#allocation66_spill] sm:$0xff] %v6306_v28  ;;  %7230 = vst [vmem:[#allocation67_spill] sm:$0xff] %v6309_v45  ;;  %v6312_v33 = vld [vmem:[#allocation4 + $0xa0] sm:$0xff]  ;;  %v6315_v16 = vld [vmem:[#allocation4 + $0xb0] sm:$0xff] }
 0x6ad   :  { %7231 = vst [vmem:[#allocation68_spill] sm:$0xff] %v6312_v33  ;;  %7232 = vst [vmem:[#allocation69_spill] sm:$0xff] %v6315_v16 }
 0x6af   :  { %2809 = vmatpush1.bf16.msra.mxu0 %v6300_v12  ;;  %2850 = vmatpush1.bf16.msra.mxu1 %v6303_v23  ;;  %v6318_v12 = vld [vmem:[#allocation4 + $0xc8] sm:$0xff]  ;;  %v6321_v23 = vld [vmem:[#allocation4 + $0xd8] sm:$0xff] }
 0x6b0   :  { %2810 = vmatprep.subr.bf16.mxu0 %v6306_v28  ;;  %2851 = vmatprep.subr.bf16.mxu1 %v6309_v45  ;;  %7233 = vst [vmem:[#allocation70_spill] sm:$0xff] %v6318_v12  ;;  %7234 = vst [vmem:[#allocation71_spill] sm:$0xff] %v6321_v23  ;;  %v6324_v28 = vld [vmem:[#allocation4 + $0xc0] sm:$0xff]  ;;  %v6327_v45 = vld [vmem:[#allocation4 + $0xd0] sm:$0xff] }
 0x6b1   :  { %7235 = vst [vmem:[#allocation72_spill] sm:$0xff] %v6324_v28  ;;  %7236 = vst [vmem:[#allocation73_spill] sm:$0xff] %v6327_v45 }
 0x6b3   :  { %2811 = vmatpush1.bf16.msra.mxu0 %v6312_v33  ;;  %2852 = vmatpush1.bf16.msra.mxu1 %v6315_v16  ;;  %v6330_v33 = vld [vmem:[#allocation4 + $0xe8] sm:$0xff]  ;;  %v6333_v16 = vld [vmem:[#allocation4 + $0xf8] sm:$0xff] }
 0x6b4   :  { %2812 = vmatprep.subr.bf16.mxu0 %v6318_v12  ;;  %2853 = vmatprep.subr.bf16.mxu1 %v6321_v23  ;;  %7237 = vst [vmem:[#allocation74_spill] sm:$0xff] %v6330_v33  ;;  %7238 = vst [vmem:[#allocation75_spill] sm:$0xff] %v6333_v16  ;;  %v6336_v12 = vld [vmem:[#allocation4 + $0xe0] sm:$0xff]  ;;  %v6339_v23 = vld [vmem:[#allocation4 + $0xf0] sm:$0xff] }
 0x6b5   :  { %7239 = vst [vmem:[#allocation76_spill] sm:$0xff] %v6336_v12  ;;  %7240 = vst [vmem:[#allocation77_spill] sm:$0xff] %v6339_v23 }
 0x6b7   :  { %2813 = vmatpush1.bf16.msra.mxu0 %v6324_v28  ;;  %2854 = vmatpush1.bf16.msra.mxu1 %v6327_v45  ;;  %v7241_v28 = vld [vmem:[#allocation25_spill] sm:$0xff] }
 0x6b8   :  { %2814 = vmatprep.subr.bf16.mxu0 %v6330_v33  ;;  %2855 = vmatprep.subr.bf16.mxu1 %v6333_v16 }
 0x6bb   :  { %2815 = vmatpush1.bf16.msra.mxu0 %v6336_v12  ;;  %2856 = vmatpush1.bf16.msra.mxu1 %v6339_v23 }
 0x6bc   :  { %2918 = vmatprep.subr.bf16.mxu0 %v6088_v25  ;;  %2959 = vmatprep.subr.bf16.mxu1 %v7241_v28 }
 0x731   :  { %v2508_v45 = vpop.f32.mrb[40].mxu0  ;;  %v2549_v4 = vpop.f32.mrb[36].mxu1 }
 0x732   :  { %v2510_v42 = vpop.f32.mrb[41].mxu0  ;;  %v2551_v33 = vpop.f32.mrb[37].mxu1 }
 0x733   :  { %v2512_v21 = vpop.f32.mrb[42].mxu0  ;;  %v2553_v57 = vpop.f32.mrb[38].mxu1 }
 0x734   :  { %v2513_v55 = vpop.f32.mrb[43].mxu0  ;;  %v2554_v16 = vpop.f32.mrb[39].mxu1 }
 0x735   :  { %v2885_v55 = vld [vmem:[#allocation5 + $0x38] sm:$0x3] }
 0x751   :  { %v2641_v47 = vpop.f32.mrb[44].mxu0  ;;  %v2682_v12 = vpop.f32.mrb[40].mxu1 }
 0x752   :  { %v2886_v37 = vadd.f32 %v2882_v54, %v2641_v47  ;;  %v2643_v36 = vpop.f32.mrb[45].mxu0  ;;  %v2684_v34 = vpop.f32.mrb[41].mxu1  ;;  %v2888_v57 = vadd.f32 %v2884_v61, %v2682_v12 }
 0x753   :  { %v2887_v23 = vadd.f32 %v2883_v49, %v2643_v36  ;;  %v2645_v13 = vpop.f32.mrb[46].mxu0  ;;  %v2686_v25 = vpop.f32.mrb[42].mxu1  ;;  %v2889_v16 = vadd.f32 %v2885_v55, %v2684_v34 }
 0x754   :  { %v4161_v43 = vmul.f32 -1.442695, %v2886_v37  ;;  %v2646_v28 = vpop.f32.mrb[47].mxu0  ;;  %v2687_v32 = vpop.f32.mrb[43].mxu1  ;;  %v4163_v21 = vmul.f32 -1.442695, %v2888_v57 }
 0x755   :  { %v4162_v41 = vmul.f32 -1.442695, %v2887_v23  ;;  %v2910_v23 = vrot.slane %v6095_v51, 6 }
 0x756   :  { %4380 = vpow2.f32 %v4161_v43 }
 0x757   :  { %4382 = vpow2.f32 %v4162_v41 }
 0x758   :  { %4384 = vtanh.f32 %v2889_v16 }
 0x759   :  { %4386 = vpow2.f32 %v4163_v21 }
 0x760   :  { %v4381_v39 = vpop.eup %4380 }
 0x761   :  { %v2899_v26 = vadd.f32 1.0, %v4381_v39  ;;  %v4383_v47 = vpop.eup %4382 }
 0x762   :  { %v2900_v36 = vadd.f32 1.0, %v4383_v47  ;;  %v4385_v49 = vpop.eup %4384 }
 0x763   :  { %4388 = vrcp.f32 %v2899_v26  ;;  %v4387_v37 = vpop.eup %4386 }
 0x764   :  { %4390 = vrcp.f32 %v2900_v36  ;;  %v2901_v41 = vadd.f32 1.0, %v4387_v37 }
 0x766   :  { %4392 = vrcp.f32 %v2901_v41 }
 0x76d   :  { %v4389_v54 = vpop.eup %4388 }
 0x76e   :  { %v2913_v43 = vmul.f32 %v4389_v54, %v4385_v49  ;;  %v4391_v28 = vpop.eup %4390 }
 0x76f   :  { %v2912_v25 = vmul.f32 %v4391_v28, %v2910_v23 }
 0x771   :  { %v2723_v61 = vpop.f32.mrb[48].mxu0  ;;  %v2764_v34 = vpop.f32.mrb[44].mxu1  ;;  %v6345_v32 = vadd.f32 %v2913_v43, %v2912_v25 }
 0x772   :  { %v2724_v39 = vadd.f32 %v2723_v61, %v2508_v45  ;;  %v2765_v13 = vadd.f32 %v2764_v34, %v2549_v4  ;;  %v2725_v12 = vpop.f32.mrb[49].mxu0  ;;  %v2766_v57 = vpop.f32.mrb[45].mxu1 }
 0x773   :  { %v2726_v26 = vadd.f32 %v2725_v12, %v2510_v42  ;;  %v2767_v55 = vadd.f32 %v2766_v57, %v2551_v33  ;;  %v2727_v16 = vpop.f32.mrb[50].mxu0  ;;  %v2768_v21 = vpop.f32.mrb[46].mxu1  ;;  %4394 = vtanh.f32 %v6345_v32 }
 0x774   :  { %v2771_v51 = vadd.f32 %v2724_v39, %v5787_v3  ;;  %v2728_v47 = vpop.f32.mrb[51].mxu0  ;;  %v2769_v36 = vpop.f32.mrb[47].mxu1  ;;  %v2773_v45 = vadd.f32 %v2765_v13, %v5799_v44 }
 0x775   :  { %v2772_v49 = vadd.f32 %v2726_v26, %v5791_v1  ;;  %v4393_v4 = vpop.eup %4392  ;;  %v2774_v33 = vadd.f32 %v2767_v55, %v5805_v2 }
 0x776   :  { %v4158_v37 = vmul.f32 -1.442695, %v2771_v51  ;;  %v4160_v43 = vmul.f32 -1.442695, %v2773_v45  ;;  %v7258_v45 = vld [vmem:[#allocation39_spill] sm:$0xff] }
 0x777   :  { %v4159_v54 = vmul.f32 -1.442695, %v2772_v49  ;;  %v7255_v49 = vld [vmem:[#allocation31_spill] sm:$0xff] }
 0x778   :  { %4396 = vpow2.f32 %v4158_v37  ;;  %v7256_v37 = vld [vmem:[#allocation38_spill] sm:$0xff] }
 0x779   :  { %4398 = vpow2.f32 %v4159_v54  ;;  %v7257_v54 = vld [vmem:[#allocation18_spill] sm:$0xff] }
 0x77a   :  { %4400 = vtanh.f32 %v2774_v33  ;;  %v7261_v33 = vld [vmem:[#allocation19_spill] sm:$0xff] }
 0x77b   :  { %4402 = vpow2.f32 %v4160_v43  ;;  %v7263_v43 = vld [vmem:[#allocation33_spill] sm:$0xff] }
 0x77d   :  { %v4395_v23 = vpop.eup %4394 }
 0x77e   :  { %v2916_v42 = vmul.f32 %v4395_v23, %v4393_v4  ;;  %v7259_v4 = vld [vmem:[#allocation32_spill] sm:$0xff] }
 0x77f   :  { %v7260_v23 = vld [vmem:[#allocation40_spill] sm:$0xff] }
 0x782   :  { %v4397_v28 = vpop.eup %4396 }
 0x783   :  { %v2784_v41 = vadd.f32 1.0, %v4397_v28  ;;  %v4399_v25 = vpop.eup %4398  ;;  %v7264_v28 = vld [vmem:[#allocation42_spill] sm:$0xff] }
 0x784   :  { %v2785_v61 = vadd.f32 1.0, %v4399_v25  ;;  %v4401_v34 = vpop.eup %4400  ;;  %v7266_v25 = vld [vmem:[#allocation43_spill] sm:$0xff] }
 0x785   :  { %4404 = vrcp.f32 %v2784_v41  ;;  %v4403_v39 = vpop.eup %4402  ;;  %v7265_v41 = vld [vmem:[#allocation21_spill] sm:$0xff] }
 0x786   :  { %4406 = vrcp.f32 %v2785_v61  ;;  %v2786_v13 = vadd.f32 1.0, %v4403_v39  ;;  %v7267_v61 = vld [vmem:[#allocation34_spill] sm:$0xff] }
 0x787   :  { %v7269_v39 = vld [vmem:[#allocation22_spill] sm:$0xff] }
 0x788   :  { %4408 = vrcp.f32 %v2786_v13  ;;  %v7273_v13 = vld [vmem:[#allocation47_spill] sm:$0xff] }
 0x78f   :  { %v4405_v12 = vpop.eup %4404 }
 0x790   :  { %v2795_v57 = vmul.f32 %v4405_v12, %v4401_v34  ;;  %v4407_v26 = vpop.eup %4406  ;;  %v7268_v34 = vld [vmem:[#allocation44_spill] sm:$0xff]  ;;  %v7270_v12 = vld [vmem:[#allocation45_spill] sm:$0xff] }
 0x791   :  { %v2794_v16 = vmul.f32 %v4407_v26, %v6105_v19  ;;  %v7254_v19 = vld [vmem:[#allocation37_spill] sm:$0xff]  ;;  %v7272_v26 = vld [vmem:[#allocation46_spill] sm:$0xff] }
 0x792   :  { %v4409_v55 = vpop.eup %4408 }
 0x793   :  { %v6353_v21 = vadd.f32 %v2795_v57, %v2794_v16  ;;  %v7271_v57 = vld [vmem:[#allocation23_spill] sm:$0xff]  ;;  %v7274_v16 = vld [vmem:[#allocation48_spill] sm:$0xff] }
 0x795   :  { %4410 = vtanh.f32 %v6353_v21 }
 0x79f   :  { %v4411_v51 = vpop.eup %4410 }
 0x7a0   :  { %v2798_v47 = vmul.f32 %v4411_v51, %v4409_v55  ;;  %v7275_v55 = vld [vmem:[#allocation49_spill] sm:$0xff]  ;;  %v7276_v51 = vld [vmem:[#allocation50_spill] sm:$0xff] }
 0x7a2   :  { %v2799_v36 = vpack.c.bf16 %v2798_v47, %v2798_v47  ;;  %v7277_v47 = vld [vmem:[#allocation51_spill] sm:$0xff] }
 0x7a4   :  { %2833 = vmatmul.mubr.bf16.vlgmr.msra.gmra.mrb[52].mxu0 %v2799_v36  ;;  %2874 = vmatmul.mubr.bf16.vlgmr.msra.gmra.mrb[48].mxu1 %v2799_v36  ;;  %v7278_v36 = vld [vmem:[#allocation52_spill] sm:$0xff] }
 0x7a5   :  { %2919 = vmatpush1.bf16.msra.mxu0 %v5930_v27  ;;  %2960 = vmatpush1.bf16.msra.mxu1 %v6109_v46  ;;  %v2917_v27 = vpack.c.bf16 %v2916_v42, %v2916_v42  ;;  %v7262_v42 = vld [vmem:[#allocation41_spill] sm:$0xff] }
 0x7a6   :  { %2920 = vmatprep.subr.bf16.mxu0 %v5934_v30  ;;  %2961 = vmatprep.subr.bf16.mxu1 %v6113_v0  ;;  %v7242_v30 = vld [vmem:[#allocation26_spill] sm:$0xff] }
 0x7a7   :  { %2950 = vmatprep.mubr.bf16.mxu0 %v7045_v60  ;;  %2991 = vmatprep.mubr.bf16.mxu1 %v7045_v60 }
 0x7a9   :  { %2921 = vmatpush1.bf16.msra.mxu0 %v5940_v9  ;;  %2962 = vmatpush1.bf16.msra.mxu1 %v6119_v35  ;;  %v7243_v9 = vld [vmem:[#allocation28_spill] sm:$0xff] }
 0x7aa   :  { %2922 = vmatprep.subr.bf16.mxu0 %v5944_v5  ;;  %2963 = vmatprep.subr.bf16.mxu1 %v6123_v10  ;;  %v7244_v5 = vld [vmem:[#allocation27_spill] sm:$0xff] }
 0x7ad   :  { %2923 = vmatpush1.bf16.msra.mxu0 %v5948_v7  ;;  %2964 = vmatpush1.bf16.msra.mxu1 %v6127_v38  ;;  %v7245_v7 = vld [vmem:[#allocation15_spill] sm:$0xff] }
 0x7ae   :  { %2924 = vmatprep.subr.bf16.mxu0 %v5952_v8  ;;  %2965 = vmatprep.subr.bf16.mxu1 %v6131_v58  ;;  %v7246_v8 = vld [vmem:[#allocation14_spill] sm:$0xff] }
 0x7b1   :  { %2925 = vmatpush1.bf16.msra.mxu0 %v5956_v40  ;;  %2966 = vmatpush1.bf16.msra.mxu1 %v6135_v62  ;;  %v7247_v40 = vld [vmem:[#allocation29_spill] sm:$0xff] }
 0x7b2   :  { %2926 = vmatprep.subr.bf16.mxu0 %v5960_v14  ;;  %2967 = vmatprep.subr.bf16.mxu1 %v6139_v52  ;;  %v7248_v14 = vld [vmem:[#allocation20_spill] sm:$0xff] }
 0x7b5   :  { %2927 = vmatpush1.bf16.msra.mxu0 %v5964_v15  ;;  %2968 = vmatpush1.bf16.msra.mxu1 %v6143_v6  ;;  %v7249_v15 = vld [vmem:[#allocation16_spill] sm:$0xff] }
 0x7b6   :  { %2928 = vmatprep.subr.bf16.mxu0 %v5968_v17  ;;  %2969 = vmatprep.subr.bf16.mxu1 %v6147_v53  ;;  %v7250_v17 = vld [vmem:[#allocation35_spill] sm:$0xff] }
 0x7b9   :  { %2929 = vmatpush1.bf16.msra.mxu0 %v5972_v18  ;;  %2970 = vmatpush1.bf16.msra.mxu1 %v6151_v48  ;;  %v7251_v18 = vld [vmem:[#allocation30_spill] sm:$0xff] }
 0x7ba   :  { %2930 = vmatprep.subr.bf16.mxu0 %v5976_v22  ;;  %2971 = vmatprep.subr.bf16.mxu1 %v6155_v59  ;;  %v7252_v22 = vld [vmem:[#allocation36_spill] sm:$0xff] }
 0x7bd   :  { %2931 = vmatpush1.bf16.msra.mxu0 %v6158_v50  ;;  %2972 = vmatpush1.bf16.msra.mxu1 %v6161_v63 }
 0x7be   :  { %2932 = vmatprep.subr.bf16.mxu0 %v6164_v11  ;;  %2973 = vmatprep.subr.bf16.mxu1 %v6167_v24 }
 0x7c1   :  { %2933 = vmatpush1.bf16.msra.mxu0 %v6172_v29  ;;  %2974 = vmatpush1.bf16.msra.mxu1 %v6175_v56 }
 0x7c2   :  { %3000 = vmatprep.subr.bf16.mxu0 %v6178_v20  ;;  %3041 = vmatprep.subr.bf16.mxu1 %v5989_v31  ;;  %v7253_v31 = vld [vmem:[#allocation17_spill] sm:$0xff] }
 0x7c4   :  { %2951 = vmatmul.mubr.bf16.vlgmr.msra.gmra.mrb[56].mxu0 %v2917_v27  ;;  %2992 = vmatmul.mubr.bf16.vlgmr.msra.gmra.mrb[52].mxu1 %v2917_v27 }
 0x7c5   :  { %3001 = vmatpush1.bf16.msra.mxu0 %v7242_v30  ;;  %3042 = vmatpush1.bf16.msra.mxu1 %v7243_v9  ;;  %v7279_v9 = vld [vmem:[#allocation53_spill] sm:$0xff] }
 0x7c6   :  { %3002 = vmatprep.subr.bf16.mxu0 %v7244_v5  ;;  %3043 = vmatprep.subr.bf16.mxu1 %v7245_v7  ;;  %v7280_v7 = vld [vmem:[#allocation54_spill] sm:$0xff] }
 0x7c7   :  { %3032 = vmatprep.mubr.bf16.mxu0 %v7045_v60  ;;  %3073 = vmatprep.mubr.bf16.mxu1 %v7045_v60 }
 0x7c9   :  { %3003 = vmatpush1.bf16.msra.mxu0 %v7246_v8  ;;  %3044 = vmatpush1.bf16.msra.mxu1 %v7247_v40  ;;  %v7281_v40 = vld [vmem:[#allocation55_spill] sm:$0xff] }
 0x7ca   :  { %3004 = vmatprep.subr.bf16.mxu0 %v7248_v14  ;;  %3045 = vmatprep.subr.bf16.mxu1 %v7249_v15  ;;  %v7283_v15 = vld [vmem:[#allocation57_spill] sm:$0xff] }
 0x7cd   :  { %3005 = vmatpush1.bf16.msra.mxu0 %v7250_v17  ;;  %3046 = vmatpush1.bf16.msra.mxu1 %v7251_v18  ;;  %v7284_v18 = vld [vmem:[#allocation58_spill] sm:$0xff] }
 0x7ce   :  { %3006 = vmatprep.subr.bf16.mxu0 %v7252_v22  ;;  %3047 = vmatprep.subr.bf16.mxu1 %v7253_v31  ;;  %v7285_v31 = vld [vmem:[#allocation59_spill] sm:$0xff] }
 0x7d1   :  { %3007 = vmatpush1.bf16.msra.mxu0 %v7254_v19  ;;  %3048 = vmatpush1.bf16.msra.mxu1 %v7255_v49  ;;  %v7286_v49 = vld [vmem:[#allocation60_spill] sm:$0xff] }
 0x7d2   :  { %3008 = vmatprep.subr.bf16.mxu0 %v7256_v37  ;;  %3049 = vmatprep.subr.bf16.mxu1 %v7257_v54  ;;  %v7287_v54 = vld [vmem:[#allocation61_spill] sm:$0xff] }
 0x7d5   :  { %3009 = vmatpush1.bf16.msra.mxu0 %v7258_v45  ;;  %3050 = vmatpush1.bf16.msra.mxu1 %v7259_v4  ;;  %v7288_v4 = vld [vmem:[#allocation62_spill] sm:$0xff] }
 0x7d6   :  { %3010 = vmatprep.subr.bf16.mxu0 %v7260_v23  ;;  %3051 = vmatprep.subr.bf16.mxu1 %v7261_v33  ;;  %v7289_v33 = vld [vmem:[#allocation63_spill] sm:$0xff] }
 0x7d9   :  { %3011 = vmatpush1.bf16.msra.mxu0 %v7262_v42  ;;  %3052 = vmatpush1.bf16.msra.mxu1 %v7263_v43  ;;  %v7290_v43 = vld [vmem:[#allocation64_spill] sm:$0xff] }
 0x7da   :  { %3012 = vmatprep.subr.bf16.mxu0 %v7264_v28  ;;  %3053 = vmatprep.subr.bf16.mxu1 %v7265_v41  ;;  %v7291_v41 = vld [vmem:[#allocation65_spill] sm:$0xff] }
 0x7dd   :  { %3013 = vmatpush1.bf16.msra.mxu0 %v7266_v25  ;;  %3054 = vmatpush1.bf16.msra.mxu1 %v7267_v61  ;;  %v7292_v61 = vld [vmem:[#allocation66_spill] sm:$0xff] }
 0x7de   :  { %3014 = vmatprep.subr.bf16.mxu0 %v7268_v34  ;;  %3055 = vmatprep.subr.bf16.mxu1 %v7269_v39  ;;  %v7293_v39 = vld [vmem:[#allocation67_spill] sm:$0xff]  ;;  %v3196_v34 = vld [vmem:[#allocation5 + $0x38] sm:$0xc] }
 0x7e1   :  { %3015 = vmatpush1.bf16.msra.mxu0 %v7270_v12  ;;  %3056 = vmatpush1.bf16.msra.mxu1 %v7271_v57  ;;  %v7294_v57 = vld [vmem:[#allocation68_spill] sm:$0xff] }
 0x7e2   :  { %3111 = vmatprep.subr.bf16.mxu0 %v7272_v26  ;;  %3152 = vmatprep.subr.bf16.mxu1 %v7273_v13 }
 0x7e4   :  { %3033 = vmatmul.mubr.bf16.vlgmr.msra.gmra.mrb[60].mxu0 %v2917_v27  ;;  %3074 = vmatmul.mubr.bf16.vlgmr.msra.gmra.mrb[56].mxu1 %v2917_v27  ;;  %v7282_v27 = vld [vmem:[#allocation56_spill] sm:$0xff] }
 0x7e5   :  { %3112 = vmatpush1.bf16.msra.mxu0 %v7274_v16  ;;  %3153 = vmatpush1.bf16.msra.mxu1 %v7275_v55 }
 0x7e6   :  { %3113 = vmatprep.subr.bf16.mxu0 %v7276_v51  ;;  %3154 = vmatprep.subr.bf16.mxu1 %v7277_v47 }
 0x7e7   :  { %3143 = vmatprep.mubr.bf16.mxu0 %v7045_v60  ;;  %3184 = vmatprep.mubr.bf16.mxu1 %v7045_v60 }
 0x7e9   :  { %3114 = vmatpush1.bf16.msra.mxu0 %v7278_v36  ;;  %3155 = vmatpush1.bf16.msra.mxu1 %v7279_v9 }
 0x7ea   :  { %3115 = vmatprep.subr.bf16.mxu0 %v7280_v7  ;;  %3156 = vmatprep.subr.bf16.mxu1 %v7281_v40 }
 0x7ed   :  { %3116 = vmatpush1.bf16.msra.mxu0 %v7282_v27  ;;  %3157 = vmatpush1.bf16.msra.mxu1 %v7283_v15 }
 0x7ee   :  { %3117 = vmatprep.subr.bf16.mxu0 %v7284_v18  ;;  %3158 = vmatprep.subr.bf16.mxu1 %v7285_v31  ;;  %v7295_v18 = vld [vmem:[#allocation69_spill] sm:$0xff]  ;;  %v7296_v31 = vld [vmem:[#allocation70_spill] sm:$0xff] }
 0x7f1   :  { %3118 = vmatpush1.bf16.msra.mxu0 %v7286_v49  ;;  %3159 = vmatpush1.bf16.msra.mxu1 %v7287_v54  ;;  %v7297_v49 = vld [vmem:[#allocation71_spill] sm:$0xff]  ;;  %v7298_v54 = vld [vmem:[#allocation72_spill] sm:$0xff] }
 0x7f2   :  { %3119 = vmatprep.subr.bf16.mxu0 %v7288_v4  ;;  %3160 = vmatprep.subr.bf16.mxu1 %v7289_v33  ;;  %v7299_v4 = vld [vmem:[#allocation73_spill] sm:$0xff]  ;;  %v7300_v33 = vld [vmem:[#allocation74_spill] sm:$0xff] }
 0x7f5   :  { %3120 = vmatpush1.bf16.msra.mxu0 %v7290_v43  ;;  %3161 = vmatpush1.bf16.msra.mxu1 %v7291_v41  ;;  %v7301_v43 = vld [vmem:[#allocation75_spill] sm:$0xff]  ;;  %v7302_v41 = vld [vmem:[#allocation76_spill] sm:$0xff] }
 0x7f6   :  { %3121 = vmatprep.subr.bf16.mxu0 %v7292_v61  ;;  %3162 = vmatprep.subr.bf16.mxu1 %v7293_v39  ;;  %v7303_v61 = vld [vmem:[#allocation77_spill] sm:$0xff]  ;;  %v7304_v39 = vld [vmem:[#allocation24_spill] sm:$0xff] }
 0x7f9   :  { %3122 = vmatpush1.bf16.msra.mxu0 %v7294_v57  ;;  %3163 = vmatpush1.bf16.msra.mxu1 %v7295_v18  ;;  %v7305_v57 = vld [vmem:[#allocation25_spill] sm:$0xff] }
 0x7fa   :  { %3123 = vmatprep.subr.bf16.mxu0 %v7296_v31  ;;  %3164 = vmatprep.subr.bf16.mxu1 %v7297_v49 }
 0x7fd   :  { %3124 = vmatpush1.bf16.msra.mxu0 %v7298_v54  ;;  %3165 = vmatpush1.bf16.msra.mxu1 %v7299_v4 }
 0x7fe   :  { %3125 = vmatprep.subr.bf16.mxu0 %v7300_v33  ;;  %3166 = vmatprep.subr.bf16.mxu1 %v7301_v43  ;;  %v3193_v33 = vld [vmem:[#allocation5 + $0x20] sm:$0xc] }
 0x801   :  { %3126 = vmatpush1.bf16.msra.mxu0 %v7302_v41  ;;  %3167 = vmatpush1.bf16.msra.mxu1 %v7303_v61  ;;  %v3194_v41 = vld [vmem:[#allocation5 + $0x28] sm:$0xc] }
 0x802   :  { %3244 = vmatprep.subr.bf16.mxu0 %v7304_v39  ;;  %3285 = vmatprep.subr.bf16.mxu1 %v7305_v57 }
 0x877   :  { %v2834_v18 = vpop.f32.mrb[52].mxu0  ;;  %v2875_v31 = vpop.f32.mrb[48].mxu1 }
 0x878   :  { %v2836_v15 = vpop.f32.mrb[53].mxu0  ;;  %v2877_v49 = vpop.f32.mrb[49].mxu1 }
 0x879   :  { %v2838_v27 = vpop.f32.mrb[54].mxu0  ;;  %v2879_v54 = vpop.f32.mrb[50].mxu1 }
 0x87a   :  { %v2839_v40 = vpop.f32.mrb[55].mxu0  ;;  %v2880_v4 = vpop.f32.mrb[51].mxu1 }
 0x87b   :  { %v3195_v40 = vld [vmem:[#allocation5 + $0x30] sm:$0xc] }
 0x897   :  { %v2952_v7 = vpop.f32.mrb[56].mxu0  ;;  %v2993_v9 = vpop.f32.mrb[52].mxu1 }
 0x898   :  { %v3201_v43 = vrot.slane %v2952_v7, 6  ;;  %v2954_v36 = vpop.f32.mrb[57].mxu0  ;;  %v2995_v47 = vpop.f32.mrb[53].mxu1  ;;  %v3203_v27 = vrot.slane %v2993_v9, 6 }
 0x899   :  { %v3202_v61 = vrot.slane %v2954_v36, 6  ;;  %v2956_v51 = vpop.f32.mrb[58].mxu0  ;;  %v2997_v39 = vpop.f32.mrb[54].mxu1  ;;  %v3204_v54 = vrot.slane %v2995_v47, 6 }
 0x89a   :  { %v3209_v55 = vadd.f32 %v3201_v43, %v3193_v33  ;;  %v2957_v57 = vpop.f32.mrb[59].mxu0  ;;  %v2998_v16 = vpop.f32.mrb[55].mxu1  ;;  %v3211_v4 = vadd.f32 %v3203_v27, %v3195_v40 }
 0x89b   :  { %v3210_v13 = vadd.f32 %v3202_v61, %v3194_v41  ;;  %v3212_v7 = vadd.f32 %v3204_v54, %v3196_v34 }
 0x89c   :  { %v4167_v26 = vmul.f32 -1.442695, %v3209_v55  ;;  %v4169_v25 = vmul.f32 -1.442695, %v3211_v4 }
 0x89d   :  { %v4168_v12 = vmul.f32 -1.442695, %v3210_v13 }
 0x89e   :  { %4412 = vpow2.f32 %v4167_v26  ;;  %v3233_v26 = vrot.slane %v6345_v32, 6 }
 0x89f   :  { %4414 = vpow2.f32 %v4168_v12 }
 0x8a0   :  { %4416 = vtanh.f32 %v3212_v7 }
 0x8a1   :  { %4418 = vpow2.f32 %v4169_v25 }
 0x8a8   :  { %v4413_v28 = vpop.eup %4412 }
 0x8a9   :  { %v3222_v42 = vadd.f32 1.0, %v4413_v28  ;;  %v4415_v51 = vpop.eup %4414 }
 0x8aa   :  { %v3223_v36 = vadd.f32 1.0, %v4415_v51  ;;  %v4417_v16 = vpop.eup %4416 }
 0x8ab   :  { %4420 = vrcp.f32 %v3222_v42  ;;  %v4419_v55 = vpop.eup %4418 }
 0x8ac   :  { %4422 = vrcp.f32 %v3223_v36  ;;  %v3224_v47 = vadd.f32 1.0, %v4419_v55 }
 0x8ae   :  { %4424 = vrcp.f32 %v3224_v47 }
 0x8b5   :  { %v4421_v13 = vpop.eup %4420 }
 0x8b6   :  { %v3236_v9 = vmul.f32 %v4421_v13, %v4417_v16  ;;  %v4423_v12 = vpop.eup %4422 }
 0x8b7   :  { %v3034_v33 = vpop.f32.mrb[60].mxu0  ;;  %v3075_v43 = vpop.f32.mrb[56].mxu1  ;;  %v3235_v34 = vmul.f32 %v4423_v12, %v3233_v26 }
 0x8b8   :  { %v3035_v41 = vadd.f32 %v3034_v33, %v2834_v18  ;;  %v3076_v61 = vadd.f32 %v3075_v43, %v2875_v31  ;;  %v3036_v28 = vpop.f32.mrb[61].mxu0  ;;  %v3077_v39 = vpop.f32.mrb[57].mxu1 }
 0x8b9   :  { %v3037_v57 = vadd.f32 %v3036_v28, %v2836_v15  ;;  %v3078_v25 = vadd.f32 %v3077_v39, %v2877_v49  ;;  %v3038_v42 = vpop.f32.mrb[62].mxu0  ;;  %v3079_v27 = vpop.f32.mrb[58].mxu1  ;;  %v6459_v40 = vadd.f32 %v3236_v9, %v3235_v34 }
 0x8ba   :  { %v3082_v54 = vadd.f32 %v3035_v41, %v5787_v3  ;;  %v3039_v4 = vpop.f32.mrb[63].mxu0  ;;  %v3080_v32 = vpop.f32.mrb[59].mxu1  ;;  %v3084_v15 = vadd.f32 %v3076_v61, %v5799_v44 }
 0x8bb   :  { %v3083_v7 = vadd.f32 %v3037_v57, %v5791_v1  ;;  %4426 = vtanh.f32 %v6459_v40  ;;  %v4425_v31 = vpop.eup %4424  ;;  %v3085_v49 = vadd.f32 %v3078_v25, %v5805_v2  ;;  %v6476_v4 = vld [vmem:[#allocation3 + $0x28] sm:$0xff] }
 0x8bc   :  { %v4164_v51 = vmul.f32 -1.442695, %v3082_v54  ;;  %v4166_v16 = vmul.f32 -1.442695, %v3084_v15  ;;  %v6472_v54 = vld [vmem:[#allocation3] sm:$0xff]  ;;  %v6486_v32 = vld [vmem:[#allocation3 + $0x48] sm:$0xff] }
 0x8bd   :  { %v4165_v18 = vmul.f32 -1.442695, %v3083_v7  ;;  %v6498_v7 = vld [vmem:[#allocation3 + $0x60] sm:$0xff]  ;;  %v7313_v15 = vld [vmem:[#allocation47_spill] sm:$0xff] }
 0x8be   :  { %4428 = vpow2.f32 %v4164_v51  ;;  %v6593_v51 = vld [vmem:[#allocation2 + $0xf0] sm:$0xff] }
 0x8bf   :  { %4430 = vpow2.f32 %v4165_v18  ;;  %7311 = vst [vmem:[#allocation26_spill] sm:$0xff] %v6593_v51  ;;  %v7312_v18 = vld [vmem:[#allocation46_spill] sm:$0xff] }
 0x8c0   :  { %4432 = vtanh.f32 %v3085_v49  ;;  %v7315_v49 = vld [vmem:[#allocation49_spill] sm:$0xff] }
 0x8c1   :  { %4434 = vpow2.f32 %v4166_v16  ;;  %v7317_v16 = vld [vmem:[#allocation51_spill] sm:$0xff] }
 0x8c5   :  { %v4427_v36 = vpop.eup %4426 }
 0x8c6   :  { %v6466_v55 = vmul.f32 %v4427_v36, %v4425_v31  ;;  %v7314_v31 = vld [vmem:[#allocation48_spill] sm:$0xff]  ;;  %v7316_v36 = vld [vmem:[#allocation50_spill] sm:$0xff] }
 0x8c8   :  { %v4429_v13 = vpop.eup %4428 }
 0x8c9   :  { %v3095_v26 = vadd.f32 1.0, %v4429_v13  ;;  %v4431_v9 = vpop.eup %4430  ;;  %v7319_v13 = vld [vmem:[#allocation53_spill] sm:$0xff] }
 0x8ca   :  { %v3096_v12 = vadd.f32 1.0, %v4431_v9  ;;  %v4433_v47 = vpop.eup %4432  ;;  %v7321_v9 = vld [vmem:[#allocation55_spill] sm:$0xff] }
 0x8cb   :  { %4436 = vrcp.f32 %v3095_v26  ;;  %v4435_v33 = vpop.eup %4434  ;;  %v7320_v26 = vld [vmem:[#allocation54_spill] sm:$0xff] }
 0x8cc   :  { %4438 = vrcp.f32 %v3096_v12  ;;  %v3097_v61 = vadd.f32 1.0, %v4435_v33  ;;  %v7322_v12 = vld [vmem:[#allocation56_spill] sm:$0xff]  ;;  %v7324_v33 = vld [vmem:[#allocation58_spill] sm:$0xff] }
 0x8ce   :  { %4440 = vrcp.f32 %v3097_v61  ;;  %v7328_v61 = vld [vmem:[#allocation62_spill] sm:$0xff] }
 0x8d5   :  { %v4437_v43 = vpop.eup %4436 }
 0x8d6   :  { %v3106_v34 = vmul.f32 %v4437_v43, %v4433_v47  ;;  %v4439_v41 = vpop.eup %4438  ;;  %v7323_v47 = vld [vmem:[#allocation57_spill] sm:$0xff]  ;;  %v7325_v43 = vld [vmem:[#allocation59_spill] sm:$0xff] }
 0x8d7   :  { %v3105_v28 = vmul.f32 %v4439_v41, %v6353_v21  ;;  %v6482_v21 = vld [vmem:[#allocation3 + $0x20] sm:$0xff] }
 0x8d8   :  { %v4441_v57 = vpop.eup %4440  ;;  %v7327_v41 = vld [vmem:[#allocation61_spill] sm:$0xff] }
 0x8d9   :  { %v6469_v39 = vadd.f32 %v3106_v34, %v3105_v28  ;;  %v7326_v34 = vld [vmem:[#allocation60_spill] sm:$0xff]  ;;  %v7329_v28 = vld [vmem:[#allocation63_spill] sm:$0xff] }
 0x8db   :  { %4442 = vtanh.f32 %v6469_v39 }
 0x8e5   :  { %v4443_v25 = vpop.eup %4442 }
 0x8e6   :  { %v3109_v42 = vmul.f32 %v4443_v25, %v4441_v57  ;;  %v7330_v57 = vld [vmem:[#allocation64_spill] sm:$0xff]  ;;  %v7331_v25 = vld [vmem:[#allocation65_spill] sm:$0xff] }
 0x8e8   :  { %v3110_v27 = vpack.c.bf16 %v3109_v42, %v3109_v42  ;;  %v7332_v42 = vld [vmem:[#allocation66_spill] sm:$0xff] }
 0x8ea   :  { %3144 = vmatmul.mubr.bf16.vlgmr.msra.gmra.mrb[64].mxu0 %v3110_v27  ;;  %3185 = vmatmul.mubr.bf16.vlgmr.msra.gmra.mrb[60].mxu1 %v3110_v27  ;;  %v7333_v27 = vld [vmem:[#allocation67_spill] sm:$0xff] }
 0x8eb   :  { %3245 = vmatpush1.bf16.msra.mxu0 %v6472_v54  ;;  %3286 = vmatpush1.bf16.msra.mxu1 %v6109_v46  ;;  %v6490_v46 = vld [vmem:[#allocation3 + $0x40] sm:$0xff] }
 0x8ec   :  { %3246 = vmatprep.subr.bf16.mxu0 %v6476_v4  ;;  %3287 = vmatprep.subr.bf16.mxu1 %v6113_v0  ;;  %v6494_v0 = vld [vmem:[#allocation3 + $0x68] sm:$0xff] }
 0x8ed   :  { %3276 = vmatprep.mubr.bf16.mxu0 %v7045_v60  ;;  %3317 = vmatprep.mubr.bf16.mxu1 %v7045_v60 }
 0x8ef   :  { %3247 = vmatpush1.bf16.msra.mxu0 %v6482_v21  ;;  %3288 = vmatpush1.bf16.msra.mxu1 %v6119_v35  ;;  %v6502_v35 = vld [vmem:[#allocation3 + $0x88] sm:$0xff] }
 0x8f0   :  { %3248 = vmatprep.subr.bf16.mxu0 %v6486_v32  ;;  %3289 = vmatprep.subr.bf16.mxu1 %v6123_v10  ;;  %v6506_v10 = vld [vmem:[#allocation3 + $0x80] sm:$0xff] }
 0x8f3   :  { %3249 = vmatpush1.bf16.msra.mxu0 %v6490_v46  ;;  %3290 = vmatpush1.bf16.msra.mxu1 %v6127_v38  ;;  %v6510_v38 = vld [vmem:[#allocation3 + $0xa8] sm:$0xff] }
 0x8f4   :  { %3250 = vmatprep.subr.bf16.mxu0 %v6494_v0  ;;  %3291 = vmatprep.subr.bf16.mxu1 %v6131_v58  ;;  %v6514_v58 = vld [vmem:[#allocation3 + $0xa0] sm:$0xff] }
 0x8f7   :  { %3251 = vmatpush1.bf16.msra.mxu0 %v6498_v7  ;;  %3292 = vmatpush1.bf16.msra.mxu1 %v6135_v62  ;;  %v6518_v62 = vld [vmem:[#allocation3 + $0xc8] sm:$0xff] }
 0x8f8   :  { %3252 = vmatprep.subr.bf16.mxu0 %v6502_v35  ;;  %3293 = vmatprep.subr.bf16.mxu1 %v6139_v52  ;;  %v3240_v52 = vpack.c.bf16 %v6466_v55, %v6466_v55  ;;  %v7318_v55 = vld [vmem:[#allocation52_spill] sm:$0xff] }
 0x8fb   :  { %3253 = vmatpush1.bf16.msra.mxu0 %v6506_v10  ;;  %3294 = vmatpush1.bf16.msra.mxu1 %v6143_v6  ;;  %v3242_v6 = vrot.slane %v3240_v52, 1  ;;  %v7334_v52 = vld [vmem:[#allocation68_spill] sm:$0xff] }
 0x8fc   :  { %3254 = vmatprep.subr.bf16.mxu0 %v6510_v38  ;;  %3295 = vmatprep.subr.bf16.mxu1 %v6147_v53  ;;  %v6531_v53 = vld [vmem:[#allocation2 + $0x18] sm:$0xff] }
 0x8ff   :  { %3255 = vmatpush1.bf16.msra.mxu0 %v6514_v58  ;;  %3296 = vmatpush1.bf16.msra.mxu1 %v6151_v48  ;;  %v6535_v48 = vld [vmem:[#allocation2 + $0x10] sm:$0xff] }
 0x900   :  { %3256 = vmatprep.subr.bf16.mxu0 %v6518_v62  ;;  %3297 = vmatprep.subr.bf16.mxu1 %v6155_v59  ;;  %v6539_v59 = vld [vmem:[#allocation2 + $0x38] sm:$0xff] }
 0x903   :  { %3257 = vmatpush1.bf16.msra.mxu0 %v6158_v50  ;;  %3298 = vmatpush1.bf16.msra.mxu1 %v6161_v63  ;;  %v6545_v50 = vld [vmem:[#allocation2 + $0x30] sm:$0xff]  ;;  %v6549_v63 = vld [vmem:[#allocation2 + $0x58] sm:$0xff] }
 0x904   :  { %3258 = vmatprep.subr.bf16.mxu0 %v6164_v11  ;;  %3299 = vmatprep.subr.bf16.mxu1 %v6167_v24  ;;  %v6553_v11 = vld [vmem:[#allocation2 + $0x50] sm:$0xff]  ;;  %v6557_v24 = vld [vmem:[#allocation2 + $0x78] sm:$0xff] }
 0x907   :  { %3259 = vmatpush1.bf16.msra.mxu0 %v6172_v29  ;;  %3300 = vmatpush1.bf16.msra.mxu1 %v6175_v56  ;;  %v6561_v29 = vld [vmem:[#allocation2 + $0x70] sm:$0xff]  ;;  %v6565_v56 = vld [vmem:[#allocation2 + $0x98] sm:$0xff] }
 0x908   :  { %3326 = vmatprep.subr.bf16.mxu0 %v6178_v20  ;;  %3367 = vmatprep.subr.bf16.mxu1 %v6531_v53  ;;  %v6569_v20 = vld [vmem:[#allocation2 + $0x90] sm:$0xff] }
 0x90a   :  { %3277 = vmatmul.mubr.bf16.vlgmr.msra.gmra.mrb[68].mxu0 %v3242_v6  ;;  %3318 = vmatmul.mubr.bf16.vlgmr.msra.gmra.mrb[64].mxu1 %v3242_v6 }
 0x90b   :  { %3327 = vmatpush1.bf16.msra.mxu0 %v7242_v30  ;;  %3368 = vmatpush1.bf16.msra.mxu1 %v6535_v48  ;;  %v6573_v30 = vld [vmem:[#allocation2 + $0xb8] sm:$0xff] }
 0x90c   :  { %3328 = vmatprep.subr.bf16.mxu0 %v7244_v5  ;;  %3369 = vmatprep.subr.bf16.mxu1 %v6539_v59  ;;  %v7306_v5 = vld [vmem:[#allocation41_spill] sm:$0xff] }
 0x90d   :  { %3358 = vmatprep.mubr.bf16.mxu0 %v7045_v60  ;;  %3399 = vmatprep.mubr.bf16.mxu1 %v7045_v60 }
 0x90f   :  { %3329 = vmatpush1.bf16.msra.mxu0 %v7246_v8  ;;  %3370 = vmatpush1.bf16.msra.mxu1 %v6545_v50  ;;  %v6577_v8 = vld [vmem:[#allocation2 + $0xb0] sm:$0xff] }
 0x910   :  { %3330 = vmatprep.subr.bf16.mxu0 %v7248_v14  ;;  %3371 = vmatprep.subr.bf16.mxu1 %v6549_v63  ;;  %v7307_v14 = vld [vmem:[#allocation42_spill] sm:$0xff] }
 0x913   :  { %3331 = vmatpush1.bf16.msra.mxu0 %v7250_v17  ;;  %3372 = vmatpush1.bf16.msra.mxu1 %v6553_v11  ;;  %v6581_v17 = vld [vmem:[#allocation2 + $0xd8] sm:$0xff] }
 0x914   :  { %3332 = vmatprep.subr.bf16.mxu0 %v7252_v22  ;;  %3373 = vmatprep.subr.bf16.mxu1 %v6557_v24  ;;  %v7308_v22 = vld [vmem:[#allocation43_spill] sm:$0xff] }
 0x917   :  { %3333 = vmatpush1.bf16.msra.mxu0 %v7254_v19  ;;  %3374 = vmatpush1.bf16.msra.mxu1 %v6561_v29  ;;  %v6585_v19 = vld [vmem:[#allocation2 + $0xd0] sm:$0xff] }
 0x918   :  { %3334 = vmatprep.subr.bf16.mxu0 %v7256_v37  ;;  %3375 = vmatprep.subr.bf16.mxu1 %v6565_v56  ;;  %v7309_v37 = vld [vmem:[#allocation44_spill] sm:$0xff] }
 0x91b   :  { %3335 = vmatpush1.bf16.msra.mxu0 %v7258_v45  ;;  %3376 = vmatpush1.bf16.msra.mxu1 %v6569_v20  ;;  %v6589_v45 = vld [vmem:[#allocation2 + $0xf8] sm:$0xff] }
 0x91c   :  { %3336 = vmatprep.subr.bf16.mxu0 %v7260_v23  ;;  %3377 = vmatprep.subr.bf16.mxu1 %v6573_v30  ;;  %v7310_v23 = vld [vmem:[#allocation45_spill] sm:$0xff] }
 0x91f   :  { %3337 = vmatpush1.bf16.msra.mxu0 %v7306_v5  ;;  %3378 = vmatpush1.bf16.msra.mxu1 %v6577_v8  ;;  %v7336_v5 = vld [vmem:[#allocation70_spill] sm:$0xff] }
 0x920   :  { %3338 = vmatprep.subr.bf16.mxu0 %v7307_v14  ;;  %3379 = vmatprep.subr.bf16.mxu1 %v6581_v17  ;;  %v7337_v14 = vld [vmem:[#allocation71_spill] sm:$0xff] }
 0x923   :  { %3339 = vmatpush1.bf16.msra.mxu0 %v7308_v22  ;;  %3380 = vmatpush1.bf16.msra.mxu1 %v6585_v19  ;;  %v7338_v22 = vld [vmem:[#allocation72_spill] sm:$0xff] }
 0x924   :  { %3340 = vmatprep.subr.bf16.mxu0 %v7309_v37  ;;  %3381 = vmatprep.subr.bf16.mxu1 %v6589_v45  ;;  %v7339_v37 = vld [vmem:[#allocation73_spill] sm:$0xff] }
 0x927   :  { %3341 = vmatpush1.bf16.msra.mxu0 %v7310_v23  ;;  %3382 = vmatpush1.bf16.msra.mxu1 %v6593_v51  ;;  %v7340_v23 = vld [vmem:[#allocation74_spill] sm:$0xff] }
 0x928   :  { %3437 = vmatprep.subr.bf16.mxu0 %v7312_v18  ;;  %3478 = vmatprep.subr.bf16.mxu1 %v7313_v15  ;;  %v7341_v18 = vld [vmem:[#allocation75_spill] sm:$0xff]  ;;  %v7342_v15 = vld [vmem:[#allocation76_spill] sm:$0xff] }
 0x92a   :  { %3359 = vmatmul.mubr.bf16.vlgmr.msra.gmra.mrb[72].mxu0 %v3242_v6  ;;  %3400 = vmatmul.mubr.bf16.vlgmr.msra.gmra.mrb[68].mxu1 %v3242_v6  ;;  %v7335_v6 = vld [vmem:[#allocation69_spill] sm:$0xff] }
 0x92b   :  { %3438 = vmatpush1.bf16.msra.mxu0 %v7314_v31  ;;  %3479 = vmatpush1.bf16.msra.mxu1 %v7315_v49  ;;  %v7343_v31 = vld [vmem:[#allocation77_spill] sm:$0xff]  ;;  %v4648_v49 = vld [vmem:[#allocation3 + $0x8] sm:$0xff] }
 0x92c   :  { %3439 = vmatprep.subr.bf16.mxu0 %v7316_v36  ;;  %3480 = vmatprep.subr.bf16.mxu1 %v7317_v16  ;;  %v4649_v36 = vld [vmem:[#allocation3 + $0x18] sm:$0xff] }
 0x92d   :  { %3469 = vmatprep.mubr.bf16.mxu0 %v7045_v60  ;;  %3510 = vmatprep.mubr.bf16.mxu1 %v7045_v60 }
 0x92f   :  { %3440 = vmatpush1.bf16.msra.mxu0 %v7318_v55  ;;  %3481 = vmatpush1.bf16.msra.mxu1 %v7319_v13 }
 0x930   :  { %3441 = vmatprep.subr.bf16.mxu0 %v7320_v26  ;;  %3482 = vmatprep.subr.bf16.mxu1 %v7321_v9 }
 0x933   :  { %3442 = vmatpush1.bf16.msra.mxu0 %v7322_v12  ;;  %3483 = vmatpush1.bf16.msra.mxu1 %v7323_v47 }
 0x934   :  { %3443 = vmatprep.subr.bf16.mxu0 %v7324_v33  ;;  %3484 = vmatprep.subr.bf16.mxu1 %v7325_v43 }
 0x937   :  { %3444 = vmatpush1.bf16.msra.mxu0 %v7326_v34  ;;  %3485 = vmatpush1.bf16.msra.mxu1 %v7327_v41  ;;  %v3519_v34 = vld [vmem:[#allocation5 + $0x20] sm:$0x30] }
 0x938   :  { %3445 = vmatprep.subr.bf16.mxu0 %v7328_v61  ;;  %3486 = vmatprep.subr.bf16.mxu1 %v7329_v28 }
 0x93b   :  { %3446 = vmatpush1.bf16.msra.mxu0 %v7330_v57  ;;  %3487 = vmatpush1.bf16.msra.mxu1 %v7331_v25  ;;  %v3520_v57 = vld [vmem:[#allocation5 + $0x28] sm:$0x30] }
 0x93c   :  { %3447 = vmatprep.subr.bf16.mxu0 %v7332_v42  ;;  %3488 = vmatprep.subr.bf16.mxu1 %v7333_v27 }
 0x93f   :  { %3448 = vmatpush1.bf16.msra.mxu0 %v7334_v52  ;;  %3489 = vmatpush1.bf16.msra.mxu1 %v7335_v6 }
 0x940   :  { %3449 = vmatprep.subr.bf16.mxu0 %v7336_v5  ;;  %3490 = vmatprep.subr.bf16.mxu1 %v7337_v14 }
 0x943   :  { %3450 = vmatpush1.bf16.msra.mxu0 %v7338_v22  ;;  %3491 = vmatpush1.bf16.msra.mxu1 %v7339_v37 }
 0x944   :  { %3451 = vmatprep.subr.bf16.mxu0 %v7340_v23  ;;  %3492 = vmatprep.subr.bf16.mxu1 %v7341_v18 }
 0x947   :  { %3452 = vmatpush1.bf16.msra.mxu0 %v7342_v15  ;;  %3493 = vmatpush1.bf16.msra.mxu1 %v7343_v31  ;;  %v3521_v15 = vld [vmem:[#allocation5 + $0x30] sm:$0x30] }
 0x948   :  { %3570 = vmatprep.subr.bf16.mxu0 %v4648_v49  ;;  %3611 = vmatprep.subr.bf16.mxu1 %v4649_v36  ;;  %v3522_v36 = vld [vmem:[#allocation5 + $0x38] sm:$0x30] }
 0x9bd   :  { %v3145_v16 = vpop.f32.mrb[64].mxu0  ;;  %v3186_v55 = vpop.f32.mrb[60].mxu1 }
 0x9be   :  { %v3147_v13 = vpop.f32.mrb[65].mxu0  ;;  %v3188_v26 = vpop.f32.mrb[61].mxu1 }
 0x9bf   :  { %v3149_v9 = vpop.f32.mrb[66].mxu0  ;;  %v3190_v12 = vpop.f32.mrb[62].mxu1 }
 0x9c0   :  { %v3150_v47 = vpop.f32.mrb[67].mxu0  ;;  %v3191_v33 = vpop.f32.mrb[63].mxu1 }
 0x9dd   :  { %v3278_v43 = vpop.f32.mrb[68].mxu0  ;;  %v3319_v41 = vpop.f32.mrb[64].mxu1 }
 0x9de   :  { %v3527_v61 = vrot.slane %v3278_v43, 4  ;;  %v3280_v28 = vpop.f32.mrb[69].mxu0  ;;  %v3321_v25 = vpop.f32.mrb[65].mxu1  ;;  %v3529_v18 = vrot.slane %v3319_v41, 4  ;;  %v3559_v41 = vrot.slane %v6459_v40, 6 }
 0x9df   :  { %v3528_v42 = vrot.slane %v3280_v28, 4  ;;  %v3282_v27 = vpop.f32.mrb[70].mxu0  ;;  %v3323_v52 = vpop.f32.mrb[66].mxu1  ;;  %v3530_v31 = vrot.slane %v3321_v25, 4 }
 0x9e0   :  { %v3535_v6 = vadd.f32 %v3527_v61, %v3519_v34  ;;  %v3283_v5 = vpop.f32.mrb[71].mxu0  ;;  %v3324_v14 = vpop.f32.mrb[67].mxu1  ;;  %v3537_v49 = vadd.f32 %v3529_v18, %v3521_v15 }
 0x9e1   :  { %v3536_v22 = vadd.f32 %v3528_v42, %v3520_v57  ;;  %v3538_v9 = vadd.f32 %v3530_v31, %v3522_v36 }
 0x9e2   :  { %v4173_v37 = vmul.f32 -1.442695, %v3535_v6  ;;  %v4175_v12 = vmul.f32 -1.442695, %v3537_v49 }
 0x9e3   :  { %v4174_v23 = vmul.f32 -1.442695, %v3536_v22 }
 0x9e4   :  { %4444 = vpow2.f32 %v4173_v37 }
 0x9e5   :  { %4446 = vpow2.f32 %v4174_v23 }
 0x9e6   :  { %4448 = vtanh.f32 %v3538_v9 }
 0x9e7   :  { %4450 = vpow2.f32 %v4175_v12 }
 0x9ee   :  { %v4445_v47 = vpop.eup %4444 }
 0x9ef   :  { %v3548_v33 = vadd.f32 1.0, %v4445_v47  ;;  %v4447_v43 = vpop.eup %4446 }
 0x9f0   :  { %v3549_v34 = vadd.f32 1.0, %v4447_v43  ;;  %v4449_v61 = vpop.eup %4448 }
 0x9f1   :  { %4452 = vrcp.f32 %v3548_v33  ;;  %v4451_v28 = vpop.eup %4450 }
 0x9f2   :  { %4454 = vrcp.f32 %v3549_v34  ;;  %v3550_v25 = vadd.f32 1.0, %v4451_v28 }
 0x9f4   :  { %4456 = vrcp.f32 %v3550_v25 }
 0x9fb   :  { %v4453_v57 = vpop.eup %4452 }
 0x9fc   :  { %v3562_v42 = vmul.f32 %v4453_v57, %v4449_v61  ;;  %v4455_v27 = vpop.eup %4454 }
 0x9fd   :  { %v3360_v52 = vpop.f32.mrb[72].mxu0  ;;  %v3401_v6 = vpop.f32.mrb[68].mxu1  ;;  %v3561_v5 = vmul.f32 %v4455_v27, %v3559_v41 }
 0x9fe   :  { %v3361_v14 = vadd.f32 %v3360_v52, %v3145_v16  ;;  %v3402_v22 = vadd.f32 %v3401_v6, %v3186_v55  ;;  %v3362_v37 = vpop.f32.mrb[73].mxu0  ;;  %v3403_v23 = vpop.f32.mrb[69].mxu1 }
 0x9ff   :  { %v3363_v18 = vadd.f32 %v3362_v37, %v3147_v13  ;;  %v3404_v15 = vadd.f32 %v3403_v23, %v3188_v26  ;;  %v3364_v31 = vpop.f32.mrb[74].mxu0  ;;  %v3405_v49 = vpop.f32.mrb[70].mxu1  ;;  %v6631_v36 = vadd.f32 %v3562_v42, %v3561_v5 }
 0xa00   :  { %v3408_v9 = vadd.f32 %v3361_v14, %v5787_v3  ;;  %v3365_v12 = vpop.f32.mrb[75].mxu0  ;;  %v3406_v40 = vpop.f32.mrb[71].mxu1  ;;  %v3410_v55 = vadd.f32 %v3402_v22, %v5799_v44  ;;  %v4650_v49 = vld [vmem:[#allocation3 + $0x10] sm:$0xff] }
 0xa01   :  { %v3409_v47 = vadd.f32 %v3363_v18, %v5791_v1  ;;  %4458 = vtanh.f32 %v6631_v36  ;;  %v4457_v13 = vpop.eup %4456  ;;  %v3411_v26 = vadd.f32 %v3404_v15, %v5805_v2  ;;  %v4653_v12 = vld [vmem:[#allocation3 + $0x58] sm:$0xff]  ;;  %v4656_v40 = vld [vmem:[#allocation3 + $0x70] sm:$0xff] }
 0xa02   :  { %v4170_v33 = vmul.f32 -1.442695, %v3408_v9  ;;  %v4172_v34 = vmul.f32 -1.442695, %v3410_v55  ;;  %v4651_v9 = vld [vmem:[#allocation3 + $0x38] sm:$0xff] }
 0xa03   :  { %v4171_v16 = vmul.f32 -1.442695, %v3409_v47  ;;  %v4662_v47 = vld [vmem:[#allocation3 + $0xc0] sm:$0xff] }
 0xa04   :  { %4460 = vpow2.f32 %v4170_v33  ;;  %v4664_v33 = vld [vmem:[#allocation3 + $0xe8] sm:$0xff] }
 0xa05   :  { %4462 = vpow2.f32 %v4171_v16  ;;  %v4666_v16 = vld [vmem:[#allocation3 + $0xe0] sm:$0xff] }
 0xa06   :  { %4464 = vtanh.f32 %v3411_v26  ;;  %v6668_v26 = vld [vmem:[#allocation2 + $0x28] sm:$0xff] }
 0xa07   :  { %4466 = vpow2.f32 %v4172_v34  ;;  %v6678_v34 = vld [vmem:[#allocation2 + $0x48] sm:$0xff] }
 0xa0b   :  { %v4459_v43 = vpop.eup %4458 }
 0xa0c   :  { %v6638_v61 = vmul.f32 %v4459_v43, %v4457_v13  ;;  %v6660_v13 = vld [vmem:[#allocation2 + $0x8] sm:$0xff]  ;;  %v6674_v43 = vld [vmem:[#allocation2 + $0x20] sm:$0xff] }
 0xa0e   :  { %v4461_v28 = vpop.eup %4460 }
 0xa0f   :  { %v3421_v57 = vadd.f32 1.0, %v4461_v28  ;;  %v4463_v41 = vpop.eup %4462  ;;  %v6686_v28 = vld [vmem:[#allocation2 + $0x68] sm:$0xff] }
 0xa10   :  { %v3422_v42 = vadd.f32 1.0, %v4463_v41  ;;  %v4465_v27 = vpop.eup %4464  ;;  %v6694_v41 = vld [vmem:[#allocation2 + $0x88] sm:$0xff] }
 0xa11   :  { %4468 = vrcp.f32 %v3421_v57  ;;  %v4467_v25 = vpop.eup %4466  ;;  %v6690_v57 = vld [vmem:[#allocation2 + $0x60] sm:$0xff] }
 0xa12   :  { %4470 = vrcp.f32 %v3422_v42  ;;  %v3423_v14 = vadd.f32 1.0, %v4467_v25  ;;  %v6698_v42 = vld [vmem:[#allocation2 + $0x80] sm:$0xff] }
 0xa13   :  { %v6706_v25 = vld [vmem:[#allocation2 + $0xa0] sm:$0xff] }
 0xa14   :  { %4472 = vrcp.f32 %v3423_v14  ;;  %v6722_v14 = vld [vmem:[#allocation2 + $0xe0] sm:$0xff] }
 0xa1b   :  { %v4469_v52 = vpop.eup %4468 }
 0xa1c   :  { %v3432_v6 = vmul.f32 %v4469_v52, %v4465_v27  ;;  %v4471_v5 = vpop.eup %4470  ;;  %v6702_v27 = vld [vmem:[#allocation2 + $0xa8] sm:$0xff] }
 0xa1d   :  { %v3431_v22 = vmul.f32 %v4471_v5, %v6469_v39  ;;  %v4652_v39 = vld [vmem:[#allocation3 + $0x30] sm:$0xff]  ;;  %v6710_v52 = vld [vmem:[#allocation2 + $0xc8] sm:$0xff] }
 0xa1e   :  { %v4473_v23 = vpop.eup %4472  ;;  %v6718_v5 = vld [vmem:[#allocation2 + $0xe8] sm:$0xff] }
 0xa1f   :  { %v6641_v37 = vadd.f32 %v3432_v6, %v3431_v22  ;;  %v6714_v6 = vld [vmem:[#allocation2 + $0xc0] sm:$0xff]  ;;  %v4684_v22 = vld [vmem:[#allocation4 + $0x8] sm:$0xff] }
 0xa21   :  { %4474 = vtanh.f32 %v6641_v37 }
 0xa2b   :  { %v4475_v18 = vpop.eup %4474 }
 0xa2c   :  { %v3435_v15 = vmul.f32 %v4475_v18, %v4473_v23  ;;  %v4685_v23 = vld [vmem:[#allocation4 + $0x18] sm:$0xff]  ;;  %v4686_v18 = vld [vmem:[#allocation4] sm:$0xff] }
 0xa2e   :  { %v3436_v31 = vpack.c.bf16 %v3435_v15, %v3435_v15  ;;  %v4687_v15 = vld [vmem:[#allocation4 + $0x10] sm:$0xff] }
 0xa30   :  { %3470 = vmatmul.mubr.bf16.vlgmr.msra.gmra.mrb[76].mxu0 %v3436_v31  ;;  %3511 = vmatmul.mubr.bf16.vlgmr.msra.gmra.mrb[72].mxu1 %v3436_v31  ;;  %v4688_v31 = vld [vmem:[#allocation4 + $0x28] sm:$0xff] }
 0xa31   :  { %3571 = vmatpush1.bf16.msra.mxu0 %v6472_v54  ;;  %3612 = vmatpush1.bf16.msra.mxu1 %v4650_v49  ;;  %v4654_v54 = vld [vmem:[#allocation3 + $0x50] sm:$0xff]  ;;  %v4689_v49 = vld [vmem:[#allocation4 + $0x38] sm:$0xff] }
 0xa32   :  { %3572 = vmatprep.subr.bf16.mxu0 %v6476_v4  ;;  %3613 = vmatprep.subr.bf16.mxu1 %v4651_v9  ;;  %v4655_v4 = vld [vmem:[#allocation3 + $0x78] sm:$0xff]  ;;  %v4690_v9 = vld [vmem:[#allocation4 + $0x20] sm:$0xff] }
 0xa33   :  { %3602 = vmatprep.mubr.bf16.mxu0 %v7045_v60  ;;  %3643 = vmatprep.mubr.bf16.mxu1 %v7045_v60 }
 0xa35   :  { %3573 = vmatpush1.bf16.msra.mxu0 %v6482_v21  ;;  %3614 = vmatpush1.bf16.msra.mxu1 %v4652_v39  ;;  %v4657_v21 = vld [vmem:[#allocation3 + $0x98] sm:$0xff]  ;;  %v4691_v39 = vld [vmem:[#allocation4 + $0x30] sm:$0xff] }
 0xa36   :  { %3574 = vmatprep.subr.bf16.mxu0 %v6486_v32  ;;  %3615 = vmatprep.subr.bf16.mxu1 %v4653_v12  ;;  %v4658_v32 = vld [vmem:[#allocation3 + $0x90] sm:$0xff]  ;;  %v4692_v12 = vld [vmem:[#allocation4 + $0x48] sm:$0xff] }
 0xa39   :  { %3575 = vmatpush1.bf16.msra.mxu0 %v6490_v46  ;;  %3616 = vmatpush1.bf16.msra.mxu1 %v4654_v54  ;;  %v4659_v46 = vld [vmem:[#allocation3 + $0xb8] sm:$0xff] }
 0xa3a   :  { %3576 = vmatprep.subr.bf16.mxu0 %v6494_v0  ;;  %3617 = vmatprep.subr.bf16.mxu1 %v4655_v4  ;;  %v4660_v0 = vld [vmem:[#allocation3 + $0xb0] sm:$0xff]  ;;  %v4693_v54 = vld [vmem:[#allocation4 + $0x58] sm:$0xff]  ;;  %v4694_v4 = vld [vmem:[#allocation4 + $0x40] sm:$0xff] }
 0xa3d   :  { %3577 = vmatpush1.bf16.msra.mxu0 %v6498_v7  ;;  %3618 = vmatpush1.bf16.msra.mxu1 %v4656_v40  ;;  %v4661_v7 = vld [vmem:[#allocation3 + $0xd8] sm:$0xff]  ;;  %v4695_v40 = vld [vmem:[#allocation4 + $0x50] sm:$0xff] }
 0xa3e   :  { %3578 = vmatprep.subr.bf16.mxu0 %v6502_v35  ;;  %3619 = vmatprep.subr.bf16.mxu1 %v4657_v21  ;;  %v4663_v35 = vld [vmem:[#allocation3 + $0xd0] sm:$0xff]  ;;  %v4696_v21 = vld [vmem:[#allocation4 + $0x68] sm:$0xff] }
 0xa41   :  { %3579 = vmatpush1.bf16.msra.mxu0 %v6506_v10  ;;  %3620 = vmatpush1.bf16.msra.mxu1 %v4658_v32  ;;  %v4665_v10 = vld [vmem:[#allocation3 + $0xf8] sm:$0xff] }
 0xa42   :  { %3580 = vmatprep.subr.bf16.mxu0 %v6510_v38  ;;  %3621 = vmatprep.subr.bf16.mxu1 %v4659_v46  ;;  %v3566_v38 = vpack.c.bf16 %v6638_v61, %v6638_v61  ;;  %v6682_v61 = vld [vmem:[#allocation2 + $0x40] sm:$0xff]  ;;  %v4697_v32 = vld [vmem:[#allocation4 + $0x78] sm:$0xff] }
 0xa43   :  { %v4698_v46 = vld [vmem:[#allocation4 + $0x60] sm:$0xff] }
 0xa44   :  { %v3568_v55 = vrot.slane %v3566_v38, 2  ;;  %v4705_v38 = vld [vmem:[#allocation4 + $0xb8] sm:$0xff] }
 0xa45   :  { %3581 = vmatpush1.bf16.msra.mxu0 %v6514_v58  ;;  %3622 = vmatpush1.bf16.msra.mxu1 %v4660_v0  ;;  %v4667_v58 = vld [vmem:[#allocation3 + $0xf0] sm:$0xff] }
 0xa46   :  { %3582 = vmatprep.subr.bf16.mxu0 %v6518_v62  ;;  %3623 = vmatprep.subr.bf16.mxu1 %v4661_v7  ;;  %v6664_v62 = vld [vmem:[#allocation2] sm:$0xff]  ;;  %v4699_v0 = vld [vmem:[#allocation4 + $0x70] sm:$0xff]  ;;  %v4700_v7 = vld [vmem:[#allocation4 + $0x88] sm:$0xff] }
 0xa49   :  { %3583 = vmatpush1.bf16.msra.mxu0 %v4662_v47  ;;  %3624 = vmatpush1.bf16.msra.mxu1 %v4663_v35  ;;  %v4701_v47 = vld [vmem:[#allocation4 + $0x98] sm:$0xff]  ;;  %v4702_v35 = vld [vmem:[#allocation4 + $0x80] sm:$0xff] }
 0xa4a   :  { %3584 = vmatprep.subr.bf16.mxu0 %v4664_v33  ;;  %3625 = vmatprep.subr.bf16.mxu1 %v4665_v10  ;;  %v4703_v33 = vld [vmem:[#allocation4 + $0x90] sm:$0xff]  ;;  %v4704_v10 = vld [vmem:[#allocation4 + $0xa8] sm:$0xff] }
 0xa4d   :  { %3585 = vmatpush1.bf16.msra.mxu0 %v4666_v16  ;;  %3626 = vmatpush1.bf16.msra.mxu1 %v4667_v58  ;;  %v4706_v16 = vld [vmem:[#allocation4 + $0xa0] sm:$0xff]  ;;  %v4707_v58 = vld [vmem:[#allocation4 + $0xb0] sm:$0xff] }
 0xa4e   :  { %3652 = vmatprep.subr.bf16.mxu0 %v6660_v13  ;;  %3693 = vmatprep.subr.bf16.mxu1 %v6531_v53 }
 0xa50   :  { %3603 = vmatmul.mubr.bf16.vlgmr.msra.gmra.mrb[80].mxu0 %v3568_v55  ;;  %3644 = vmatmul.mubr.bf16.vlgmr.msra.gmra.mrb[76].mxu1 %v3568_v55 }
 0xa51   :  { %3653 = vmatpush1.bf16.msra.mxu0 %v6664_v62  ;;  %3694 = vmatpush1.bf16.msra.mxu1 %v6535_v48 }
 0xa52   :  { %3654 = vmatprep.subr.bf16.mxu0 %v6668_v26  ;;  %3695 = vmatprep.subr.bf16.mxu1 %v6539_v59 }
 0xa53   :  { %3684 = vmatprep.mubr.bf16.mxu0 %v7045_v60  ;;  %3725 = vmatprep.mubr.bf16.mxu1 %v7045_v60 }
 0xa55   :  { %3655 = vmatpush1.bf16.msra.mxu0 %v6674_v43  ;;  %3696 = vmatpush1.bf16.msra.mxu1 %v6545_v50 }
 0xa56   :  { %3656 = vmatprep.subr.bf16.mxu0 %v6678_v34  ;;  %3697 = vmatprep.subr.bf16.mxu1 %v6549_v63 }
 0xa59   :  { %3657 = vmatpush1.bf16.msra.mxu0 %v6682_v61  ;;  %3698 = vmatpush1.bf16.msra.mxu1 %v6553_v11 }
 0xa5a   :  { %3658 = vmatprep.subr.bf16.mxu0 %v6686_v28  ;;  %3699 = vmatprep.subr.bf16.mxu1 %v6557_v24 }
 0xa5d   :  { %3659 = vmatpush1.bf16.msra.mxu0 %v6690_v57  ;;  %3700 = vmatpush1.bf16.msra.mxu1 %v6561_v29 }
 0xa5e   :  { %3660 = vmatprep.subr.bf16.mxu0 %v6694_v41  ;;  %3701 = vmatprep.subr.bf16.mxu1 %v6565_v56 }
 0xa61   :  { %3661 = vmatpush1.bf16.msra.mxu0 %v6698_v42  ;;  %3702 = vmatpush1.bf16.msra.mxu1 %v6569_v20 }
 0xa62   :  { %3662 = vmatprep.subr.bf16.mxu0 %v6702_v27  ;;  %3703 = vmatprep.subr.bf16.mxu1 %v6573_v30 }
 0xa65   :  { %3663 = vmatpush1.bf16.msra.mxu0 %v6706_v25  ;;  %3704 = vmatpush1.bf16.msra.mxu1 %v6577_v8 }
 0xa66   :  { %3664 = vmatprep.subr.bf16.mxu0 %v6710_v52  ;;  %3705 = vmatprep.subr.bf16.mxu1 %v6581_v17 }
 0xa69   :  { %3665 = vmatpush1.bf16.msra.mxu0 %v6714_v6  ;;  %3706 = vmatpush1.bf16.msra.mxu1 %v6585_v19 }
 0xa6a   :  { %3666 = vmatprep.subr.bf16.mxu0 %v6718_v5  ;;  %3707 = vmatprep.subr.bf16.mxu1 %v6589_v45 }
 0xa6d   :  { %3667 = vmatpush1.bf16.msra.mxu0 %v6722_v14  ;;  %3708 = vmatpush1.bf16.msra.mxu1 %v6593_v51 }
 0xa6e   :  { %3763 = vmatprep.subr.bf16.mxu0 %v4684_v22  ;;  %3804 = vmatprep.subr.bf16.mxu1 %v4685_v23  ;;  %v4709_v22 = vld [vmem:[#allocation4 + $0xd8] sm:$0xff]  ;;  %v4710_v23 = vld [vmem:[#allocation4 + $0xc0] sm:$0xff] }
 0xa70   :  { %3685 = vmatmul.mubr.bf16.vlgmr.msra.gmra.mrb[84].mxu0 %v3568_v55  ;;  %3726 = vmatmul.mubr.bf16.vlgmr.msra.gmra.mrb[80].mxu1 %v3568_v55  ;;  %v4708_v55 = vld [vmem:[#allocation4 + $0xc8] sm:$0xff] }
 0xa71   :  { %3764 = vmatpush1.bf16.msra.mxu0 %v4686_v18  ;;  %3805 = vmatpush1.bf16.msra.mxu1 %v4687_v15  ;;  %v4711_v18 = vld [vmem:[#allocation4 + $0xd0] sm:$0xff]  ;;  %v4712_v15 = vld [vmem:[#allocation4 + $0xe8] sm:$0xff] }
 0xa72   :  { %3765 = vmatprep.subr.bf16.mxu0 %v4688_v31  ;;  %3806 = vmatprep.subr.bf16.mxu1 %v4689_v49  ;;  %v4713_v31 = vld [vmem:[#allocation4 + $0xf8] sm:$0xff]  ;;  %v4714_v49 = vld [vmem:[#allocation4 + $0xe0] sm:$0xff] }
 0xa73   :  { %3795 = vmatprep.mubr.bf16.mxu0 %v7045_v60  ;;  %3836 = vmatprep.mubr.bf16.mxu1 %v7045_v60 }
 0xa75   :  { %3766 = vmatpush1.bf16.msra.mxu0 %v4690_v9  ;;  %3807 = vmatpush1.bf16.msra.mxu1 %v4691_v39  ;;  %v4715_v9 = vld [vmem:[#allocation4 + $0xf0] sm:$0xff] }
 0xa76   :  { %3767 = vmatprep.subr.bf16.mxu0 %v4692_v12  ;;  %3808 = vmatprep.subr.bf16.mxu1 %v4693_v54 }
 0xa79   :  { %3768 = vmatpush1.bf16.msra.mxu0 %v4694_v4  ;;  %3809 = vmatpush1.bf16.msra.mxu1 %v4695_v40 }
 0xa7a   :  { %3769 = vmatprep.subr.bf16.mxu0 %v4696_v21  ;;  %3810 = vmatprep.subr.bf16.mxu1 %v4697_v32 }
 0xa7d   :  { %3770 = vmatpush1.bf16.msra.mxu0 %v4698_v46  ;;  %3811 = vmatpush1.bf16.msra.mxu1 %v4699_v0 }
 0xa7e   :  { %3771 = vmatprep.subr.bf16.mxu0 %v4700_v7  ;;  %3812 = vmatprep.subr.bf16.mxu1 %v4701_v47  ;;  %v3845_v7 = vld [vmem:[#allocation5 + $0x20] sm:$0xc0] }
 0xa81   :  { %3772 = vmatpush1.bf16.msra.mxu0 %v4702_v35  ;;  %3813 = vmatpush1.bf16.msra.mxu1 %v4703_v33 }
 0xa82   :  { %3773 = vmatprep.subr.bf16.mxu0 %v4704_v10  ;;  %3814 = vmatprep.subr.bf16.mxu1 %v4705_v38  ;;  %v3846_v10 = vld [vmem:[#allocation5 + $0x28] sm:$0xc0] }
 0xa85   :  { %3774 = vmatpush1.bf16.msra.mxu0 %v4706_v16  ;;  %3815 = vmatpush1.bf16.msra.mxu1 %v4707_v58 }
 0xa86   :  { %3775 = vmatprep.subr.bf16.mxu0 %v4708_v55  ;;  %3816 = vmatprep.subr.bf16.mxu1 %v4709_v22 }
 0xa89   :  { %3776 = vmatpush1.bf16.msra.mxu0 %v4710_v23  ;;  %3817 = vmatpush1.bf16.msra.mxu1 %v4711_v18 }
 0xa8a   :  { %3777 = vmatprep.subr.bf16.mxu0 %v4712_v15  ;;  %3818 = vmatprep.subr.bf16.mxu1 %v4713_v31 }
 0xa8d   :  { %3778 = vmatpush1.bf16.msra.mxu0 %v4714_v49  ;;  %3819 = vmatpush1.bf16.msra.mxu1 %v4715_v9  ;;  %v3847_v49 = vld [vmem:[#allocation5 + $0x30] sm:$0xc0] }
 0xa8e   :  { %3896 = vmatprep.subr.bf16.mxu0 %v6660_v13  ;;  %3937 = vmatprep.subr.bf16.mxu1 %v6531_v53 }
 0xb03   :  { %v3471_v39 = vpop.f32.mrb[76].mxu0  ;;  %v3512_v12 = vpop.f32.mrb[72].mxu1 }
 0xb04   :  { %v3473_v54 = vpop.f32.mrb[77].mxu0  ;;  %v3514_v4 = vpop.f32.mrb[73].mxu1 }
 0xb05   :  { %v3475_v40 = vpop.f32.mrb[78].mxu0  ;;  %v3516_v21 = vpop.f32.mrb[74].mxu1 }
 0xb06   :  { %v3476_v32 = vpop.f32.mrb[79].mxu0  ;;  %v3517_v46 = vpop.f32.mrb[75].mxu1  ;;  %v3848_v21 = vld [vmem:[#allocation5 + $0x38] sm:$0xc0] }
 0xb23   :  { %v3604_v0 = vpop.f32.mrb[80].mxu0  ;;  %v3645_v47 = vpop.f32.mrb[76].mxu1 }
 0xb24   :  { %v3853_v35 = vrot.slane %v3604_v0, 2  ;;  %v3606_v33 = vpop.f32.mrb[81].mxu0  ;;  %v3647_v38 = vpop.f32.mrb[77].mxu1  ;;  %v3855_v31 = vrot.slane %v3645_v47, 2  ;;  %v3885_v47 = vrot.slane %v6631_v36, 6 }
 0xb25   :  { %v3854_v16 = vrot.slane %v3606_v33, 2  ;;  %v3608_v58 = vpop.f32.mrb[82].mxu0  ;;  %v3649_v13 = vpop.f32.mrb[78].mxu1  ;;  %v3856_v9 = vrot.slane %v3647_v38, 2 }
 0xb26   :  { %v3861_v55 = vadd.f32 %v3853_v35, %v3845_v7  ;;  %v3609_v53 = vpop.f32.mrb[83].mxu0  ;;  %v3650_v22 = vpop.f32.mrb[79].mxu1  ;;  %v3863_v40 = vadd.f32 %v3855_v31, %v3847_v49 }
 0xb27   :  { %v3862_v23 = vadd.f32 %v3854_v16, %v3846_v10  ;;  %v3864_v32 = vadd.f32 %v3856_v9, %v3848_v21 }
 0xb28   :  { %v4179_v18 = vmul.f32 -1.442695, %v3861_v55  ;;  %v4181_v46 = vmul.f32 -1.442695, %v3863_v40 }
 0xb29   :  { %v4180_v15 = vmul.f32 -1.442695, %v3862_v23 }
 0xb2a   :  { %4476 = vpow2.f32 %v4179_v18 }
 0xb2b   :  { %4478 = vpow2.f32 %v4180_v15 }
 0xb2c   :  { %4480 = vtanh.f32 %v3864_v32 }
 0xb2d   :  { %4482 = vpow2.f32 %v4181_v46 }
 0xb34   :  { %v4477_v0 = vpop.eup %4476 }
 0xb35   :  { %v3874_v51 = vadd.f32 1.0, %v4477_v0  ;;  %v4479_v33 = vpop.eup %4478 }
 0xb36   :  { %v3875_v7 = vadd.f32 1.0, %v4479_v33  ;;  %v4481_v35 = vpop.eup %4480 }
 0xb37   :  { %4484 = vrcp.f32 %v3874_v51  ;;  %v4483_v10 = vpop.eup %4482 }
 0xb38   :  { %4486 = vrcp.f32 %v3875_v7  ;;  %v3876_v38 = vadd.f32 1.0, %v4483_v10 }
 0xb3a   :  { %4488 = vrcp.f32 %v3876_v38 }
 0xb41   :  { %v4485_v16 = vpop.eup %4484 }
 0xb42   :  { %v3888_v58 = vmul.f32 %v4485_v16, %v4481_v35  ;;  %v4487_v13 = vpop.eup %4486 }
 0xb43   :  { %v3686_v55 = vpop.f32.mrb[84].mxu0  ;;  %v3727_v53 = vpop.f32.mrb[80].mxu1  ;;  %v3887_v22 = vmul.f32 %v4487_v13, %v3885_v47 }
 0xb44   :  { %v3687_v23 = vadd.f32 %v3686_v55, %v3471_v39  ;;  %v3728_v18 = vadd.f32 %v3727_v53, %v3512_v12  ;;  %v3688_v15 = vpop.f32.mrb[85].mxu0  ;;  %v3729_v31 = vpop.f32.mrb[81].mxu1 }
 0xb45   :  { %v3689_v49 = vadd.f32 %v3688_v15, %v3473_v54  ;;  %v3730_v9 = vadd.f32 %v3729_v31, %v3514_v4  ;;  %v3690_v51 = vpop.f32.mrb[86].mxu0  ;;  %v3731_v40 = vpop.f32.mrb[82].mxu1  ;;  %v3889_v21 = vadd.f32 %v3888_v58, %v3887_v22 }
 0xb46   :  { %v3734_v32 = vadd.f32 %v3687_v23, %v5787_v3  ;;  %v3691_v46 = vpop.f32.mrb[87].mxu0  ;;  %v3732_v0 = vpop.f32.mrb[83].mxu1  ;;  %v3736_v39 = vadd.f32 %v3728_v18, %v5799_v44 }
 0xb47   :  { %v3735_v36 = vadd.f32 %v3689_v49, %v5791_v1  ;;  %4490 = vtanh.f32 %v3889_v21  ;;  %v4489_v12 = vpop.eup %4488  ;;  %v3737_v54 = vadd.f32 %v3730_v9, %v5805_v2 }
 0xb48   :  { %v4176_v33 = vmul.f32 -1.442695, %v3734_v32  ;;  %v4178_v35 = vmul.f32 -1.442695, %v3736_v39 }
 0xb49   :  { %v4177_v7 = vmul.f32 -1.442695, %v3735_v36 }
 0xb4a   :  { %4492 = vpow2.f32 %v4176_v33 }
 0xb4b   :  { %4494 = vpow2.f32 %v4177_v7 }
 0xb4c   :  { %4496 = vtanh.f32 %v3737_v54  ;;  %v4185_v54 = vld [vmem:[%s6793_s11] ss:$0 sm:$0xff] }
 0xb4d   :  { %4498 = vpow2.f32 %v4178_v35 }
 0xb51   :  { %v4491_v4 = vpop.eup %4490 }
 0xb52   :  { %v3891_v10 = vmul.f32 %v4491_v4, %v4489_v12 }
 0xb54   :  { %v4493_v16 = vpop.eup %4492 }
 0xb55   :  { %v3747_v47 = vadd.f32 1.0, %v4493_v16  ;;  %v4495_v58 = vpop.eup %4494  ;;  %v4186_v16 = vld [vmem:[#allocation7] ss:$0 sm:$0xff] }
 0xb56   :  { %v3748_v13 = vadd.f32 1.0, %v4495_v58  ;;  %v4497_v38 = vpop.eup %4496 }
 0xb57   :  { %4500 = vrcp.f32 %v3747_v47  ;;  %v4499_v55 = vpop.eup %4498 }
 0xb58   :  { %4502 = vrcp.f32 %v3748_v13  ;;  %v3749_v18 = vadd.f32 1.0, %v4499_v55 }
 0xb5a   :  { %4504 = vrcp.f32 %v3749_v18 }
 0xb61   :  { %v4501_v53 = vpop.eup %4500 }
 0xb62   :  { %v3758_v22 = vmul.f32 %v4501_v53, %v4497_v38  ;;  %v4503_v23 = vpop.eup %4502 }
 0xb63   :  { %v3757_v15 = vmul.f32 %v4503_v23, %v6641_v37 }
 0xb64   :  { %v4505_v49 = vpop.eup %4504 }
 0xb65   :  { %v6736_v31 = vadd.f32 %v3758_v22, %v3757_v15 }
 0xb67   :  { %4506 = vtanh.f32 %v6736_v31 }
 0xb71   :  { %v4507_v9 = vpop.eup %4506 }
 0xb72   :  { %v3761_v51 = vmul.f32 %v4507_v9, %v4505_v49 }
 0xb74   :  { %v3762_v40 = vpack.c.bf16 %v3761_v51, %v3761_v51 }
 0xb76   :  { %3796 = vmatmul.mubr.bf16.vlgmr.msra.gmra.mrb[88].mxu0 %v3762_v40  ;;  %3837 = vmatmul.mubr.bf16.vlgmr.msra.gmra.mrb[84].mxu1 %v3762_v40 }
 0xb77   :  { %3897 = vmatpush1.bf16.msra.mxu0 %v6664_v62  ;;  %3938 = vmatpush1.bf16.msra.mxu1 %v6535_v48  ;;  %v7344_v48 = vld [vmem:[#allocation26_spill] sm:$0xff] }
 0xb78   :  { %3898 = vmatprep.subr.bf16.mxu0 %v6668_v26  ;;  %3939 = vmatprep.subr.bf16.mxu1 %v6539_v59 }
 0xb79   :  { %3928 = vmatprep.mubr.bf16.mxu0 %v7045_v60  ;;  %3969 = vmatprep.mubr.bf16.mxu1 %v7045_v60  ;;  %v3892_v60 = vpack.c.bf16 %v3891_v10, %v3891_v10 }
 0xb7b   :  { %3899 = vmatpush1.bf16.msra.mxu0 %v6674_v43  ;;  %3940 = vmatpush1.bf16.msra.mxu1 %v6545_v50  ;;  %v3894_v59 = vrot.slane %v3892_v60, 3 }
 0xb7c   :  { %3900 = vmatprep.subr.bf16.mxu0 %v6678_v34  ;;  %3941 = vmatprep.subr.bf16.mxu1 %v6549_v63 }
 0xb7f   :  { %3901 = vmatpush1.bf16.msra.mxu0 %v6682_v61  ;;  %3942 = vmatpush1.bf16.msra.mxu1 %v6553_v11 }
 0xb80   :  { %3902 = vmatprep.subr.bf16.mxu0 %v6686_v28  ;;  %3943 = vmatprep.subr.bf16.mxu1 %v6557_v24 }
 0xb83   :  { %3903 = vmatpush1.bf16.msra.mxu0 %v6690_v57  ;;  %3944 = vmatpush1.bf16.msra.mxu1 %v6561_v29 }
 0xb84   :  { %3904 = vmatprep.subr.bf16.mxu0 %v6694_v41  ;;  %3945 = vmatprep.subr.bf16.mxu1 %v6565_v56 }
 0xb87   :  { %3905 = vmatpush1.bf16.msra.mxu0 %v6698_v42  ;;  %3946 = vmatpush1.bf16.msra.mxu1 %v6569_v20 }
 0xb88   :  { %3906 = vmatprep.subr.bf16.mxu0 %v6702_v27  ;;  %3947 = vmatprep.subr.bf16.mxu1 %v6573_v30 }
 0xb8b   :  { %3907 = vmatpush1.bf16.msra.mxu0 %v6706_v25  ;;  %3948 = vmatpush1.bf16.msra.mxu1 %v6577_v8 }
 0xb8c   :  { %3908 = vmatprep.subr.bf16.mxu0 %v6710_v52  ;;  %3949 = vmatprep.subr.bf16.mxu1 %v6581_v17 }
 0xb8f   :  { %3909 = vmatpush1.bf16.msra.mxu0 %v6714_v6  ;;  %3950 = vmatpush1.bf16.msra.mxu1 %v6585_v19 }
 0xb90   :  { %3910 = vmatprep.subr.bf16.mxu0 %v6718_v5  ;;  %3951 = vmatprep.subr.bf16.mxu1 %v6589_v45 }
 0xb93   :  { %3911 = vmatpush1.bf16.msra.mxu0 %v6722_v14  ;;  %3952 = vmatpush1.bf16.msra.mxu1 %v7344_v48 }
 0xb96   :  { %3929 = vmatmul.mubr.bf16.vlgmr.msra.gmra.mrb[92].mxu0 %v3894_v59  ;;  %3970 = vmatmul.mubr.bf16.vlgmr.msra.gmra.mrb[88].mxu1 %v3894_v59 }
 0xc49   :  { %v3797_v50 = vpop.f32.mrb[88].mxu0  ;;  %v3838_v63 = vpop.f32.mrb[84].mxu1 }
 0xc4a   :  { %v3799_v11 = vpop.f32.mrb[89].mxu0  ;;  %v3840_v24 = vpop.f32.mrb[85].mxu1 }
 0xc4b   :  { %v3801_v29 = vpop.f32.mrb[90].mxu0  ;;  %v3842_v56 = vpop.f32.mrb[86].mxu1 }
 0xc4c   :  { %v3802_v20 = vpop.f32.mrb[91].mxu0  ;;  %v3843_v30 = vpop.f32.mrb[87].mxu1 }
 0xc69   :  { %v3930_v8 = vpop.f32.mrb[92].mxu0  ;;  %v3971_v17 = vpop.f32.mrb[88].mxu1 }
 0xc6a   :  { %v3931_v19 = vadd.f32 %v3930_v8, %v3797_v50  ;;  %v3972_v45 = vadd.f32 %v3971_v17, %v3838_v63  ;;  %v3932_v37 = vpop.f32.mrb[93].mxu0  ;;  %v3973_v62 = vpop.f32.mrb[89].mxu1 }
 0xc6b   :  { %v3933_v26 = vadd.f32 %v3932_v37, %v3799_v11  ;;  %v3974_v43 = vadd.f32 %v3973_v62, %v3840_v24  ;;  %v3934_v34 = vpop.f32.mrb[94].mxu0  ;;  %v3975_v61 = vpop.f32.mrb[90].mxu1 }
 0xc6c   :  { %v3978_v28 = vadd.f32 %v3931_v19, %v5787_v3  ;;  %v3935_v57 = vpop.f32.mrb[95].mxu0  ;;  %v3976_v41 = vpop.f32.mrb[91].mxu1  ;;  %v3980_v52 = vadd.f32 %v3972_v45, %v5799_v44 }
 0xc6d   :  { %v3979_v42 = vadd.f32 %v3933_v26, %v5791_v1  ;;  %v3981_v6 = vadd.f32 %v3974_v43, %v5805_v2 }
 0xc6e   :  { %v4182_v27 = vmul.f32 -1.442695, %v3978_v28  ;;  %v4184_v5 = vmul.f32 -1.442695, %v3980_v52 }
 0xc6f   :  { %v4183_v25 = vmul.f32 -1.442695, %v3979_v42 }
 0xc70   :  { %4508 = vpow2.f32 %v4182_v27 }
 0xc71   :  { %4510 = vpow2.f32 %v4183_v25 }
 0xc72   :  { %4512 = vtanh.f32 %v3981_v6 }
 0xc73   :  { %4514 = vpow2.f32 %v4184_v5 }
 0xc7a   :  { %v4509_v14 = vpop.eup %4508 }
 0xc7b   :  { %v3991_v21 = vadd.f32 1.0, %v4509_v14  ;;  %v4511_v32 = vpop.eup %4510 }
 0xc7c   :  { %v3992_v3 = vadd.f32 1.0, %v4511_v32  ;;  %v4513_v46 = vpop.eup %4512 }
 0xc7d   :  { %4516 = vrcp.f32 %v3991_v21  ;;  %v4515_v0 = vpop.eup %4514 }
 0xc7e   :  { %4518 = vrcp.f32 %v3992_v3  ;;  %v3993_v7 = vadd.f32 1.0, %v4515_v0 }
 0xc80   :  { %4520 = vrcp.f32 %v3993_v7 }
 0xc87   :  { %v4517_v1 = vpop.eup %4516 }
 0xc88   :  { %v4002_v36 = vmul.f32 %v4517_v1, %v4513_v46  ;;  %v4519_v33 = vpop.eup %4518 }
 0xc89   :  { %v4001_v39 = vmul.f32 %v4519_v33, %v6736_v31 }
 0xc8a   :  { %v4521_v2 = vpop.eup %4520 }
 0xc8b   :  { %v4003_v44 = vadd.f32 %v4002_v36, %v4001_v39 }
 0xc8d   :  { %4522 = vtanh.f32 %v4003_v44 }
 0xc97   :  { %v4523_v12 = vpop.eup %4522 }
 0xc98   :  { %v4005_v4 = vmul.f32 %v4523_v12, %v4521_v2 }
 0xc9a   :  { %v4013_v35 = vmul.f32 %v4185_v54, %v4005_v4 }
 0xc9c   :  { %v4014_v10 = vsel %vm1091_vm2, %v4013_v35, 0.0 }
 0xc9d   :  { %4015 = vadd.xlane.f32.xlu0 %v4014_v10 }
 0xd2a   :  { %v4016_v47 = vpop.xlane.xlu0 %4015 }
 0xd2b   :  { %v4024_v58 = vadd.f32 %v4186_v16, %v4016_v47 }
 0xd2d   :  { %4026 = vst.msk [vmem:[%s6796_s14] sm:$0x3] %vm4025_vm4, %v4024_v58 }
 0xd2e   :  { %4035 = vsyncmov [#allocation6] }
 0xd31   :  { %s4036_s23 = vpop.sfrf %4035 }
 0xd32   :  { %p4187_p0 = scmp.ne.s32.totalorder %s4036_s23, 0 }
 0xd34   :  { %4040 = shalt.err (%p4187_p0)  }
 0xd35   :  { %4042 = vsyncmov [#allocation6 + $0x1] }
 0xd38   :  { %s4043_s5 = vpop.sfrf %4042 }
 0xd39   :  { %p4188_p1 = scmp.ne.s32.totalorder %s4043_s5, 0 }
 0xd3b   :  { %4047 = shalt.err (%p4188_p1)  }
 0xd3c   :  { %4049 = vsyncmov [#allocation6 + $0x2] }
 0xd3f   :  { %s4050_s11 = vpop.sfrf %4049 }
 0xd40   :  { %p4189_p2 = scmp.ne.s32.totalorder %s4050_s11, 0 }
 0xd42   :  { %4054 = shalt.err (%p4189_p2)  }

</bundles_post_ra>
